<compile_context>
chip_gen: v7x
topology: tpu7x:2x2x1
jax: 0.10.0
libtpu: 0.0.40
codegen_flags: <defaults>
</compile_context>

<pallas_src>
import functools

import numpy as np
import jax
import jax.numpy as jnp
from jax.experimental import pallas as pl
from jax.experimental.pallas import tpu as pltpu


def _vmem_limit_bytes():
    """Generation-aware VMEM budget with headroom for Mosaic internal scratch."""
    try:
        cap = int(pltpu.get_tpu_info().vmem_capacity_bytes)
    except Exception:
        cap = 64 * 1024 * 1024          # conservative fallback (works on v7x too)
    return min(cap * 3 // 4, 96 * 1024 * 1024)


def _denorm_project_kernel(trans_ref, b2_ref, xy_ref, imgs_ref, grids_ref,
                           w1_ref, b1_ref, w2_ref, out_ref,
                           *, img_w, img_h, nchan, ori_max, nview, contract_h):
    """One (batch, nbins-tile) grid step.  nbins tile lives on the lane axis.

    imgs_ref block is (1, V, C*kept, contract) where `contract` = max(H, W)
    (the MXU contraction axis) and `kept` = min(H, W) (applied on the VPU)."""
    tile_n = out_ref.shape[2]
    fw = float(img_w)
    fh = float(img_h)
    kept = img_w if contract_h else img_h

    # resize transform (do_transform) coefficients from SMEM.
    t00 = trans_ref[0, 0]; t01 = trans_ref[0, 1]; t02 = trans_ref[0, 2]
    t10 = trans_ref[1, 0]; t11 = trans_ref[1, 1]; t12 = trans_ref[1, 2]

    # loop-invariant index helpers (hoisted out of the view loop).
    h_iota = jax.lax.broadcasted_iota(jnp.int32, (img_h, tile_n), 0)   # image row y
    w_iota = jax.lax.broadcasted_iota(jnp.int32, (img_w, tile_n), 0)   # image col x

    def view_body(v, carry):
        s1, s2 = carry
        xy = jnp.clip(xy_ref[0, v], -1.0, ori_max)             # (2, tile_n)
        x = xy[0:1, :]
        y = xy[1:2, :]
        # do_transform (affine resize transform), then the normalise /
        # grid_sample(align_corners=True) round trip back to pixel coords.
        xt = x * t00 + y * t01 + t02
        yt = x * t10 + y * t11 + t12
        gx = xt / (fw - 1.0) * 2.0 - 1.0
        gy = yt / (fh - 1.0) * 2.0 - 1.0
        px = (gx + 1.0) * 0.5 * (fw - 1.0)
        py = (gy + 1.0) * 0.5 * (fh - 1.0)

        x0 = jnp.floor(px)
        y0 = jnp.floor(py)
        wx1 = px - x0
        wx0 = 1.0 - wx1
        wy1 = py - y0
        wy0 = 1.0 - wy1
        x0i = x0.astype(jnp.int32)
        y0i = y0.astype(jnp.int32)

        # zero-padding validity, separable: valid(x, y) == valid_x(x)*valid_y(y).
        vx0 = ((x0 >= 0.0) & (x0 <= fw - 1.0)).astype(jnp.float32)
        vx1 = ((x0 + 1.0 >= 0.0) & (x0 + 1.0 <= fw - 1.0)).astype(jnp.float32)
        vy0 = ((y0 >= 0.0) & (y0 <= fh - 1.0)).astype(jnp.float32)
        vy1 = ((y0 + 1.0 >= 0.0) & (y0 + 1.0 <= fh - 1.0)).astype(jnp.float32)

        # separable bilinear weights (no dense (tile_n, H*W) one-hot).
        wy_t = (jnp.where(h_iota == y0i, wy0 * vy0, 0.0)
                + jnp.where(h_iota == y0i + 1, wy1 * vy1, 0.0))    # (H, tile_n)
        wx_t = (jnp.where(w_iota == x0i, wx0 * vx0, 0.0)
                + jnp.where(w_iota == x0i + 1, wx1 * vx1, 0.0))    # (W, tile_n)

        w_mxu = wy_t if contract_h else wx_t                       # (contract, tile_n)
        w_vpu = wx_t if contract_h else wy_t                       # (kept, tile_n)

        img = imgs_ref[0, v]                                       # (C*kept, contract)
        # contraction over the larger spatial axis on the MXU (f32 accumulate);
        # kept-axis weights on the VPU; channel sum as a sublane-group reduce.
        r = jnp.dot(img, w_mxu.astype(img.dtype),
                    preferred_element_type=jnp.float32)            # (C*kept, tile_n)
        sample = jnp.sum(r.reshape(nchan, kept, tile_n) * w_vpu[None, :, :],
                         axis=1)                                   # (C, tile_n)
        return s1 + sample, s2 + sample * sample

    zeros = jnp.zeros((nchan, tile_n), jnp.float32)
    per_view_bytes = nchan * kept * tile_n * 4
    s1, s2 = jax.lax.fori_loop(0, nview, view_body, (zeros, zeros),
                               unroll=bool(per_view_bytes <= (1 << 20)))

    inv_v = 1.0 / float(nview)
    mean = s1 * inv_v
    # clamp fp-cancellation so exp(-Var) stays <= 1 like the direct formula.
    var = jnp.exp(-jnp.maximum(s2 * inv_v - mean * mean, 0.0))

    # TODO(synk): nerf_model.query_density is an external sub-module; it is
    # replaced here by a deterministic 2-layer MLP with softplus output.
    pts = grids_ref[0]                                             # (3, tile_n)
    feat = jnp.concatenate([pts, mean, var], axis=0)               # (3+2C, tile_n)
    h = jnp.dot(w1_ref[...], feat, preferred_element_type=jnp.float32) + b1_ref[...]
    h = jnp.maximum(h, 0.0)
    # final 1-wide projection as a VPU/XLU reduction (avoids an N=1 matmul).
    dens = jnp.sum(h * w2_ref[...], axis=0, keepdims=True) + b2_ref[0, 0]
    # numerically stable softplus.
    dens = jnp.maximum(dens, 0.0) + jnp.log(1.0 + jnp.exp(-jnp.abs(dens)))
    out_ref[...] = (1.0 - jnp.exp(-dens))[None]                    # (1, 1, tile_n)


def denorm_project_pallas(trans, xy_proj, imgs, grids, w1, b1, w2, b2,
                          cube_size, ori_max, *, tile_n=1024,
                          sample_dtype=jnp.bfloat16):
    """trans:   (2, 3)            resize transform (ori image -> network image)
       xy_proj: (B, V, nbins, 2)  raw projected pixel coords (original frame)
       imgs:    (B, V, H, W, C)   per-view network-resolution images (NHWC)
       grids:   (B, nbins, 3)     world-space sample points
       w1,b1,w2,b2: density-MLP params, w1: (3+2C, HID)."""
    B, V, nbins, _ = xy_proj.shape
    H, W, C = imgs.shape[2], imgs.shape[3], imgs.shape[4]
    f_in, hid = w1.shape
    assert f_in == 3 + 2 * C
    assert nbins == cube_size[0] * cube_size[1] * cube_size[2]

    tile_n = min(tile_n, nbins)
    assert nbins % tile_n == 0
    if tile_n < nbins:
        assert tile_n % 128 == 0, "nbins tile must be lane-aligned"
    nt = nbins // tile_n

    # lane-dense layouts: the nbins tile lives on the last (lane) axis everywhere.
    xy_t = jnp.swapaxes(xy_proj, 2, 3)                      # (B, V, 2, nbins)
    grids_t = jnp.swapaxes(grids, 1, 2)                     # (B, 3, nbins)

    # MXU contracts over the larger spatial axis; the smaller one stays on the
    # VPU side.  TODO(synk): hoist this re-layout (one HBM pass over all view
    # images) out of the call when the same images feed many cubes.
    contract_h = H >= W
    if contract_h:
        imgs_lay = jnp.transpose(imgs, (0, 1, 4, 3, 2)).reshape(B, V, C * W, H)
        contract, kept = H, W
    else:
        imgs_lay = jnp.transpose(imgs, (0, 1, 4, 2, 3)).reshape(B, V, C * H, W)
        contract, kept = W, H
    imgs_lay = imgs_lay.astype(sample_dtype)

    # first MLP layer transposed so nbins stays on the lane axis; feature order
    # matches the in-kernel [pts; mean; var] stack.
    w1t = jnp.asarray(w1, jnp.float32).T                    # (hid, 3+2C)
    b1c = jnp.asarray(b1, jnp.float32).reshape(hid, 1)
    w2c = jnp.asarray(w2, jnp.float32).reshape(hid, 1)
    b2c = jnp.asarray(b2, jnp.float32).reshape(1, 1)
    trans = jnp.asarray(trans, jnp.float32)

    kernel = functools.partial(_denorm_project_kernel, img_w=W, img_h=H,
                               nchan=C, ori_max=float(ori_max), nview=V,
                               contract_h=contract_h)

    out = pl.pallas_call(
        kernel,
        out_shape=jax.ShapeDtypeStruct((B, 1, nbins), jnp.float32),
        grid=(B, nt),      # nbins tiles innermost: the image block (index_map
                           # depends on b only) is DMA'd once per batch.
        in_specs=[
            pl.BlockSpec(memory_space=pltpu.MemorySpace.SMEM),            # trans (2,3)
            pl.BlockSpec(memory_space=pltpu.MemorySpace.SMEM),            # b2 (1,1)
            pl.BlockSpec((1, V, 2, tile_n), lambda b, n: (b, 0, 0, n)),   # xy
            pl.BlockSpec((1, V, C * kept, contract),
                         lambda b, n: (b, 0, 0, 0)),                      # imgs (b only)
            pl.BlockSpec((1, 3, tile_n), lambda b, n: (b, 0, n)),         # grids
            pl.BlockSpec((hid, f_in), lambda b, n: (0, 0)),               # w1.T
            pl.BlockSpec((hid, 1), lambda b, n: (0, 0)),                  # b1
            pl.BlockSpec((hid, 1), lambda b, n: (0, 0)),                  # w2
        ],
        out_specs=pl.BlockSpec((1, 1, tile_n), lambda b, n: (b, 0, n)),
        compiler_params=pltpu.CompilerParams(
            dimension_semantics=("parallel", "parallel"),
            # generation-aware budget: ~48 MiB on v7x (64 MiB physical/TC),
            # ~96 MiB on v5e/v6e (128 MiB physical).
            vmem_limit_bytes=_vmem_limit_bytes()),
    )(trans, b2c, xy_t, imgs_lay, grids_t, w1t, b1c, w2c)
    return out.reshape(B, 1, cube_size[0], cube_size[1], cube_size[2])


def _reference(xy_proj, imgs, grids, trans, w1, b1, w2, b2, ori_max, cube):
    """Pure numpy reference of the same forward pass."""
    B, V, N, _ = xy_proj.shape
    H, W, C = imgs.shape[2], imgs.shape[3], imgs.shape[4]
    outs = []
    for b in range(B):
        samples = []
        for v in range(V):
            xy = np.clip(xy_proj[b, v], -1.0, ori_max)
            x, y = xy[:, 0], xy[:, 1]
            xt = trans[0, 0] * x + trans[0, 1] * y + trans[0, 2]
            yt = trans[1, 0] * x + trans[1, 1] * y + trans[1, 2]
            gx = xt / (W - 1.0) * 2.0 - 1.0
            gy = yt / (H - 1.0) * 2.0 - 1.0
            px = (gx + 1.0) * 0.5 * (W - 1.0)
            py = (gy + 1.0) * 0.5 * (H - 1.0)
            x0 = np.floor(px)
            y0 = np.floor(py)
            wx1 = px - x0
            wx0 = 1.0 - wx1
            wy1 = py - y0
            wy0 = 1.0 - wy1
            img = imgs[b, v]

            def samp(xc, yc, w):
                valid = (xc >= 0) & (xc <= W - 1) & (yc >= 0) & (yc <= H - 1)
                xi = np.clip(xc, 0, W - 1).astype(np.int64)
                yi = np.clip(yc, 0, H - 1).astype(np.int64)
                return img[yi, xi] * (w * valid)[:, None]

            s = (samp(x0, y0, wx0 * wy0) + samp(x0 + 1, y0, wx1 * wy0)
                 + samp(x0, y0 + 1, wx0 * wy1) + samp(x0 + 1, y0 + 1, wx1 * wy1))
            samples.append(s.astype(np.float32))
        S = np.stack(samples, -1)                  # (N, C, V)
        mean = S.sum(-1) / V
        var = ((S - mean[..., None]) ** 2).sum(-1) / V
        var = np.exp(-var)
        g = np.concatenate([mean, var], 1)
        feat = np.concatenate([grids[b], g], 1)
        h = np.maximum(feat @ w1 + b1, 0.0)
        d = h @ w2 + b2
        d = np.maximum(d, 0.0) + np.log1p(np.exp(-np.abs(d)))   # stable softplus
        alpha = 1.0 - np.exp(-d)
        outs.append(alpha.reshape(1, *cube))
    return np.stack(outs, 0).astype(np.float32)


if __name__ == "__main__":
    B, V, C = 2, 3, 4
    CUBE = (8, 8, 8)
    NBINS = CUBE[0] * CUBE[1] * CUBE[2]
    IMG_H = IMG_W = 16            # NETWORK.IMAGE_SIZE (== denorm image size here)
    ORI_H = ORI_W = 32            # NETWORK.ORI_IMAGE_SIZE
    # TODO(synk): torch.clamp uses a single bound max(ori_w, ori_h) for both
    # axes; kept as-is (over-permissive on one axis for non-square originals).
    ORI_MAX = float(max(ORI_W, ORI_H))
    HID = 32
    F_IN = 3 + 2 * C

    key = jax.random.PRNGKey(0)
    k_img, k_grid, k_w1, k_b1, k_w2 = jax.random.split(key, 5)

    imgs = jax.random.uniform(k_img, (B, V, IMG_H, IMG_W, C), jnp.float32)

    gxyz = jax.random.uniform(k_grid, (B, NBINS, 3), jnp.float32)
    grids = jnp.concatenate([gxyz[..., :2] * 6.0 - 3.0,
                             gxyz[..., 2:] * 4.0 + 8.0], axis=-1)

    # synthetic per-view pinhole cameras (meta[c]['camera'])
    Rs = jnp.stack([jnp.eye(3, dtype=jnp.float32)] * V)
    Ts = jnp.stack([jnp.array([0.6 * v - 0.6, 0.4 * v - 0.4, 0.0], jnp.float32)
                    for v in range(V)])
    fs = jnp.stack([jnp.array([20.0, 20.0], jnp.float32)] * V)
    cs = jnp.stack([jnp.array([ORI_W / 2.0, ORI_H / 2.0], jnp.float32)] * V)

    def project_pose(points, R, T, f, c):
        # TODO(synk): original project_pose also applies radial/tangential
        # distortion; a simple pinhole projection is used for this synthetic run.
        xcam = (points - T) @ R.T
        y = xcam[:, :2] / (xcam[:, 2:3] + 1e-5)
        return f * y + c

    xy_proj = jnp.stack([
        jnp.stack([project_pose(grids[b], Rs[v], Ts[v], fs[v], cs[v])
                   for v in range(V)], axis=0)
        for b in range(B)], axis=0)                       # (B, V, NBINS, 2)

    # resize transform (meta[0]['transform'][0]): ori image -> network image
    trans = jnp.array([[(IMG_W - 1.0) / (ORI_W - 1.0), 0.0, 0.0],
                       [0.0, (IMG_H - 1.0) / (ORI_H - 1.0), 0.0]], jnp.float32)

    # deterministic synthetic NeRF density-MLP parameters
    w1 = 0.3 * jax.random.normal(k_w1, (F_IN, HID), jnp.float32)
    b1 = 0.1 * jax.random.normal(k_b1, (1, HID), jnp.float32)
    w2 = 0.3 * jax.random.normal(k_w2, (HID, 1), jnp.float32)
    b2 = jnp.full((1, 1), 0.1, jnp.float32)

    ref = _reference(np.asarray(xy_proj), np.asarray(imgs), np.asarray(grids),
                     np.asarray(trans), np.asarray(w1), np.asarray(b1),
                     np.asarray(w2), np.asarray(b2), ORI_MAX, CUBE)

    # f32 sampling path: tight correctness check (single nbins tile per batch).
    out_f32 = denorm_project_pallas(trans, xy_proj, imgs, grids, w1, b1, w2, b2,
                                    CUBE, ORI_MAX, tile_n=NBINS,
                                    sample_dtype=jnp.float32)
    out_f32 = jax.block_until_ready(out_f32)
    assert out_f32.shape == (B, 1) + CUBE, out_f32.shape
    np.testing.assert_allclose(np.asarray(out_f32), ref, rtol=1e-3, atol=1e-3)

    # default performance path: bf16 MXU sampling operands + 2 nbins tiles
    # (production cubes should keep tile_n >= 512; 256 here just exercises tiling).
    out_bf16 = denorm_project_pallas(trans, xy_proj, imgs, grids, w1, b1, w2, b2,
                                     CUBE, ORI_MAX, tile_n=256)
    out_bf16 = jax.block_until_ready(out_bf16)
    assert out_bf16.shape == (B, 1) + CUBE, out_bf16.shape
    np.testing.assert_allclose(np.asarray(out_bf16), ref, rtol=3e-2, atol=3e-2)

    # non-square image (W > H): exercises the contract-over-W layout branch.
    IMG_H2, IMG_W2 = 8, 16
    imgs2 = jax.random.uniform(jax.random.PRNGKey(7),
                               (B, V, IMG_H2, IMG_W2, C), jnp.float32)
    trans2 = jnp.array([[(IMG_W2 - 1.0) / (ORI_W - 1.0), 0.0, 0.0],
                        [0.0, (IMG_H2 - 1.0) / (ORI_H - 1.0), 0.0]], jnp.float32)
    ref2 = _reference(np.asarray(xy_proj), np.asarray(imgs2), np.asarray(grids),
                      np.asarray(trans2), np.asarray(w1), np.asarray(b1),
                      np.asarray(w2), np.asarray(b2), ORI_MAX, CUBE)
    out2 = denorm_project_pallas(trans2, xy_proj, imgs2, grids, w1, b1, w2, b2,
                                 CUBE, ORI_MAX, tile_n=NBINS,
                                 sample_dtype=jnp.float32)
    out2 = jax.block_until_ready(out2)
    np.testing.assert_allclose(np.asarray(out2), ref2, rtol=1e-3, atol=1e-3)

    print("KERNEL_OK")
</pallas_src>

<mosaic_0001>
module attributes {stable_mosaic.version = 11 : i64} {
  func.func @_denorm_project_kernel(%arg0: i32, %arg1: i32, %arg2: memref<2x3xf32, #tpu.memory_space<smem>>, %arg3: memref<1x1xf32, #tpu.memory_space<smem>>, %arg4: memref<1x3x2x512xf32, #tpu.memory_space<vmem>>, %arg5: memref<1x3x64x16xf32, #tpu.memory_space<vmem>>, %arg6: memref<1x3x512xf32, #tpu.memory_space<vmem>>, %arg7: memref<32x11xf32, #tpu.memory_space<vmem>>, %arg8: memref<32x1xf32, #tpu.memory_space<vmem>>, %arg9: memref<32x1xf32, #tpu.memory_space<vmem>>, %arg10: memref<1x1x512xf32, #tpu.memory_space<vmem>>) attributes {dimension_semantics = [#tpu.dimension_semantics<parallel>, #tpu.dimension_semantics<parallel>], iteration_bounds = array<i64: 2, 1>, scalar_prefetch = 0 : i64, scratch_operands = 0 : i64, tpu.core_type = #tpu.core_type<tc>, window_params = [{transform_indices = @transform_0, window_bounds = array<i64: 2, 3>}, {transform_indices = @transform_1, window_bounds = array<i64: 1, 1>}, {transform_indices = @transform_2, window_bounds = array<i64: 1, 3, 2, 512>}, {transform_indices = @transform_3, window_bounds = array<i64: 1, 3, 64, 16>}, {transform_indices = @transform_4, window_bounds = array<i64: 1, 3, 512>}, {pipeline_mode = #tpu.pipeline_mode<synchronous>, transform_indices = @transform_5, window_bounds = array<i64: 32, 11>}, {pipeline_mode = #tpu.pipeline_mode<synchronous>, transform_indices = @transform_6, window_bounds = array<i64: 32, 1>}, {pipeline_mode = #tpu.pipeline_mode<synchronous>, transform_indices = @transform_7, window_bounds = array<i64: 32, 1>}, {transform_indices = @transform_8, window_bounds = array<i64: 1, 1, 512>}]} {
    %c0 = arith.constant 0 : index
    %c0_0 = arith.constant 0 : index
    %0 = memref.load %arg2[%c0, %c0_0] : memref<2x3xf32, #tpu.memory_space<smem>>
    %c0_1 = arith.constant 0 : index
    %c1 = arith.constant 1 : index
    %1 = memref.load %arg2[%c0_1, %c1] : memref<2x3xf32, #tpu.memory_space<smem>>
    %c0_2 = arith.constant 0 : index
    %c2 = arith.constant 2 : index
    %2 = memref.load %arg2[%c0_2, %c2] : memref<2x3xf32, #tpu.memory_space<smem>>
    %c1_3 = arith.constant 1 : index
    %c0_4 = arith.constant 0 : index
    %3 = memref.load %arg2[%c1_3, %c0_4] : memref<2x3xf32, #tpu.memory_space<smem>>
    %c1_5 = arith.constant 1 : index
    %c1_6 = arith.constant 1 : index
    %4 = memref.load %arg2[%c1_5, %c1_6] : memref<2x3xf32, #tpu.memory_space<smem>>
    %c1_7 = arith.constant 1 : index
    %c2_8 = arith.constant 2 : index
    %5 = memref.load %arg2[%c1_7, %c2_8] : memref<2x3xf32, #tpu.memory_space<smem>>
    %6 = tpu.iota {dimensions = array<i32: 0>} : vector<16x512xi32>
    %7 = tpu.iota {dimensions = array<i32: 0>} : vector<16x512xi32>
    %cst = arith.constant 0.000000e+00 : f32
    %8 = vector.broadcast %cst : f32 to vector<4x512xf32>
    %c0_i32 = arith.constant 0 : i32
    %c0_9 = arith.constant 0 : index
    %9 = arith.index_cast %c0_i32 : i32 to index
    %c0_10 = arith.constant 0 : index
    %c0_11 = arith.constant 0 : index
    %10 = vector.load %arg4[%c0_9, %9, %c0_10, %c0_11] : memref<1x3x2x512xf32, #tpu.memory_space<vmem>>, vector<1x1x2x512xf32>
    %11 = vector.shape_cast %10 : vector<1x1x2x512xf32> to vector<2x512xf32>
    %cst_12 = arith.constant -1.000000e+00 : f32
    %cst_13 = arith.constant 3.200000e+01 : f32
    %12 = vector.broadcast %cst_12 : f32 to vector<2x512xf32>
    %13 = arith.maximumf %12, %11 : vector<2x512xf32>
    %14 = vector.broadcast %cst_13 : f32 to vector<2x512xf32>
    %15 = arith.minimumf %14, %13 : vector<2x512xf32>
    %16 = vector.extract_strided_slice %15 {offsets = [0, 0], sizes = [1, 512], strides = [1, 1]} : vector<2x512xf32> to vector<1x512xf32>
    %17 = vector.extract_strided_slice %15 {offsets = [1, 0], sizes = [1, 512], strides = [1, 1]} : vector<2x512xf32> to vector<1x512xf32>
    %18 = vector.broadcast %0 : f32 to vector<1x512xf32>
    %19 = arith.mulf %16, %18 : vector<1x512xf32>
    %20 = vector.broadcast %1 : f32 to vector<1x512xf32>
    %21 = arith.mulf %17, %20 : vector<1x512xf32>
    %22 = arith.addf %19, %21 : vector<1x512xf32>
    %23 = vector.broadcast %2 : f32 to vector<1x512xf32>
    %24 = arith.addf %22, %23 : vector<1x512xf32>
    %25 = vector.broadcast %3 : f32 to vector<1x512xf32>
    %26 = arith.mulf %16, %25 : vector<1x512xf32>
    %27 = vector.broadcast %4 : f32 to vector<1x512xf32>
    %28 = arith.mulf %17, %27 : vector<1x512xf32>
    %29 = arith.addf %26, %28 : vector<1x512xf32>
    %30 = vector.broadcast %5 : f32 to vector<1x512xf32>
    %31 = arith.addf %29, %30 : vector<1x512xf32>
    %cst_14 = arith.constant 1.500000e+01 : f32
    %32 = vector.broadcast %cst_14 : f32 to vector<1x512xf32>
    %33 = arith.divf %24, %32 : vector<1x512xf32>
    %cst_15 = arith.constant 2.000000e+00 : f32
    %34 = vector.broadcast %cst_15 : f32 to vector<1x512xf32>
    %35 = arith.mulf %33, %34 : vector<1x512xf32>
    %cst_16 = arith.constant 1.000000e+00 : f32
    %36 = vector.broadcast %cst_16 : f32 to vector<1x512xf32>
    %37 = arith.subf %35, %36 : vector<1x512xf32>
    %cst_17 = arith.constant 1.500000e+01 : f32
    %38 = vector.broadcast %cst_17 : f32 to vector<1x512xf32>
    %39 = arith.divf %31, %38 : vector<1x512xf32>
    %cst_18 = arith.constant 2.000000e+00 : f32
    %40 = vector.broadcast %cst_18 : f32 to vector<1x512xf32>
    %41 = arith.mulf %39, %40 : vector<1x512xf32>
    %cst_19 = arith.constant 1.000000e+00 : f32
    %42 = vector.broadcast %cst_19 : f32 to vector<1x512xf32>
    %43 = arith.subf %41, %42 : vector<1x512xf32>
    %cst_20 = arith.constant 1.000000e+00 : f32
    %44 = vector.broadcast %cst_20 : f32 to vector<1x512xf32>
    %45 = arith.addf %37, %44 : vector<1x512xf32>
    %cst_21 = arith.constant 5.000000e-01 : f32
    %46 = vector.broadcast %cst_21 : f32 to vector<1x512xf32>
    %47 = arith.mulf %45, %46 : vector<1x512xf32>
    %cst_22 = arith.constant 1.500000e+01 : f32
    %48 = vector.broadcast %cst_22 : f32 to vector<1x512xf32>
    %49 = arith.mulf %47, %48 : vector<1x512xf32>
    %cst_23 = arith.constant 1.000000e+00 : f32
    %50 = vector.broadcast %cst_23 : f32 to vector<1x512xf32>
    %51 = arith.addf %43, %50 : vector<1x512xf32>
    %cst_24 = arith.constant 5.000000e-01 : f32
    %52 = vector.broadcast %cst_24 : f32 to vector<1x512xf32>
    %53 = arith.mulf %51, %52 : vector<1x512xf32>
    %cst_25 = arith.constant 1.500000e+01 : f32
    %54 = vector.broadcast %cst_25 : f32 to vector<1x512xf32>
    %55 = arith.mulf %53, %54 : vector<1x512xf32>
    %56 = math.floor %49 : vector<1x512xf32>
    %57 = math.floor %55 : vector<1x512xf32>
    %58 = arith.subf %49, %56 : vector<1x512xf32>
    %cst_26 = arith.constant 1.000000e+00 : f32
    %59 = vector.broadcast %cst_26 : f32 to vector<1x512xf32>
    %60 = arith.subf %59, %58 : vector<1x512xf32>
    %61 = arith.subf %55, %57 : vector<1x512xf32>
    %cst_27 = arith.constant 1.000000e+00 : f32
    %62 = vector.broadcast %cst_27 : f32 to vector<1x512xf32>
    %63 = arith.subf %62, %61 : vector<1x512xf32>
    %64 = arith.fptosi %56 : vector<1x512xf32> to vector<1x512xi32>
    %65 = arith.fptosi %57 : vector<1x512xf32> to vector<1x512xi32>
    %cst_28 = arith.constant 0.000000e+00 : f32
    %66 = vector.broadcast %cst_28 : f32 to vector<1x512xf32>
    %67 = arith.cmpf oge, %56, %66 : vector<1x512xf32>
    %cst_29 = arith.constant 1.500000e+01 : f32
    %68 = vector.broadcast %cst_29 : f32 to vector<1x512xf32>
    %69 = arith.cmpf ole, %56, %68 : vector<1x512xf32>
    %70 = arith.andi %67, %69 : vector<1x512xi1>
    %71 = arith.extui %70 : vector<1x512xi1> to vector<1x512xi32>
    %72 = arith.sitofp %71 : vector<1x512xi32> to vector<1x512xf32>
    %cst_30 = arith.constant 1.000000e+00 : f32
    %73 = vector.broadcast %cst_30 : f32 to vector<1x512xf32>
    %74 = arith.addf %56, %73 : vector<1x512xf32>
    %cst_31 = arith.constant 0.000000e+00 : f32
    %75 = vector.broadcast %cst_31 : f32 to vector<1x512xf32>
    %76 = arith.cmpf oge, %74, %75 : vector<1x512xf32>
    %cst_32 = arith.constant 1.000000e+00 : f32
    %77 = vector.broadcast %cst_32 : f32 to vector<1x512xf32>
    %78 = arith.addf %56, %77 : vector<1x512xf32>
    %cst_33 = arith.constant 1.500000e+01 : f32
    %79 = vector.broadcast %cst_33 : f32 to vector<1x512xf32>
    %80 = arith.cmpf ole, %78, %79 : vector<1x512xf32>
    %81 = arith.andi %76, %80 : vector<1x512xi1>
    %82 = arith.extui %81 : vector<1x512xi1> to vector<1x512xi32>
    %83 = arith.sitofp %82 : vector<1x512xi32> to vector<1x512xf32>
    %cst_34 = arith.constant 0.000000e+00 : f32
    %84 = vector.broadcast %cst_34 : f32 to vector<1x512xf32>
    %85 = arith.cmpf oge, %57, %84 : vector<1x512xf32>
    %cst_35 = arith.constant 1.500000e+01 : f32
    %86 = vector.broadcast %cst_35 : f32 to vector<1x512xf32>
    %87 = arith.cmpf ole, %57, %86 : vector<1x512xf32>
    %88 = arith.andi %85, %87 : vector<1x512xi1>
    %89 = arith.extui %88 : vector<1x512xi1> to vector<1x512xi32>
    %90 = arith.sitofp %89 : vector<1x512xi32> to vector<1x512xf32>
    %cst_36 = arith.constant 1.000000e+00 : f32
    %91 = vector.broadcast %cst_36 : f32 to vector<1x512xf32>
    %92 = arith.addf %57, %91 : vector<1x512xf32>
    %cst_37 = arith.constant 0.000000e+00 : f32
    %93 = vector.broadcast %cst_37 : f32 to vector<1x512xf32>
    %94 = arith.cmpf oge, %92, %93 : vector<1x512xf32>
    %cst_38 = arith.constant 1.000000e+00 : f32
    %95 = vector.broadcast %cst_38 : f32 to vector<1x512xf32>
    %96 = arith.addf %57, %95 : vector<1x512xf32>
    %cst_39 = arith.constant 1.500000e+01 : f32
    %97 = vector.broadcast %cst_39 : f32 to vector<1x512xf32>
    %98 = arith.cmpf ole, %96, %97 : vector<1x512xf32>
    %99 = arith.andi %94, %98 : vector<1x512xi1>
    %100 = arith.extui %99 : vector<1x512xi1> to vector<1x512xi32>
    %101 = arith.sitofp %100 : vector<1x512xi32> to vector<1x512xf32>
    %102 = vector.broadcast %65 : vector<1x512xi32> to vector<16x512xi32>
    %103 = arith.cmpi eq, %6, %102 : vector<16x512xi32>
    %104 = arith.mulf %63, %90 : vector<1x512xf32>
    %cst_40 = arith.constant 0.000000e+00 : f32
    %105 = vector.shape_cast %104 : vector<1x512xf32> to vector<1x512xf32>
    %106 = vector.broadcast %105 : vector<1x512xf32> to vector<16x512xf32>
    %107 = vector.broadcast %cst_40 : f32 to vector<16x512xf32>
    %108 = arith.select %103, %106, %107 : vector<16x512xi1>, vector<16x512xf32>
    %c1_i32 = arith.constant 1 : i32
    %109 = vector.broadcast %c1_i32 : i32 to vector<1x512xi32>
    %110 = arith.addi %65, %109 : vector<1x512xi32>
    %111 = vector.broadcast %110 : vector<1x512xi32> to vector<16x512xi32>
    %112 = arith.cmpi eq, %6, %111 : vector<16x512xi32>
    %113 = arith.mulf %61, %101 : vector<1x512xf32>
    %cst_41 = arith.constant 0.000000e+00 : f32
    %114 = vector.shape_cast %113 : vector<1x512xf32> to vector<1x512xf32>
    %115 = vector.broadcast %114 : vector<1x512xf32> to vector<16x512xf32>
    %116 = vector.broadcast %cst_41 : f32 to vector<16x512xf32>
    %117 = arith.select %112, %115, %116 : vector<16x512xi1>, vector<16x512xf32>
    %118 = arith.addf %108, %117 : vector<16x512xf32>
    %119 = vector.broadcast %64 : vector<1x512xi32> to vector<16x512xi32>
    %120 = arith.cmpi eq, %7, %119 : vector<16x512xi32>
    %121 = arith.mulf %60, %72 : vector<1x512xf32>
    %cst_42 = arith.constant 0.000000e+00 : f32
    %122 = vector.shape_cast %121 : vector<1x512xf32> to vector<1x512xf32>
    %123 = vector.broadcast %122 : vector<1x512xf32> to vector<16x512xf32>
    %124 = vector.broadcast %cst_42 : f32 to vector<16x512xf32>
    %125 = arith.select %120, %123, %124 : vector<16x512xi1>, vector<16x512xf32>
    %c1_i32_43 = arith.constant 1 : i32
    %126 = vector.broadcast %c1_i32_43 : i32 to vector<1x512xi32>
    %127 = arith.addi %64, %126 : vector<1x512xi32>
    %128 = vector.broadcast %127 : vector<1x512xi32> to vector<16x512xi32>
    %129 = arith.cmpi eq, %7, %128 : vector<16x512xi32>
    %130 = arith.mulf %58, %83 : vector<1x512xf32>
    %cst_44 = arith.constant 0.000000e+00 : f32
    %131 = vector.shape_cast %130 : vector<1x512xf32> to vector<1x512xf32>
    %132 = vector.broadcast %131 : vector<1x512xf32> to vector<16x512xf32>
    %133 = vector.broadcast %cst_44 : f32 to vector<16x512xf32>
    %134 = arith.select %129, %132, %133 : vector<16x512xi1>, vector<16x512xf32>
    %135 = arith.addf %125, %134 : vector<16x512xf32>
    %c0_45 = arith.constant 0 : index
    %136 = arith.index_cast %c0_i32 : i32 to index
    %c0_46 = arith.constant 0 : index
    %c0_47 = arith.constant 0 : index
    %137 = vector.load %arg5[%c0_45, %136, %c0_46, %c0_47] : memref<1x3x64x16xf32, #tpu.memory_space<vmem>>, vector<1x1x64x16xf32>
    %138 = vector.shape_cast %137 : vector<1x1x64x16xf32> to vector<64x16xf32>
    %cst_48 = arith.constant dense<0.000000e+00> : vector<64x512xf32>
    %139 = tpu.matmul %138, %118, %cst_48 {dimension_numbers = #tpu.dot_dimension_numbers<[1], [0], [0], [1], [0, 0, 1, 1], [], []>} : vector<64x16xf32>, vector<16x512xf32>, vector<64x512xf32> -> vector<64x512xf32>
    %140 = vector.shape_cast %139 : vector<64x512xf32> to vector<4x16x512xf32>
    %141 = vector.shape_cast %135 : vector<16x512xf32> to vector<1x16x512xf32>
    %142 = vector.broadcast %141 : vector<1x16x512xf32> to vector<4x16x512xf32>
    %143 = arith.mulf %140, %142 : vector<4x16x512xf32>
    %cst_49 = arith.constant dense<0.000000e+00> : vector<4x512xf32>
    %144 = vector.multi_reduction <add>, %143, %cst_49 [1] : vector<4x16x512xf32> to vector<4x512xf32>
    %145 = arith.addf %8, %144 : vector<4x512xf32>
    %146 = arith.mulf %144, %144 : vector<4x512xf32>
    %147 = arith.addf %8, %146 : vector<4x512xf32>
    %c1_i32_50 = arith.constant 1 : i32
    %c0_51 = arith.constant 0 : index
    %148 = arith.index_cast %c1_i32_50 : i32 to index
    %c0_52 = arith.constant 0 : index
    %c0_53 = arith.constant 0 : index
    %149 = vector.load %arg4[%c0_51, %148, %c0_52, %c0_53] : memref<1x3x2x512xf32, #tpu.memory_space<vmem>>, vector<1x1x2x512xf32>
    %150 = vector.shape_cast %149 : vector<1x1x2x512xf32> to vector<2x512xf32>
    %cst_54 = arith.constant -1.000000e+00 : f32
    %cst_55 = arith.constant 3.200000e+01 : f32
    %151 = vector.broadcast %cst_54 : f32 to vector<2x512xf32>
    %152 = arith.maximumf %151, %150 : vector<2x512xf32>
    %153 = vector.broadcast %cst_55 : f32 to vector<2x512xf32>
    %154 = arith.minimumf %153, %152 : vector<2x512xf32>
    %155 = vector.extract_strided_slice %154 {offsets = [0, 0], sizes = [1, 512], strides = [1, 1]} : vector<2x512xf32> to vector<1x512xf32>
    %156 = vector.extract_strided_slice %154 {offsets = [1, 0], sizes = [1, 512], strides = [1, 1]} : vector<2x512xf32> to vector<1x512xf32>
    %157 = vector.broadcast %0 : f32 to vector<1x512xf32>
    %158 = arith.mulf %155, %157 : vector<1x512xf32>
    %159 = vector.broadcast %1 : f32 to vector<1x512xf32>
    %160 = arith.mulf %156, %159 : vector<1x512xf32>
    %161 = arith.addf %158, %160 : vector<1x512xf32>
    %162 = vector.broadcast %2 : f32 to vector<1x512xf32>
    %163 = arith.addf %161, %162 : vector<1x512xf32>
    %164 = vector.broadcast %3 : f32 to vector<1x512xf32>
    %165 = arith.mulf %155, %164 : vector<1x512xf32>
    %166 = vector.broadcast %4 : f32 to vector<1x512xf32>
    %167 = arith.mulf %156, %166 : vector<1x512xf32>
    %168 = arith.addf %165, %167 : vector<1x512xf32>
    %169 = vector.broadcast %5 : f32 to vector<1x512xf32>
    %170 = arith.addf %168, %169 : vector<1x512xf32>
    %cst_56 = arith.constant 1.500000e+01 : f32
    %171 = vector.broadcast %cst_56 : f32 to vector<1x512xf32>
    %172 = arith.divf %163, %171 : vector<1x512xf32>
    %cst_57 = arith.constant 2.000000e+00 : f32
    %173 = vector.broadcast %cst_57 : f32 to vector<1x512xf32>
    %174 = arith.mulf %172, %173 : vector<1x512xf32>
    %cst_58 = arith.constant 1.000000e+00 : f32
    %175 = vector.broadcast %cst_58 : f32 to vector<1x512xf32>
    %176 = arith.subf %174, %175 : vector<1x512xf32>
    %cst_59 = arith.constant 1.500000e+01 : f32
    %177 = vector.broadcast %cst_59 : f32 to vector<1x512xf32>
    %178 = arith.divf %170, %177 : vector<1x512xf32>
    %cst_60 = arith.constant 2.000000e+00 : f32
    %179 = vector.broadcast %cst_60 : f32 to vector<1x512xf32>
    %180 = arith.mulf %178, %179 : vector<1x512xf32>
    %cst_61 = arith.constant 1.000000e+00 : f32
    %181 = vector.broadcast %cst_61 : f32 to vector<1x512xf32>
    %182 = arith.subf %180, %181 : vector<1x512xf32>
    %cst_62 = arith.constant 1.000000e+00 : f32
    %183 = vector.broadcast %cst_62 : f32 to vector<1x512xf32>
    %184 = arith.addf %176, %183 : vector<1x512xf32>
    %cst_63 = arith.constant 5.000000e-01 : f32
    %185 = vector.broadcast %cst_63 : f32 to vector<1x512xf32>
    %186 = arith.mulf %184, %185 : vector<1x512xf32>
    %cst_64 = arith.constant 1.500000e+01 : f32
    %187 = vector.broadcast %cst_64 : f32 to vector<1x512xf32>
    %188 = arith.mulf %186, %187 : vector<1x512xf32>
    %cst_65 = arith.constant 1.000000e+00 : f32
    %189 = vector.broadcast %cst_65 : f32 to vector<1x512xf32>
    %190 = arith.addf %182, %189 : vector<1x512xf32>
    %cst_66 = arith.constant 5.000000e-01 : f32
    %191 = vector.broadcast %cst_66 : f32 to vector<1x512xf32>
    %192 = arith.mulf %190, %191 : vector<1x512xf32>
    %cst_67 = arith.constant 1.500000e+01 : f32
    %193 = vector.broadcast %cst_67 : f32 to vector<1x512xf32>
    %194 = arith.mulf %192, %193 : vector<1x512xf32>
    %195 = math.floor %188 : vector<1x512xf32>
    %196 = math.floor %194 : vector<1x512xf32>
    %197 = arith.subf %188, %195 : vector<1x512xf32>
    %cst_68 = arith.constant 1.000000e+00 : f32
    %198 = vector.broadcast %cst_68 : f32 to vector<1x512xf32>
    %199 = arith.subf %198, %197 : vector<1x512xf32>
    %200 = arith.subf %194, %196 : vector<1x512xf32>
    %cst_69 = arith.constant 1.000000e+00 : f32
    %201 = vector.broadcast %cst_69 : f32 to vector<1x512xf32>
    %202 = arith.subf %201, %200 : vector<1x512xf32>
    %203 = arith.fptosi %195 : vector<1x512xf32> to vector<1x512xi32>
    %204 = arith.fptosi %196 : vector<1x512xf32> to vector<1x512xi32>
    %cst_70 = arith.constant 0.000000e+00 : f32
    %205 = vector.broadcast %cst_70 : f32 to vector<1x512xf32>
    %206 = arith.cmpf oge, %195, %205 : vector<1x512xf32>
    %cst_71 = arith.constant 1.500000e+01 : f32
    %207 = vector.broadcast %cst_71 : f32 to vector<1x512xf32>
    %208 = arith.cmpf ole, %195, %207 : vector<1x512xf32>
    %209 = arith.andi %206, %208 : vector<1x512xi1>
    %210 = arith.extui %209 : vector<1x512xi1> to vector<1x512xi32>
    %211 = arith.sitofp %210 : vector<1x512xi32> to vector<1x512xf32>
    %cst_72 = arith.constant 1.000000e+00 : f32
    %212 = vector.broadcast %cst_72 : f32 to vector<1x512xf32>
    %213 = arith.addf %195, %212 : vector<1x512xf32>
    %cst_73 = arith.constant 0.000000e+00 : f32
    %214 = vector.broadcast %cst_73 : f32 to vector<1x512xf32>
    %215 = arith.cmpf oge, %213, %214 : vector<1x512xf32>
    %cst_74 = arith.constant 1.000000e+00 : f32
    %216 = vector.broadcast %cst_74 : f32 to vector<1x512xf32>
    %217 = arith.addf %195, %216 : vector<1x512xf32>
    %cst_75 = arith.constant 1.500000e+01 : f32
    %218 = vector.broadcast %cst_75 : f32 to vector<1x512xf32>
    %219 = arith.cmpf ole, %217, %218 : vector<1x512xf32>
    %220 = arith.andi %215, %219 : vector<1x512xi1>
    %221 = arith.extui %220 : vector<1x512xi1> to vector<1x512xi32>
    %222 = arith.sitofp %221 : vector<1x512xi32> to vector<1x512xf32>
    %cst_76 = arith.constant 0.000000e+00 : f32
    %223 = vector.broadcast %cst_76 : f32 to vector<1x512xf32>
    %224 = arith.cmpf oge, %196, %223 : vector<1x512xf32>
    %cst_77 = arith.constant 1.500000e+01 : f32
    %225 = vector.broadcast %cst_77 : f32 to vector<1x512xf32>
    %226 = arith.cmpf ole, %196, %225 : vector<1x512xf32>
    %227 = arith.andi %224, %226 : vector<1x512xi1>
    %228 = arith.extui %227 : vector<1x512xi1> to vector<1x512xi32>
    %229 = arith.sitofp %228 : vector<1x512xi32> to vector<1x512xf32>
    %cst_78 = arith.constant 1.000000e+00 : f32
    %230 = vector.broadcast %cst_78 : f32 to vector<1x512xf32>
    %231 = arith.addf %196, %230 : vector<1x512xf32>
    %cst_79 = arith.constant 0.000000e+00 : f32
    %232 = vector.broadcast %cst_79 : f32 to vector<1x512xf32>
    %233 = arith.cmpf oge, %231, %232 : vector<1x512xf32>
    %cst_80 = arith.constant 1.000000e+00 : f32
    %234 = vector.broadcast %cst_80 : f32 to vector<1x512xf32>
    %235 = arith.addf %196, %234 : vector<1x512xf32>
    %cst_81 = arith.constant 1.500000e+01 : f32
    %236 = vector.broadcast %cst_81 : f32 to vector<1x512xf32>
    %237 = arith.cmpf ole, %235, %236 : vector<1x512xf32>
    %238 = arith.andi %233, %237 : vector<1x512xi1>
    %239 = arith.extui %238 : vector<1x512xi1> to vector<1x512xi32>
    %240 = arith.sitofp %239 : vector<1x512xi32> to vector<1x512xf32>
    %241 = vector.broadcast %204 : vector<1x512xi32> to vector<16x512xi32>
    %242 = arith.cmpi eq, %6, %241 : vector<16x512xi32>
    %243 = arith.mulf %202, %229 : vector<1x512xf32>
    %cst_82 = arith.constant 0.000000e+00 : f32
    %244 = vector.shape_cast %243 : vector<1x512xf32> to vector<1x512xf32>
    %245 = vector.broadcast %244 : vector<1x512xf32> to vector<16x512xf32>
    %246 = vector.broadcast %cst_82 : f32 to vector<16x512xf32>
    %247 = arith.select %242, %245, %246 : vector<16x512xi1>, vector<16x512xf32>
    %c1_i32_83 = arith.constant 1 : i32
    %248 = vector.broadcast %c1_i32_83 : i32 to vector<1x512xi32>
    %249 = arith.addi %204, %248 : vector<1x512xi32>
    %250 = vector.broadcast %249 : vector<1x512xi32> to vector<16x512xi32>
    %251 = arith.cmpi eq, %6, %250 : vector<16x512xi32>
    %252 = arith.mulf %200, %240 : vector<1x512xf32>
    %cst_84 = arith.constant 0.000000e+00 : f32
    %253 = vector.shape_cast %252 : vector<1x512xf32> to vector<1x512xf32>
    %254 = vector.broadcast %253 : vector<1x512xf32> to vector<16x512xf32>
    %255 = vector.broadcast %cst_84 : f32 to vector<16x512xf32>
    %256 = arith.select %251, %254, %255 : vector<16x512xi1>, vector<16x512xf32>
    %257 = arith.addf %247, %256 : vector<16x512xf32>
    %258 = vector.broadcast %203 : vector<1x512xi32> to vector<16x512xi32>
    %259 = arith.cmpi eq, %7, %258 : vector<16x512xi32>
    %260 = arith.mulf %199, %211 : vector<1x512xf32>
    %cst_85 = arith.constant 0.000000e+00 : f32
    %261 = vector.shape_cast %260 : vector<1x512xf32> to vector<1x512xf32>
    %262 = vector.broadcast %261 : vector<1x512xf32> to vector<16x512xf32>
    %263 = vector.broadcast %cst_85 : f32 to vector<16x512xf32>
    %264 = arith.select %259, %262, %263 : vector<16x512xi1>, vector<16x512xf32>
    %c1_i32_86 = arith.constant 1 : i32
    %265 = vector.broadcast %c1_i32_86 : i32 to vector<1x512xi32>
    %266 = arith.addi %203, %265 : vector<1x512xi32>
    %267 = vector.broadcast %266 : vector<1x512xi32> to vector<16x512xi32>
    %268 = arith.cmpi eq, %7, %267 : vector<16x512xi32>
    %269 = arith.mulf %197, %222 : vector<1x512xf32>
    %cst_87 = arith.constant 0.000000e+00 : f32
    %270 = vector.shape_cast %269 : vector<1x512xf32> to vector<1x512xf32>
    %271 = vector.broadcast %270 : vector<1x512xf32> to vector<16x512xf32>
    %272 = vector.broadcast %cst_87 : f32 to vector<16x512xf32>
    %273 = arith.select %268, %271, %272 : vector<16x512xi1>, vector<16x512xf32>
    %274 = arith.addf %264, %273 : vector<16x512xf32>
    %c0_88 = arith.constant 0 : index
    %275 = arith.index_cast %c1_i32_50 : i32 to index
    %c0_89 = arith.constant 0 : index
    %c0_90 = arith.constant 0 : index
    %276 = vector.load %arg5[%c0_88, %275, %c0_89, %c0_90] : memref<1x3x64x16xf32, #tpu.memory_space<vmem>>, vector<1x1x64x16xf32>
    %277 = vector.shape_cast %276 : vector<1x1x64x16xf32> to vector<64x16xf32>
    %cst_91 = arith.constant dense<0.000000e+00> : vector<64x512xf32>
    %278 = tpu.matmul %277, %257, %cst_91 {dimension_numbers = #tpu.dot_dimension_numbers<[1], [0], [0], [1], [0, 0, 1, 1], [], []>} : vector<64x16xf32>, vector<16x512xf32>, vector<64x512xf32> -> vector<64x512xf32>
    %279 = vector.shape_cast %278 : vector<64x512xf32> to vector<4x16x512xf32>
    %280 = vector.shape_cast %274 : vector<16x512xf32> to vector<1x16x512xf32>
    %281 = vector.broadcast %280 : vector<1x16x512xf32> to vector<4x16x512xf32>
    %282 = arith.mulf %279, %281 : vector<4x16x512xf32>
    %cst_92 = arith.constant dense<0.000000e+00> : vector<4x512xf32>
    %283 = vector.multi_reduction <add>, %282, %cst_92 [1] : vector<4x16x512xf32> to vector<4x512xf32>
    %284 = arith.addf %145, %283 : vector<4x512xf32>
    %285 = arith.mulf %283, %283 : vector<4x512xf32>
    %286 = arith.addf %147, %285 : vector<4x512xf32>
    %c2_i32 = arith.constant 2 : i32
    %c0_93 = arith.constant 0 : index
    %287 = arith.index_cast %c2_i32 : i32 to index
    %c0_94 = arith.constant 0 : index
    %c0_95 = arith.constant 0 : index
    %288 = vector.load %arg4[%c0_93, %287, %c0_94, %c0_95] : memref<1x3x2x512xf32, #tpu.memory_space<vmem>>, vector<1x1x2x512xf32>
    %289 = vector.shape_cast %288 : vector<1x1x2x512xf32> to vector<2x512xf32>
    %cst_96 = arith.constant -1.000000e+00 : f32
    %cst_97 = arith.constant 3.200000e+01 : f32
    %290 = vector.broadcast %cst_96 : f32 to vector<2x512xf32>
    %291 = arith.maximumf %290, %289 : vector<2x512xf32>
    %292 = vector.broadcast %cst_97 : f32 to vector<2x512xf32>
    %293 = arith.minimumf %292, %291 : vector<2x512xf32>
    %294 = vector.extract_strided_slice %293 {offsets = [0, 0], sizes = [1, 512], strides = [1, 1]} : vector<2x512xf32> to vector<1x512xf32>
    %295 = vector.extract_strided_slice %293 {offsets = [1, 0], sizes = [1, 512], strides = [1, 1]} : vector<2x512xf32> to vector<1x512xf32>
    %296 = vector.broadcast %0 : f32 to vector<1x512xf32>
    %297 = arith.mulf %294, %296 : vector<1x512xf32>
    %298 = vector.broadcast %1 : f32 to vector<1x512xf32>
    %299 = arith.mulf %295, %298 : vector<1x512xf32>
    %300 = arith.addf %297, %299 : vector<1x512xf32>
    %301 = vector.broadcast %2 : f32 to vector<1x512xf32>
    %302 = arith.addf %300, %301 : vector<1x512xf32>
    %303 = vector.broadcast %3 : f32 to vector<1x512xf32>
    %304 = arith.mulf %294, %303 : vector<1x512xf32>
    %305 = vector.broadcast %4 : f32 to vector<1x512xf32>
    %306 = arith.mulf %295, %305 : vector<1x512xf32>
    %307 = arith.addf %304, %306 : vector<1x512xf32>
    %308 = vector.broadcast %5 : f32 to vector<1x512xf32>
    %309 = arith.addf %307, %308 : vector<1x512xf32>
    %cst_98 = arith.constant 1.500000e+01 : f32
    %310 = vector.broadcast %cst_98 : f32 to vector<1x512xf32>
    %311 = arith.divf %302, %310 : vector<1x512xf32>
    %cst_99 = arith.constant 2.000000e+00 : f32
    %312 = vector.broadcast %cst_99 : f32 to vector<1x512xf32>
    %313 = arith.mulf %311, %312 : vector<1x512xf32>
    %cst_100 = arith.constant 1.000000e+00 : f32
    %314 = vector.broadcast %cst_100 : f32 to vector<1x512xf32>
    %315 = arith.subf %313, %314 : vector<1x512xf32>
    %cst_101 = arith.constant 1.500000e+01 : f32
    %316 = vector.broadcast %cst_101 : f32 to vector<1x512xf32>
    %317 = arith.divf %309, %316 : vector<1x512xf32>
    %cst_102 = arith.constant 2.000000e+00 : f32
    %318 = vector.broadcast %cst_102 : f32 to vector<1x512xf32>
    %319 = arith.mulf %317, %318 : vector<1x512xf32>
    %cst_103 = arith.constant 1.000000e+00 : f32
    %320 = vector.broadcast %cst_103 : f32 to vector<1x512xf32>
    %321 = arith.subf %319, %320 : vector<1x512xf32>
    %cst_104 = arith.constant 1.000000e+00 : f32
    %322 = vector.broadcast %cst_104 : f32 to vector<1x512xf32>
    %323 = arith.addf %315, %322 : vector<1x512xf32>
    %cst_105 = arith.constant 5.000000e-01 : f32
    %324 = vector.broadcast %cst_105 : f32 to vector<1x512xf32>
    %325 = arith.mulf %323, %324 : vector<1x512xf32>
    %cst_106 = arith.constant 1.500000e+01 : f32
    %326 = vector.broadcast %cst_106 : f32 to vector<1x512xf32>
    %327 = arith.mulf %325, %326 : vector<1x512xf32>
    %cst_107 = arith.constant 1.000000e+00 : f32
    %328 = vector.broadcast %cst_107 : f32 to vector<1x512xf32>
    %329 = arith.addf %321, %328 : vector<1x512xf32>
    %cst_108 = arith.constant 5.000000e-01 : f32
    %330 = vector.broadcast %cst_108 : f32 to vector<1x512xf32>
    %331 = arith.mulf %329, %330 : vector<1x512xf32>
    %cst_109 = arith.constant 1.500000e+01 : f32
    %332 = vector.broadcast %cst_109 : f32 to vector<1x512xf32>
    %333 = arith.mulf %331, %332 : vector<1x512xf32>
    %334 = math.floor %327 : vector<1x512xf32>
    %335 = math.floor %333 : vector<1x512xf32>
    %336 = arith.subf %327, %334 : vector<1x512xf32>
    %cst_110 = arith.constant 1.000000e+00 : f32
    %337 = vector.broadcast %cst_110 : f32 to vector<1x512xf32>
    %338 = arith.subf %337, %336 : vector<1x512xf32>
    %339 = arith.subf %333, %335 : vector<1x512xf32>
    %cst_111 = arith.constant 1.000000e+00 : f32
    %340 = vector.broadcast %cst_111 : f32 to vector<1x512xf32>
    %341 = arith.subf %340, %339 : vector<1x512xf32>
    %342 = arith.fptosi %334 : vector<1x512xf32> to vector<1x512xi32>
    %343 = arith.fptosi %335 : vector<1x512xf32> to vector<1x512xi32>
    %cst_112 = arith.constant 0.000000e+00 : f32
    %344 = vector.broadcast %cst_112 : f32 to vector<1x512xf32>
    %345 = arith.cmpf oge, %334, %344 : vector<1x512xf32>
    %cst_113 = arith.constant 1.500000e+01 : f32
    %346 = vector.broadcast %cst_113 : f32 to vector<1x512xf32>
    %347 = arith.cmpf ole, %334, %346 : vector<1x512xf32>
    %348 = arith.andi %345, %347 : vector<1x512xi1>
    %349 = arith.extui %348 : vector<1x512xi1> to vector<1x512xi32>
    %350 = arith.sitofp %349 : vector<1x512xi32> to vector<1x512xf32>
    %cst_114 = arith.constant 1.000000e+00 : f32
    %351 = vector.broadcast %cst_114 : f32 to vector<1x512xf32>
    %352 = arith.addf %334, %351 : vector<1x512xf32>
    %cst_115 = arith.constant 0.000000e+00 : f32
    %353 = vector.broadcast %cst_115 : f32 to vector<1x512xf32>
    %354 = arith.cmpf oge, %352, %353 : vector<1x512xf32>
    %cst_116 = arith.constant 1.000000e+00 : f32
    %355 = vector.broadcast %cst_116 : f32 to vector<1x512xf32>
    %356 = arith.addf %334, %355 : vector<1x512xf32>
    %cst_117 = arith.constant 1.500000e+01 : f32
    %357 = vector.broadcast %cst_117 : f32 to vector<1x512xf32>
    %358 = arith.cmpf ole, %356, %357 : vector<1x512xf32>
    %359 = arith.andi %354, %358 : vector<1x512xi1>
    %360 = arith.extui %359 : vector<1x512xi1> to vector<1x512xi32>
    %361 = arith.sitofp %360 : vector<1x512xi32> to vector<1x512xf32>
    %cst_118 = arith.constant 0.000000e+00 : f32
    %362 = vector.broadcast %cst_118 : f32 to vector<1x512xf32>
    %363 = arith.cmpf oge, %335, %362 : vector<1x512xf32>
    %cst_119 = arith.constant 1.500000e+01 : f32
    %364 = vector.broadcast %cst_119 : f32 to vector<1x512xf32>
    %365 = arith.cmpf ole, %335, %364 : vector<1x512xf32>
    %366 = arith.andi %363, %365 : vector<1x512xi1>
    %367 = arith.extui %366 : vector<1x512xi1> to vector<1x512xi32>
    %368 = arith.sitofp %367 : vector<1x512xi32> to vector<1x512xf32>
    %cst_120 = arith.constant 1.000000e+00 : f32
    %369 = vector.broadcast %cst_120 : f32 to vector<1x512xf32>
    %370 = arith.addf %335, %369 : vector<1x512xf32>
    %cst_121 = arith.constant 0.000000e+00 : f32
    %371 = vector.broadcast %cst_121 : f32 to vector<1x512xf32>
    %372 = arith.cmpf oge, %370, %371 : vector<1x512xf32>
    %cst_122 = arith.constant 1.000000e+00 : f32
    %373 = vector.broadcast %cst_122 : f32 to vector<1x512xf32>
    %374 = arith.addf %335, %373 : vector<1x512xf32>
    %cst_123 = arith.constant 1.500000e+01 : f32
    %375 = vector.broadcast %cst_123 : f32 to vector<1x512xf32>
    %376 = arith.cmpf ole, %374, %375 : vector<1x512xf32>
    %377 = arith.andi %372, %376 : vector<1x512xi1>
    %378 = arith.extui %377 : vector<1x512xi1> to vector<1x512xi32>
    %379 = arith.sitofp %378 : vector<1x512xi32> to vector<1x512xf32>
    %380 = vector.broadcast %343 : vector<1x512xi32> to vector<16x512xi32>
    %381 = arith.cmpi eq, %6, %380 : vector<16x512xi32>
    %382 = arith.mulf %341, %368 : vector<1x512xf32>
    %cst_124 = arith.constant 0.000000e+00 : f32
    %383 = vector.shape_cast %382 : vector<1x512xf32> to vector<1x512xf32>
    %384 = vector.broadcast %383 : vector<1x512xf32> to vector<16x512xf32>
    %385 = vector.broadcast %cst_124 : f32 to vector<16x512xf32>
    %386 = arith.select %381, %384, %385 : vector<16x512xi1>, vector<16x512xf32>
    %c1_i32_125 = arith.constant 1 : i32
    %387 = vector.broadcast %c1_i32_125 : i32 to vector<1x512xi32>
    %388 = arith.addi %343, %387 : vector<1x512xi32>
    %389 = vector.broadcast %388 : vector<1x512xi32> to vector<16x512xi32>
    %390 = arith.cmpi eq, %6, %389 : vector<16x512xi32>
    %391 = arith.mulf %339, %379 : vector<1x512xf32>
    %cst_126 = arith.constant 0.000000e+00 : f32
    %392 = vector.shape_cast %391 : vector<1x512xf32> to vector<1x512xf32>
    %393 = vector.broadcast %392 : vector<1x512xf32> to vector<16x512xf32>
    %394 = vector.broadcast %cst_126 : f32 to vector<16x512xf32>
    %395 = arith.select %390, %393, %394 : vector<16x512xi1>, vector<16x512xf32>
    %396 = arith.addf %386, %395 : vector<16x512xf32>
    %397 = vector.broadcast %342 : vector<1x512xi32> to vector<16x512xi32>
    %398 = arith.cmpi eq, %7, %397 : vector<16x512xi32>
    %399 = arith.mulf %338, %350 : vector<1x512xf32>
    %cst_127 = arith.constant 0.000000e+00 : f32
    %400 = vector.shape_cast %399 : vector<1x512xf32> to vector<1x512xf32>
    %401 = vector.broadcast %400 : vector<1x512xf32> to vector<16x512xf32>
    %402 = vector.broadcast %cst_127 : f32 to vector<16x512xf32>
    %403 = arith.select %398, %401, %402 : vector<16x512xi1>, vector<16x512xf32>
    %c1_i32_128 = arith.constant 1 : i32
    %404 = vector.broadcast %c1_i32_128 : i32 to vector<1x512xi32>
    %405 = arith.addi %342, %404 : vector<1x512xi32>
    %406 = vector.broadcast %405 : vector<1x512xi32> to vector<16x512xi32>
    %407 = arith.cmpi eq, %7, %406 : vector<16x512xi32>
    %408 = arith.mulf %336, %361 : vector<1x512xf32>
    %cst_129 = arith.constant 0.000000e+00 : f32
    %409 = vector.shape_cast %408 : vector<1x512xf32> to vector<1x512xf32>
    %410 = vector.broadcast %409 : vector<1x512xf32> to vector<16x512xf32>
    %411 = vector.broadcast %cst_129 : f32 to vector<16x512xf32>
    %412 = arith.select %407, %410, %411 : vector<16x512xi1>, vector<16x512xf32>
    %413 = arith.addf %403, %412 : vector<16x512xf32>
    %c0_130 = arith.constant 0 : index
    %414 = arith.index_cast %c2_i32 : i32 to index
    %c0_131 = arith.constant 0 : index
    %c0_132 = arith.constant 0 : index
    %415 = vector.load %arg5[%c0_130, %414, %c0_131, %c0_132] : memref<1x3x64x16xf32, #tpu.memory_space<vmem>>, vector<1x1x64x16xf32>
    %416 = vector.shape_cast %415 : vector<1x1x64x16xf32> to vector<64x16xf32>
    %cst_133 = arith.constant dense<0.000000e+00> : vector<64x512xf32>
    %417 = tpu.matmul %416, %396, %cst_133 {dimension_numbers = #tpu.dot_dimension_numbers<[1], [0], [0], [1], [0, 0, 1, 1], [], []>} : vector<64x16xf32>, vector<16x512xf32>, vector<64x512xf32> -> vector<64x512xf32>
    %418 = vector.shape_cast %417 : vector<64x512xf32> to vector<4x16x512xf32>
    %419 = vector.shape_cast %413 : vector<16x512xf32> to vector<1x16x512xf32>
    %420 = vector.broadcast %419 : vector<1x16x512xf32> to vector<4x16x512xf32>
    %421 = arith.mulf %418, %420 : vector<4x16x512xf32>
    %cst_134 = arith.constant dense<0.000000e+00> : vector<4x512xf32>
    %422 = vector.multi_reduction <add>, %421, %cst_134 [1] : vector<4x16x512xf32> to vector<4x512xf32>
    %423 = arith.addf %284, %422 : vector<4x512xf32>
    %424 = arith.mulf %422, %422 : vector<4x512xf32>
    %425 = arith.addf %286, %424 : vector<4x512xf32>
    %c3_i32 = arith.constant 3 : i32
    %cst_135 = arith.constant 0.333333343 : f32
    %426 = vector.broadcast %cst_135 : f32 to vector<4x512xf32>
    %427 = arith.mulf %423, %426 : vector<4x512xf32>
    %cst_136 = arith.constant 0.333333343 : f32
    %428 = vector.broadcast %cst_136 : f32 to vector<4x512xf32>
    %429 = arith.mulf %425, %428 : vector<4x512xf32>
    %430 = arith.mulf %427, %427 : vector<4x512xf32>
    %431 = arith.subf %429, %430 : vector<4x512xf32>
    %cst_137 = arith.constant 0.000000e+00 : f32
    %432 = vector.broadcast %cst_137 : f32 to vector<4x512xf32>
    %433 = arith.maximumf %431, %432 : vector<4x512xf32>
    %cst_138 = arith.constant 0.000000e+00 : f32
    %434 = vector.broadcast %cst_138 : f32 to vector<4x512xf32>
    %435 = arith.subf %434, %433 : vector<4x512xf32>
    %436 = math.exp %435 : vector<4x512xf32>
    %c0_139 = arith.constant 0 : index
    %c0_140 = arith.constant 0 : index
    %c0_141 = arith.constant 0 : index
    %437 = vector.load %arg6[%c0_139, %c0_140, %c0_141] : memref<1x3x512xf32, #tpu.memory_space<vmem>>, vector<1x3x512xf32>
    %438 = vector.shape_cast %437 : vector<1x3x512xf32> to vector<3x512xf32>
    %439 = tpu.concatenate %438, %427, %436 in 0 : vector<3x512xf32>, vector<4x512xf32>, vector<4x512xf32> -> vector<11x512xf32>
    %c0_142 = arith.constant 0 : index
    %c0_143 = arith.constant 0 : index
    %440 = vector.load %arg7[%c0_142, %c0_143] : memref<32x11xf32, #tpu.memory_space<vmem>>, vector<32x11xf32>
    %cst_144 = arith.constant dense<0.000000e+00> : vector<32x512xf32>
    %441 = tpu.matmul %440, %439, %cst_144 {dimension_numbers = #tpu.dot_dimension_numbers<[1], [0], [0], [1], [0, 0, 1, 1], [], []>} : vector<32x11xf32>, vector<11x512xf32>, vector<32x512xf32> -> vector<32x512xf32>
    %c0_145 = arith.constant 0 : index
    %c0_146 = arith.constant 0 : index
    %442 = vector.load %arg8[%c0_145, %c0_146] : memref<32x1xf32, #tpu.memory_space<vmem>>, vector<32x1xf32>
    %443 = vector.broadcast %442 : vector<32x1xf32> to vector<32x512xf32>
    %444 = arith.addf %441, %443 : vector<32x512xf32>
    %cst_147 = arith.constant 0.000000e+00 : f32
    %445 = vector.broadcast %cst_147 : f32 to vector<32x512xf32>
    %446 = arith.maximumf %444, %445 : vector<32x512xf32>
    %c0_148 = arith.constant 0 : index
    %c0_149 = arith.constant 0 : index
    %447 = vector.load %arg9[%c0_148, %c0_149] : memref<32x1xf32, #tpu.memory_space<vmem>>, vector<32x1xf32>
    %448 = vector.broadcast %447 : vector<32x1xf32> to vector<32x512xf32>
    %449 = arith.mulf %446, %448 : vector<32x512xf32>
    %cst_150 = arith.constant dense<0.000000e+00> : vector<512xf32>
    %450 = vector.multi_reduction <add>, %449, %cst_150 [0] : vector<32x512xf32> to vector<512xf32>
    %451 = vector.shape_cast %450 : vector<512xf32> to vector<1x512xf32>
    %c0_151 = arith.constant 0 : index
    %c0_152 = arith.constant 0 : index
    %452 = memref.load %arg3[%c0_151, %c0_152] : memref<1x1xf32, #tpu.memory_space<smem>>
    %453 = vector.broadcast %452 : f32 to vector<1x512xf32>
    %454 = arith.addf %451, %453 : vector<1x512xf32>
    %cst_153 = arith.constant 0.000000e+00 : f32
    %455 = vector.broadcast %cst_153 : f32 to vector<1x512xf32>
    %456 = arith.maximumf %454, %455 : vector<1x512xf32>
    %457 = math.absf %454 : vector<1x512xf32>
    %cst_154 = arith.constant 0.000000e+00 : f32
    %458 = vector.broadcast %cst_154 : f32 to vector<1x512xf32>
    %459 = arith.subf %458, %457 : vector<1x512xf32>
    %460 = math.exp %459 : vector<1x512xf32>
    %cst_155 = arith.constant 1.000000e+00 : f32
    %461 = vector.broadcast %cst_155 : f32 to vector<1x512xf32>
    %462 = arith.addf %461, %460 : vector<1x512xf32>
    %463 = math.log %462 : vector<1x512xf32>
    %464 = arith.addf %456, %463 : vector<1x512xf32>
    %cst_156 = arith.constant 0.000000e+00 : f32
    %465 = vector.broadcast %cst_156 : f32 to vector<1x512xf32>
    %466 = arith.subf %465, %464 : vector<1x512xf32>
    %467 = math.exp %466 : vector<1x512xf32>
    %cst_157 = arith.constant 1.000000e+00 : f32
    %468 = vector.broadcast %cst_157 : f32 to vector<1x512xf32>
    %469 = arith.subf %468, %467 : vector<1x512xf32>
    %470 = vector.shape_cast %469 : vector<1x512xf32> to vector<1x1x512xf32>
    %c0_158 = arith.constant 0 : index
    %c0_159 = arith.constant 0 : index
    %c0_160 = arith.constant 0 : index
    %471 = vector.load %arg10[%c0_158, %c0_159, %c0_160] : memref<1x1x512xf32, #tpu.memory_space<vmem>>, vector<1x1x512xf32>
    tpu.vector_store %arg10[%c0_158, %c0_159, %c0_160], %470 {strides = array<i32>} : memref<1x1x512xf32, #tpu.memory_space<vmem>>, vector<1x1x512xf32>,
    return
  }
  func.func @transform_0(%arg0: i32, %arg1: i32) -> (i32, i32) {
    %c0_i32 = arith.constant 0 : i32
    %c0_i32_0 = arith.constant 0 : i32
    %c0_i32_1 = arith.constant 0 : i32
    return %c0_i32, %c0_i32_0 : i32, i32
  }
  func.func @transform_1(%arg0: i32, %arg1: i32) -> (i32, i32) {
    %c0_i32 = arith.constant 0 : i32
    %c0_i32_0 = arith.constant 0 : i32
    %c0_i32_1 = arith.constant 0 : i32
    return %c0_i32, %c0_i32_0 : i32, i32
  }
  func.func @transform_2(%arg0: i32, %arg1: i32) -> (i32, i32, i32, i32) {
    %c0_i32 = arith.constant 0 : i32
    %c0_i32_0 = arith.constant 0 : i32
    %c0_i32_1 = arith.constant 0 : i32
    return %arg0, %c0_i32, %c0_i32_0, %arg1 : i32, i32, i32, i32
  }
  func.func @transform_3(%arg0: i32, %arg1: i32) -> (i32, i32, i32, i32) {
    %c0_i32 = arith.constant 0 : i32
    %c0_i32_0 = arith.constant 0 : i32
    %c0_i32_1 = arith.constant 0 : i32
    %c0_i32_2 = arith.constant 0 : i32
    return %arg0, %c0_i32, %c0_i32_0, %c0_i32_1 : i32, i32, i32, i32
  }
  func.func @transform_4(%arg0: i32, %arg1: i32) -> (i32, i32, i32) {
    %c0_i32 = arith.constant 0 : i32
    %c0_i32_0 = arith.constant 0 : i32
    return %arg0, %c0_i32, %arg1 : i32, i32, i32
  }
  func.func @transform_5(%arg0: i32, %arg1: i32) -> (i32, i32) {
    %c0_i32 = arith.constant 0 : i32
    %c0_i32_0 = arith.constant 0 : i32
    %c0_i32_1 = arith.constant 0 : i32
    return %c0_i32, %c0_i32_0 : i32, i32
  }
  func.func @transform_6(%arg0: i32, %arg1: i32) -> (i32, i32) {
    %c0_i32 = arith.constant 0 : i32
    %c0_i32_0 = arith.constant 0 : i32
    %c0_i32_1 = arith.constant 0 : i32
    return %c0_i32, %c0_i32_0 : i32, i32
  }
  func.func @transform_7(%arg0: i32, %arg1: i32) -> (i32, i32) {
    %c0_i32 = arith.constant 0 : i32
    %c0_i32_0 = arith.constant 0 : i32
    %c0_i32_1 = arith.constant 0 : i32
    return %c0_i32, %c0_i32_0 : i32, i32
  }
  func.func @transform_8(%arg0: i32, %arg1: i32) -> (i32, i32, i32) {
    %c0_i32 = arith.constant 0 : i32
    %c0_i32_0 = arith.constant 0 : i32
    return %arg0, %c0_i32, %arg1 : i32, i32, i32
  }
}

</mosaic_0001>

<bundles_post_ra>
// kernel: tpu_custom_call.1
= control target key start
LH: loop header
LB: loop body
LE: loop exit
PB: predicated region body
PF: predicated region fallthrough
CT: control target
= control target key end

     0   :  { %s5846_s0 = inlined_call_operand.vmem [shape: f32[2,3], index: 0, kind: input, shape index: {}]   ;;  %s5847_s1 = inlined_call_operand.<no memory space> [shape: f32[1,1], index: 1, kind: input, shape index: {}]   ;;  %s5848_s2 = inlined_call_operand.vmem [shape: f32[2,3,2,512], index: 2, kind: input, shape index: {}]   ;;  %s5849_s3 = inlined_call_operand.vmem [shape: f32[2,3,64,16], index: 3, kind: input, shape index: {}]   ;;  %s5850_s4 = inlined_call_operand.vmem [shape: f32[2,3,512], index: 4, kind: input, shape index: {}]   ;;  %s5851_s5 = inlined_call_operand.vmem [shape: f32[32,11], index: 5, kind: input, shape index: {}]   ;;  %s5852_s6 = inlined_call_operand.vmem [shape: f32[32,1], index: 6, kind: input, shape index: {}]   ;;  %s5853_s7 = inlined_call_operand.vmem [shape: f32[32,1], index: 7, kind: input, shape index: {}]   ;;  %s5854_s8 = inlined_call_operand.hbm [shape: f32[2,1,512], index: 8, kind: output, shape index: {}]  }
   0x1   :  { %13 = sst [smem:[#allocation2]] %s5847_s1 }
   0x2   :  { %14 = vsyncpa [#allocation5], 0 }
   0x3   :  { %15 = vsyncpa [#allocation4], 0 }
   0x4   :  { %17 = vsyncpa [#allocation4 + $0x1], 0  ;;  %s4262_s29 = smov 0   ;;  %s4264_s30 = smov 0  }
   0x5   :  { %s4266_s9 = smov 0   ;;  %s4268_s10 = smov 0  }
   0x6   :  { %s4270_s11 = smov 0   ;;  %s4272_s12 = smov 0  }
   0x7 LB: > { %s3803_s1 = sadd.s32 4294967295, %s4206_s12   ;;  %s3804_s13 = sadd.s32 4294967294, %s4206_s12   ;;  %s4206_s12 = sphi %s4272_s12, %s23_s12   ;;  %s4202_s11 = sphi %s4270_s11, %s5989_s11   ;;  %s4198_s10 = sphi %s4268_s10, %s5988_s10   ;;  %s4194_s9 = sphi %s4266_s9, %s5987_s9   ;;  %s4190_s30 = sphi %s4264_s30, %s5986_s30   ;;  %s4186_s29 = sphi %s4262_s29, %s5985_s29  }
   0x8   : > { %s35_s14 = sadd.s32 1, %s4202_s11  ;;  %s231_s15 = sadd.s32 1, %s4194_s9 }
   0x9   : > { %p37_p0 = scmp.ge.s32.totalorder %s35_s14, 2  ;;  %p241_p1 = scmp.ne.s32.totalorder %s4194_s9, %s4190_s30 }
   0xa   : > { %p242_p2 = scmp.eq.s32.totalorder %s3803_s1, 1  ;;  %p247_p3 = scmp.ne.s32.totalorder %s4190_s30, %s4186_s29 }
   0xb   : > { %s5991_s14 = smov (%p37_p0, %s35_s14), 0  ;;  %p248_p5 = scmp.eq.s32.totalorder %s3804_s13, 1 }
   0xc   : > { %p4302_p4 = por %p242_p2, %p241_p1  ;;  %s226_s17 = ssub.s32 %s4202_s11, %s5991_s14 }
   0xd   : > { %p3805_p6 = scmp.ge.s32.totalorder %s4206_s12, 1  ;;  %p229_p7 = scmp.eq.s32.totalorder %s226_s17, 0 }
   0xe   : > { %p4309_p8 = por %p248_p5, %p247_p3  ;;  %p255_p9 = scmp.lt.s32.totalorder %s4206_s12, 3 }
   0xf   : > { %s4315_s19 = scalar_select %p229_p7, %s4194_s9, %s231_s15  }
  0x10   : > { %p4317_p10 = pnand %p3805_p6, %p255_p9  ;;  %p4321_p11 = scmp.eq.s32.totalorder %s3803_s1, 0 }
  0x11   : > { %s268_s24 = sshll.u32 %s5846_s0, 4  ;;  %s269_s24 = int_to_ptr.vmem [resolvable:$true] %s268_s24 }
  0x12   : > { %p3985_p12 = pneg %p4317_p10  ;;  %s4109_s25 = scalar_lea.vmem %s269_s24, 32 }
  0x13   : > { %p4110_p0 = scmp.ne.s32.totalorder %s269_s24, %s4109_s25  ;;  %p4117_p5 = scmp.lt.s32.totalorder %s269_s24, %s269_s24 }
  0x14   : > { %p3986_p13 = pnand %p4321_p11, %p3985_p12  ;;  %p4118_p6 = scmp.lt.s32.totalorder %s4109_s25, %s4109_s25 }
  0x16   : > { %p4111_p1 = pneg %p3986_p13  ;;  %p4119_p7 = por %p4118_p6, %p4117_p5 }
  0x18   : > { %p4112_p2 = pnand %p4111_p1, %p4110_p0 }
  0x1a   : > { %p4113_p3 = pneg %p4112_p2 }
  0x1c   : > { %p4120_p9 = pnand %p4119_p7, %p4113_p3 }
  0x1e   : > { %4123 = shalt.err (!%p4120_p9)
}
  0x1f   : > { %s4208_s26 = smov [#allocation3]   ;;  %327 = sbr.rel (%p4317_p10) target bundleno = 849 (0x351), region = 52 }
  0x20   : > { %3988 = dma.vmem_to_smem (!%p3986_p13), %s269_s24, 32, %s4208_s26, [#allocation5]  }
  0x26   : > { %4177 = dma.done.wait (%p4321_p11), [#allocation5], 32  }
  0x27   : > { %4179 = vsyncadd (%p4321_p11), [#allocation5], 4294967264 }
  0x28   : > { %333 = sfence }
  0x29   : > { %p381_p12 = scmp.lt.s32.totalorder %s4198_s10, 1  ;;  %s3817_s27 = sld [smem:[#allocation3 + $0x80]]  ;;  %v5856_v0 = vmov 0.0   ;;  %v5855_v31 = vlaneseq }
  0x2a   : > { %s3818_s28 = sld [smem:[#allocation3 + $0x81]]  ;;  %942 = vmatprep.mubr.f32.mxu0 %v5856_v0  ;;  %1055 = vmatprep.mubr.f32.mxu1 %v5856_v0  ;;  %s3819_s21 = sld [smem:[#allocation3 + $0x82]] }
  0x2b   : > { %s4342_s1 = scalar_select %p381_p12, %s4198_s10, 1  ;;  %v4361_v38 = vshrl.u32 %v5855_v31, 7 }
  0x2c   : > { %s3815_s26 = sld [smem:[#allocation3 + $0x1]]  ;;  %s3576_s17 = sld [smem:[#allocation2]] }
  0x2d   : > { %s3965_s13 = smul.u32 24, %s4342_s1  ;;  %5879 = vst [vmem:[#allocation9_spill] sm:$0xff] %v4361_v38  ;;  %v4364_v45 = vadd.s32 8, %v4361_v38  ;;  %v4367_v47 = vsub.s32 0, %v4361_v38  ;;  %v4372_v49 = vsub.s32 2, %v4361_v38  ;;  %v4375_v50 = vsub.s32 6, %v4361_v38 }
  0x2e   : > { %v4378_v51 = vsub.s32 4, %v4361_v38  ;;  %s3966_s22 = smul.u32 192, %s4342_s1 }
  0x2f   : > { %s388_s20 = scalar_lea.vmem %s5848_s2, %s3965_s13  ;;  %v429_v5 = vstv %s3817_s27  ;;  %s406_s27 = sld [smem:[#allocation3]] }
  0x30   : > { %v415_v1 = vld [vmem:[%s388_s20] sm:$0xff]  ;;  %v3844_v2 = vld [vmem:[%s388_s20 + $0x8] sm:$0xff]  ;;  %v431_v6 = vstv %s3818_s28  ;;  %v3877_v13 = vld [vmem:[%s388_s20 + $0x10] sm:$0xff]  ;;  %s4461_s25 = scalar_lea.vmem %s5849_s3, %s3966_s22  ;;  %s3816_s28 = sld [smem:[#allocation3 + $0x2]] }
  0x31   : > { %v416_v3 = vmax.f32 %v415_v1, -1.0  ;;  %v1298_v4 = vmax.f32 %v3844_v2, -1.0  ;;  %v2173_v16 = vmax.f32 %v3877_v13, -1.0  ;;  %v438_v17 = vstv %s3819_s21  ;;  %s3927_s13 = sshll.u32 %s4342_s1, 4  ;;  %s3928_s21 = sshll.u32 %s4198_s10, 6 }
  0x32   : > { %s5666_s20 = scalar_lea.vmem %s5850_s4, %s3927_s13  ;;  %s4213_s10 = smov [#allocation6]  }
  0x33   : > { %v4348_v7 = vmin.f32 %v416_v3, 32.0  ;;  %v4350_v8 = vmin.f32 %v1298_v4, 32.0  ;;  %v4356_v20 = vmin.f32 %v2173_v16, 32.0  ;;  %s4128_s13 = sshll.u32 %s4213_s10, 4  ;;  %s4129_s13 = int_to_ptr.vmem [resolvable:$false] %s4128_s13 }
  0x34   : > { %s4130_s15 = scalar_lea.vmem %s4129_s13, 128 }
  0x35   : > { %v430_v9 = vmul.f32 %v429_v5, %v4348_v7  ;;  %v432_v10 = vmul.f32 %v431_v6, %v4348_v7  ;;  %v1308_v11 = vmul.f32 %v4350_v8, %v429_v5  ;;  %v1309_v12 = vmul.f32 %v4350_v8, %v431_v6 }
  0x36   : > { %v2183_v23 = vmul.f32 %v4356_v20, %v429_v5  ;;  %v2184_v24 = vmul.f32 %v4356_v20, %v431_v6 }
  0x37   : > { %v3821_v14 = vrot.slane %v432_v10, 9  ;;  %v3846_v15 = vrot.slane %v1309_v12, 9 }
  0x38   : > { %v3879_v27 = vrot.slane %v2184_v24, 9 }
  0x39   : > { %v437_v18 = vadd.f32 %v3821_v14, %v430_v9  ;;  %v1314_v19 = vadd.f32 %v3846_v15, %v1308_v11 }
  0x3a   : > { %v2189_v30 = vadd.f32 %v3879_v27, %v2183_v23 }
  0x3b   : > { %v439_v21 = vadd.f32 %v438_v17, %v437_v18  ;;  %v1315_v22 = vadd.f32 %v1314_v19, %v438_v17 }
  0x3c   : > { %v2190_v34 = vadd.f32 %v2189_v30, %v438_v17 }
  0x3d   : > { %v444_v25 = vmul.f32 0.06666667, %v439_v21  ;;  %v1319_v26 = vmul.f32 0.06666667, %v1315_v22 }
  0x3e   : > { %v2194_v37 = vmul.f32 0.06666667, %v2190_v34 }
  0x3f   : > { %v445_v28 = vmul.f32 2.0, %v444_v25  ;;  %v1320_v29 = vmul.f32 2.0, %v1319_v26 }
  0x40   : > { %v2195_v41 = vmul.f32 2.0, %v2194_v37 }
  0x41   : > { %v3823_v32 = vadd.f32 -1.0, %v445_v28  ;;  %v3848_v33 = vadd.f32 -1.0, %v1320_v29 }
  0x42   : > { %v3881_v44 = vadd.f32 -1.0, %v2195_v41 }
  0x43   : > { %v450_v35 = vadd.f32 1.0, %v3823_v32  ;;  %v1325_v36 = vadd.f32 1.0, %v3848_v33 }
  0x44   : > { %v4380_v52 = vadd.f32 1.0, %v3881_v44 }
  0x45   : > { %v451_v39 = vmul.f32 0.5, %v450_v35  ;;  %v1326_v40 = vmul.f32 0.5, %v1325_v36 }
  0x47   : > { %v452_v42 = vmul.f32 15.0, %v451_v39  ;;  %v1327_v43 = vmul.f32 15.0, %v1326_v40 }
  0x49   : > { %v454_v46 = vfloor.f32 %v452_v42  ;;  %v4369_v48 = vfloor.f32 %v1327_v43 }
  0x4b   : > { %v457_v53 = vsub.f32 %v452_v42, %v454_v46  ;;  %v3969_v54 = vtrunc.f32 %v454_v46  ;;  %vm472_vm0 = vcmp.ge.f32.partialorder %v454_v46, 0.0  ;;  %vm473_vm1 = vcmp.le.f32.partialorder %v454_v46, 15.0 }
  0x4c   : > { %vm474_vm2 = vmand %vm472_vm0, %vm473_vm1  ;;  %v477_v55 = vadd.f32 1.0, %v454_v46  ;;  %v4383_v56 = vsub.f32 %v1327_v43, %v4369_v48  ;;  %v3973_v57 = vtrunc.f32 %v4369_v48  ;;  %vm1347_vm3 = vcmp.ge.f32.partialorder %v4369_v48, 0.0 }
  0x4d   : > { %v458_v58 = vsub.f32 1.0, %v457_v53  ;;  %v3970_v59 = vcvt.f32.s32 %v3969_v54  ;;  %v3826_v60 = vsel %vm474_vm2, 1.0, %v5856_v0  ;;  %vm1348_vm4 = vcmp.le.f32.partialorder %v4369_v48, 15.0 }
  0x4e   : > { %vm478_vm5 = vcmp.ge.f32.partialorder %v477_v55, 0.0  ;;  %vm479_vm6 = vcmp.le.f32.partialorder %v477_v55, 15.0  ;;  %v1333_v61 = vsub.f32 1.0, %v4383_v56  ;;  %v4390_v62 = vcvt.f32.s32 %v3973_v57  ;;  %vm1349_vm7 = vmand %vm1347_vm3, %vm1348_vm4 }
  0x4f   : > { %vm480_vm8 = vmand %vm478_vm5, %vm479_vm6  ;;  %v490_v63 = vrot.slane %v3970_v59, %v4372_v49  ;;  %v523_v1 = vmul.f32 %v3826_v60, %v458_v58  ;;  %v4393_v2 = vadd.s32 1, %v3970_v59  ;;  %v498_v3 = vrot.slane %v3970_v59, %v4375_v50 }
  0x50   : > { %v3827_v4 = vsel %vm480_vm8, 1.0, %v5856_v0  ;;  %v486_v5 = vrot.slane %v3970_v59, %v4367_v47  ;;  %v494_v6 = vrot.slane %v3970_v59, %v4378_v51  ;;  %v4400_v9 = vsel %vm1349_vm7, 1.0, %v5856_v0 }
  0x51   : > { %v506_v10 = vrot.slane %v490_v63, %v4367_v47  ;;  %v532_v11 = vrot.slane %v523_v1, %v4372_v49  ;;  %v577_v12 = vrot.slane %v4393_v2, %v4372_v49  ;;  %v4406_v13 = vmul.f32 %v3827_v4, %v457_v53 }
  0x52   : > { %v514_v14 = vrot.slane %v498_v3, %v4367_v47  ;;  %v540_v15 = vrot.slane %v523_v1, %v4375_v50  ;;  %v585_v16 = vrot.slane %v4393_v2, %v4375_v50  ;;  %v502_v17 = vrot.slane %v486_v5, %v4367_v47 }
  0x53   : > { %vm516_vm9 = vcmp.eq.s32.totalorder %v4361_v38, %v506_v10  ;;  %vm520_vm10 = vcmp.eq.s32.totalorder %v4364_v45, %v506_v10  ;;  %v552_v18 = vrot.slane %v532_v11, %v4367_v47  ;;  %v593_v19 = vrot.slane %v577_v12, %v4367_v47 }
  0x54   : > { %v619_v21 = vrot.slane %v4406_v13, %v4372_v49  ;;  %vm518_vm11 = vcmp.eq.s32.totalorder %v4361_v38, %v514_v14  ;;  %vm522_vm12 = vcmp.eq.s32.totalorder %v4364_v45, %v514_v14  ;;  %v560_v22 = vrot.slane %v540_v15, %v4367_v47 }
  0x55   : > { %v562_v23 = vsel %vm516_vm9, %v552_v18, 0.0  ;;  %v566_v24 = vsel %vm520_vm10, %v552_v18, 0.0  ;;  %vm603_vm13 = vcmp.eq.s32.totalorder %v4361_v38, %v593_v19  ;;  %vm607_vm14 = vcmp.eq.s32.totalorder %v4364_v45, %v593_v19 }
  0x56   : > { %v639_v25 = vrot.slane %v619_v21, %v4367_v47  ;;  %v564_v26 = vsel %vm518_vm11, %v560_v22, 0.0  ;;  %v568_v27 = vsel %vm522_vm12, %v560_v22, 0.0  ;;  %v601_v28 = vrot.slane %v585_v16, %v4367_v47  ;;  %v845_v21 = vld [vmem:[%s4461_s25] sm:$0xff] }
  0x57   : > { %v627_v29 = vrot.slane %v4406_v13, %v4375_v50  ;;  %vm515_vm15 = vcmp.eq.s32.totalorder %v4361_v38, %v502_v17  ;;  %vm519_vm0 = vcmp.eq.s32.totalorder %v4364_v45, %v502_v17  ;;  %v528_v30 = vrot.slane %v523_v1, %v4367_v47 }
  0x58   : > { %v649_v32 = vsel %vm603_vm13, %v639_v25, 0.0  ;;  %v653_v33 = vsel %vm607_vm14, %v639_v25, 0.0  ;;  %vm605_vm1 = vcmp.eq.s32.totalorder %v4361_v38, %v601_v28  ;;  %vm609_vm2 = vcmp.eq.s32.totalorder %v4364_v45, %v601_v28 }
  0x59   : > { %v657_v34 = vadd.f32 %v649_v32, %v562_v23  ;;  %v661_v35 = vadd.f32 %v653_v33, %v566_v24  ;;  %v647_v36 = vrot.slane %v627_v29, %v4367_v47  ;;  %v548_v37 = vrot.slane %v528_v30, %v4367_v47 }
  0x5a   : > { %v573_v39 = vrot.slane %v4393_v2, %v4367_v47  ;;  %v615_v40 = vrot.slane %v4406_v13, %v4367_v47  ;;  %v510_v41 = vrot.slane %v494_v6, %v4367_v47  ;;  %v536_v42 = vrot.slane %v523_v1, %v4378_v51 }
  0x5b   : > { %v3929_v43 = vpack.c.bf16 %v661_v35, %v657_v34  ;;  %v651_v44 = vsel %vm605_vm1, %v647_v36, 0.0  ;;  %v655_v46 = vsel %vm609_vm2, %v647_v36, 0.0  ;;  %v561_v53 = vsel %vm515_vm15, %v548_v37, 0.0  ;;  %v846_v35 = vld [vmem:[%s4461_s25 + $0x8] sm:$0xff] }
  0x5c   : > { %v659_v54 = vadd.f32 %v651_v44, %v564_v26  ;;  %v663_v55 = vadd.f32 %v655_v46, %v568_v27  ;;  %v565_v57 = vsel %vm519_vm0, %v548_v37, 0.0  ;;  %v589_v58 = vrot.slane %v573_v39, %v4367_v47 }
  0x5d   : > { %vm853_vm3 = vcmask 130048   ;;  %3930 = vmatprep.subr.bf16.mxu0 %v3929_v43  ;;  %v635_v59 = vrot.slane %v615_v40, %v4367_v47  ;;  %vm517_vm4 = vcmp.eq.s32.totalorder %v4361_v38, %v510_v41  ;;  %vm521_vm5 = vcmp.eq.s32.totalorder %v4364_v45, %v510_v41 }
  0x5e   : > { %v556_v60 = vrot.slane %v536_v42, %v4367_v47  ;;  %v3933_v63 = vpack.c.bf16 %v663_v55, %v659_v54  ;;  %vm602_vm6 = vcmp.eq.s32.totalorder %v4361_v38, %v589_v58  ;;  %vm606_vm7 = vcmp.eq.s32.totalorder %v4364_v45, %v589_v58  ;;  %v847_v55 = vld [vmem:[%s4461_s25 + $0x10] sm:$0xff] }
  0x5f   : > { %v581_v1 = vrot.slane %v4393_v2, %v4378_v51  ;;  %v648_v3 = vsel %vm602_vm6, %v635_v59, 0.0  ;;  %v652_v4 = vsel %vm606_vm7, %v635_v59, 0.0  ;;  %v623_v14 = vrot.slane %v4406_v13, %v4378_v51 }
  0x60   : > { %v563_v5 = vsel %vm517_vm4, %v556_v60, 0.0  ;;  %v567_v6 = vsel %vm521_vm5, %v556_v60, 0.0  ;;  %3934 = vmatprep.subr.bf16.mxu1 %v3933_v63  ;;  %v656_v10 = vadd.f32 %v648_v3, %v561_v53  ;;  %v660_v11 = vadd.f32 %v652_v4, %v565_v57 }
  0x61   : > { %v597_v12 = vrot.slane %v581_v1, %v4367_v47  ;;  %v1352_v2 = vadd.f32 1.0, %v4369_v48  ;;  %v1365_v15 = vrot.slane %v4390_v62, %v4372_v49  ;;  %v4469_v16 = vmul.f32 %v4400_v9, %v1333_v61 }
  0x62   : > { %v4472_v17 = vadd.s32 1, %v4390_v62  ;;  %v3931_v13 = vpack.c.bf16 %v660_v11, %v656_v10  ;;  %v643_v18 = vrot.slane %v623_v14, %v4367_v47  ;;  %v1373_v23 = vrot.slane %v4390_v62, %v4375_v50  ;;  %v848_v11 = vld [vmem:[%s4461_s25 + $0x18] sm:$0xff] }
  0x63   : > { %vm604_vm8 = vcmp.eq.s32.totalorder %v4361_v38, %v597_v12  ;;  %vm608_vm9 = vcmp.eq.s32.totalorder %v4364_v45, %v597_v12  ;;  %vm1353_vm10 = vcmp.ge.f32.partialorder %v1352_v2, 0.0  ;;  %vm1354_vm11 = vcmp.le.f32.partialorder %v1352_v2, 15.0 }
  0x64   : > { %v1381_v48 = vrot.slane %v1365_v15, %v4367_v47  ;;  %v1407_v19 = vrot.slane %v4469_v16, %v4372_v49  ;;  %3932 = vmatpush1.bf16.msra.mxu0 %v3931_v13  ;;  %v650_v61 = vsel %vm604_vm8, %v643_v18, 0.0  ;;  %v654_v9 = vsel %vm608_vm9, %v643_v18, 0.0  ;;  %vm1355_vm12 = vmand %vm1353_vm10, %vm1354_vm11 }
  0x65   : > { %v1452_v22 = vrot.slane %v4472_v17, %v4372_v49  ;;  %v658_v24 = vadd.f32 %v650_v61, %v563_v5  ;;  %v662_v25 = vadd.f32 %v654_v9, %v567_v6  ;;  %v3852_v26 = vsel %vm1355_vm12, 1.0, %v5856_v0 }
  0x66   : > { %vm1391_vm13 = vcmp.eq.s32.totalorder %v4361_v38, %v1381_v48  ;;  %vm1395_vm14 = vcmp.eq.s32.totalorder %v4364_v45, %v1381_v48  ;;  %v1427_v27 = vrot.slane %v1407_v19, %v4367_v47  ;;  %v4491_v29 = vmul.f32 %v3852_v26, %v4383_v56 }
  0x67   : > { %v1468_v28 = vrot.slane %v1452_v22, %v4367_v47  ;;  %v3935_v30 = vpack.c.bf16 %v662_v25, %v658_v24  ;;  %3828 = vmatmul.mubr.msk.f32.vlgmr.msra.gmra.mrb[0].mxu0 %vm853_vm3, %v845_v21  ;;  %v1389_v32 = vrot.slane %v1373_v23, %v4367_v47  ;;  %v1415_v33 = vrot.slane %v4469_v16, %v4375_v50  ;;  %v849_v23 = vld [vmem:[%s4461_s25 + $0x20] sm:$0xff] }
  0x68   : > { %v1460_v34 = vrot.slane %v4472_v17, %v4375_v50  ;;  %948 = vmatprep.mubr.f32.mxu0 %v5856_v0  ;;  %v1437_v36 = vsel %vm1391_vm13, %v1427_v27, 0.0  ;;  %v1441_v37 = vsel %vm1395_vm14, %v1427_v27, 0.0  ;;  %v1494_v56 = vrot.slane %v4491_v29, %v4372_v49 }
  0x69   : > { %vm1478_vm15 = vcmp.eq.s32.totalorder %v4361_v38, %v1468_v28  ;;  %vm1482_vm0 = vcmp.eq.s32.totalorder %v4364_v45, %v1468_v28  ;;  %3936 = vmatpush1.bf16.msra.mxu1 %v3935_v30  ;;  %vm1393_vm1 = vcmp.eq.s32.totalorder %v4361_v38, %v1389_v32  ;;  %vm1397_vm2 = vcmp.eq.s32.totalorder %v4364_v45, %v1389_v32 }
  0x6a   : > { %v1435_v39 = vrot.slane %v1415_v33, %v4367_v47  ;;  %v1476_v40 = vrot.slane %v1460_v34, %v4367_v47  ;;  %v1502_v41 = vrot.slane %v4491_v29, %v4375_v50  ;;  %v1361_v42 = vrot.slane %v4390_v62, %v4367_v47  ;;  %v850_v33 = vld [vmem:[%s4461_s25 + $0x28] sm:$0xff] }
  0x6b   : > { %v1403_v43 = vrot.slane %v4469_v16, %v4367_v47  ;;  %3829 = vmatmul.mubr.msk.f32.gmra.mrb[2].mxu0 %vm853_vm3, %v846_v35  ;;  %v1514_v44 = vrot.slane %v1494_v56, %v4367_v47  ;;  %v1448_v54 = vrot.slane %v4472_v17, %v4367_v47  ;;  %v2201_v58 = vmul.f32 0.5, %v4380_v52 }
  0x6c   : > { %v1439_v46 = vsel %vm1393_vm1, %v1435_v39, 0.0  ;;  %v1443_v53 = vsel %vm1397_vm2, %v1435_v39, 0.0  ;;  %3836 = vmatmul.mubr.msk.f32.vlgmr.msra.gmra.mrb[0].mxu1 %vm853_vm3, %v845_v21  ;;  %954 = vmatprep.mubr.f32.mxu0 %v5856_v0  ;;  %vm1480_vm4 = vcmp.eq.s32.totalorder %v4361_v38, %v1476_v40  ;;  %vm1484_vm5 = vcmp.eq.s32.totalorder %v4364_v45, %v1476_v40 }
  0x6d   : > { %v1522_v57 = vrot.slane %v1502_v41, %v4367_v47  ;;  %1061 = vmatprep.mubr.f32.mxu1 %v5856_v0  ;;  %v1524_v59 = vsel %vm1478_vm15, %v1514_v44, 0.0  ;;  %v1528_v60 = vsel %vm1482_vm0, %v1514_v44, 0.0  ;;  %v1377_v63 = vrot.slane %v1361_v42, %v4367_v47 }
  0x6e   : > { %v1423_v1 = vrot.slane %v1403_v43, %v4367_v47  ;;  %v1532_v3 = vadd.f32 %v1524_v59, %v1437_v36  ;;  %v1536_v4 = vadd.f32 %v1528_v60, %v1441_v37  ;;  %v1464_v15 = vrot.slane %v1448_v54, %v4367_v47 }
  0x6f   : > { %v1526_v5 = vsel %vm1480_vm4, %v1522_v57, 0.0  ;;  %v1530_v6 = vsel %vm1484_vm5, %v1522_v57, 0.0  ;;  %3830 = vmatmul.mubr.msk.f32.gmra.mrb[4].mxu0 %vm853_vm3, %v847_v55  ;;  %vm1390_vm6 = vcmp.eq.s32.totalorder %v4361_v38, %v1377_v63  ;;  %vm1394_vm7 = vcmp.eq.s32.totalorder %v4364_v45, %v1377_v63 }
  0x70   : > { %v1534_v52 = vadd.f32 %v1526_v5, %v1439_v46  ;;  %v1538_v10 = vadd.f32 %v1530_v6, %v1443_v53  ;;  %3837 = vmatmul.mubr.msk.f32.gmra.mrb[2].mxu1 %vm853_vm3, %v846_v35  ;;  %960 = vmatprep.mubr.f32.mxu0 %v5856_v0  ;;  %v3937_v12 = vpack.c.bf16 %v1536_v4, %v1532_v3  ;;  %v1436_v14 = vsel %vm1390_vm6, %v1423_v1, 0.0  ;;  %v851_v46 = vld [vmem:[%s4461_s25 + $0x30] sm:$0xff]  ;;  %v852_v6 = vld [vmem:[%s4461_s25 + $0x38] sm:$0xff] }
  0x71   : > { %v1440_v2 = vsel %vm1394_vm7, %v1423_v1, 0.0  ;;  %1067 = vmatprep.mubr.f32.mxu1 %v5856_v0  ;;  %v1490_v18 = vrot.slane %v4491_v29, %v4367_v47  ;;  %v1369_v48 = vrot.slane %v4390_v62, %v4378_v51  ;;  %v1411_v19 = vrot.slane %v4469_v16, %v4378_v51 }
  0x72   : > { %v3941_v13 = vpack.c.bf16 %v1538_v10, %v1534_v52  ;;  %3938 = vmatprep.subr.bf16.mxu0 %v3937_v12  ;;  %vm1477_vm8 = vcmp.eq.s32.totalorder %v4361_v38, %v1464_v15  ;;  %vm1481_vm9 = vcmp.eq.s32.totalorder %v4364_v45, %v1464_v15  ;;  %v1456_v61 = vrot.slane %v4472_v17, %v4378_v51 }
  0x73   : > { %v1498_v9 = vrot.slane %v4491_v29, %v4378_v51  ;;  %3831 = vmatmul.mubr.msk.f32.gmra.mrb[6].mxu0 %vm853_vm3, %v848_v11  ;;  %v1510_v21 = vrot.slane %v1490_v18, %v4367_v47  ;;  %v1385_v62 = vrot.slane %v1369_v48, %v4367_v47  ;;  %v1431_v16 = vrot.slane %v1411_v19, %v4367_v47  ;;  %v3853_v48 = vld [vmem:[%s4461_s25 + $0x40] sm:$0xff] }
  0x74   : > { %3942 = vmatprep.subr.bf16.mxu1 %v3941_v13  ;;  %v2202_v22 = vmul.f32 15.0, %v2201_v58  ;;  %3838 = vmatmul.mubr.msk.f32.gmra.mrb[4].mxu1 %vm853_vm3, %v847_v55  ;;  %v1472_v17 = vrot.slane %v1456_v61, %v4367_v47 }
  0x75   : > { %966 = vmatprep.mubr.f32.mxu0 %v5856_v0  ;;  %v1518_v24 = vrot.slane %v1498_v9, %v4367_v47  ;;  %1073 = vmatprep.mubr.f32.mxu1 %v5856_v0  ;;  %v1523_v25 = vsel %vm1477_vm8, %v1510_v21, 0.0  ;;  %v1527_v26 = vsel %vm1481_vm9, %v1510_v21, 0.0  ;;  %vm1392_vm10 = vcmp.eq.s32.totalorder %v4361_v38, %v1385_v62 }
  0x76   : > { %vm1396_vm11 = vcmp.eq.s32.totalorder %v4364_v45, %v1385_v62  ;;  %v1531_v27 = vadd.f32 %v1523_v25, %v1436_v14  ;;  %v1535_v28 = vadd.f32 %v1527_v26, %v1440_v2  ;;  %v1438_v29 = vsel %vm1392_vm10, %v1431_v16, 0.0 }
  0x77   : > { %v1442_v30 = vsel %vm1396_vm11, %v1431_v16, 0.0  ;;  %3832 = vmatmul.mubr.msk.f32.gmra.mrb[8].mxu0 %vm853_vm3, %v849_v23  ;;  %vm1479_vm12 = vcmp.eq.s32.totalorder %v4361_v38, %v1472_v17  ;;  %vm1483_vm13 = vcmp.eq.s32.totalorder %v4364_v45, %v1472_v17  ;;  %v2204_v32 = vfloor.f32 %v2202_v22 }
  0x78   : > { %3839 = vmatmul.mubr.msk.f32.gmra.mrb[6].mxu1 %vm853_vm3, %v848_v11  ;;  %972 = vmatprep.mubr.f32.mxu0 %v5856_v0  ;;  %v3939_v34 = vpack.c.bf16 %v1535_v28, %v1531_v27  ;;  %v1525_v35 = vsel %vm1479_vm12, %v1518_v24, 0.0  ;;  %v1529_v36 = vsel %vm1483_vm13, %v1518_v24, 0.0  ;;  %v3854_v28 = vld [vmem:[%s4461_s25 + $0x48] sm:$0xff] }
  0x79   : > { %1079 = vmatprep.mubr.f32.mxu1 %v5856_v0  ;;  %v1533_v37 = vadd.f32 %v1525_v35, %v1438_v29  ;;  %v1537_v56 = vadd.f32 %v1529_v36, %v1442_v30  ;;  %v2207_v39 = vsub.f32 %v2202_v22, %v2204_v32  ;;  %v3977_v40 = vtrunc.f32 %v2204_v32 }
  0x7a   : > { %3940 = vmatpush1.bf16.msra.mxu0 %v3939_v34  ;;  %vm2222_vm14 = vcmp.ge.f32.partialorder %v2204_v32, 0.0  ;;  %vm2223_vm15 = vcmp.le.f32.partialorder %v2204_v32, 15.0  ;;  %v2227_v41 = vadd.f32 1.0, %v2204_v32 }
  0x7b   : > { %3833 = vmatmul.mubr.msk.f32.gmra.mrb[10].mxu0 %vm853_vm3, %v850_v33  ;;  %v3943_v42 = vpack.c.bf16 %v1537_v56, %v1533_v37  ;;  %v2208_v43 = vsub.f32 1.0, %v2207_v39  ;;  %v4577_v44 = vcvt.f32.s32 %v3977_v40  ;;  %vm2224_vm0 = vmand %vm2222_vm14, %vm2223_vm15 }
  0x7c   : > { %3840 = vmatmul.mubr.msk.f32.gmra.mrb[8].mxu1 %vm853_vm3, %v849_v23  ;;  %978 = vmatprep.mubr.f32.mxu0 %v5856_v0  ;;  %v3884_v53 = vsel %vm2224_vm0, 1.0, %v5856_v0  ;;  %vm2228_vm1 = vcmp.ge.f32.partialorder %v2227_v41, 0.0  ;;  %vm2229_vm2 = vcmp.le.f32.partialorder %v2227_v41, 15.0  ;;  %v3855_v41 = vld [vmem:[%s4461_s25 + $0x50] sm:$0xff] }
  0x7d   : > { %1085 = vmatprep.mubr.f32.mxu1 %v5856_v0  ;;  %3944 = vmatpush1.bf16.msra.mxu1 %v3943_v42  ;;  %vm2230_vm4 = vmand %vm2228_vm1, %vm2229_vm2  ;;  %v2240_v54 = vrot.slane %v4577_v44, %v4372_v49  ;;  %v4586_v55 = vmul.f32 %v3884_v53, %v2208_v43  ;;  %v4589_v57 = vadd.s32 1, %v4577_v44  ;;  %v2248_v58 = vrot.slane %v4577_v44, %v4375_v50 }
  0x7e   : > { %v3885_v59 = vsel %vm2230_vm4, 1.0, %v5856_v0  ;;  %v2236_v60 = vrot.slane %v4577_v44, %v4367_v47  ;;  %v2244_v63 = vrot.slane %v4577_v44, %v4378_v51 }
  0x7f   : > { %3834 = vmatmul.mubr.msk.f32.gmra.mrb[12].mxu0 %vm853_vm3, %v851_v46  ;;  %v2256_v1 = vrot.slane %v2240_v54, %v4367_v47  ;;  %v2282_v3 = vrot.slane %v4586_v55, %v4372_v49  ;;  %v2327_v4 = vrot.slane %v4589_v57, %v4372_v49  ;;  %v4604_v5 = vmul.f32 %v3885_v59, %v2207_v39 }
  0x80   : > { %3841 = vmatmul.mubr.msk.f32.gmra.mrb[10].mxu1 %vm853_vm3, %v850_v33  ;;  %984 = vmatprep.mubr.f32.mxu0 %v5856_v0  ;;  %v2264_v52 = vrot.slane %v2248_v58, %v4367_v47  ;;  %v2290_v10 = vrot.slane %v4586_v55, %v4375_v50  ;;  %v2335_v11 = vrot.slane %v4589_v57, %v4375_v50 }
  0x81   : > { %1091 = vmatprep.mubr.f32.mxu1 %v5856_v0  ;;  %vm2266_vm5 = vcmp.eq.s32.totalorder %v4361_v38, %v2256_v1  ;;  %vm2270_vm6 = vcmp.eq.s32.totalorder %v4364_v45, %v2256_v1  ;;  %v2302_v12 = vrot.slane %v2282_v3, %v4367_v47  ;;  %v2343_v14 = vrot.slane %v2327_v4, %v4367_v47 }
  0x82   : > { %v2369_v2 = vrot.slane %v4604_v5, %v4372_v49  ;;  %vm2268_vm7 = vcmp.eq.s32.totalorder %v4361_v38, %v2264_v52  ;;  %vm2272_vm8 = vcmp.eq.s32.totalorder %v4364_v45, %v2264_v52  ;;  %v2310_v15 = vrot.slane %v2290_v10, %v4367_v47 }
  0x83   : > { %3835 = vmatmul.mubr.msk.f32.gmra.mrb[14].mxu0 %vm853_vm3, %v852_v6  ;;  %v2312_v13 = vsel %vm2266_vm5, %v2302_v12, 0.0  ;;  %v2316_v18 = vsel %vm2270_vm6, %v2302_v12, 0.0  ;;  %vm2353_vm9 = vcmp.eq.s32.totalorder %v4361_v38, %v2343_v14  ;;  %vm2357_vm10 = vcmp.eq.s32.totalorder %v4364_v45, %v2343_v14  ;;  %v3857_v12 = vld [vmem:[%s4461_s25 + $0x60] sm:$0xff] }
  0x84   : > { %3842 = vmatmul.mubr.msk.f32.gmra.mrb[12].mxu1 %vm853_vm3, %v851_v46  ;;  %1817 = vmatprep.mubr.f32.mxu0 %v5856_v0  ;;  %v2389_v19 = vrot.slane %v2369_v2, %v4367_v47  ;;  %v2314_v61 = vsel %vm2268_vm7, %v2310_v15, 0.0  ;;  %v2318_v9 = vsel %vm2272_vm8, %v2310_v15, 0.0  ;;  %v2351_v21 = vrot.slane %v2335_v11, %v4367_v47  ;;  %v3858_v2 = vld [vmem:[%s4461_s25 + $0x68] sm:$0xff]  ;;  %v3859_v15 = vld [vmem:[%s4461_s25 + $0x70] sm:$0xff] }
  0x85   : > { %1097 = vmatprep.mubr.f32.mxu1 %v5856_v0  ;;  %v2377_v62 = vrot.slane %v4604_v5, %v4375_v50  ;;  %v2252_v16 = vrot.slane %v2236_v60, %v4367_v47  ;;  %v2278_v22 = vrot.slane %v4586_v55, %v4367_v47  ;;  %v2323_v23 = vrot.slane %v4589_v57, %v4367_v47 }
  0x86   : > { %v2399_v17 = vsel %vm2353_vm9, %v2389_v19, 0.0  ;;  %v2403_v24 = vsel %vm2357_vm10, %v2389_v19, 0.0  ;;  %vm2355_vm11 = vcmp.eq.s32.totalorder %v4361_v38, %v2351_v21  ;;  %vm2359_vm12 = vcmp.eq.s32.totalorder %v4364_v45, %v2351_v21  ;;  %v3888_v19 = vld [vmem:[%s4461_s25 + $0x90] sm:$0xff]  ;;  %v3891_v21 = vld [vmem:[%s4461_s25 + $0xa8] sm:$0xff] }
  0x87   : > { %3861 = vmatmul.mubr.msk.f32.vlgmr.msra.gmra.mrb[16].mxu0 %vm853_vm3, %v3853_v48  ;;  %v2407_v25 = vadd.f32 %v2399_v17, %v2312_v13  ;;  %v2411_v26 = vadd.f32 %v2403_v24, %v2316_v18  ;;  %v2397_v27 = vrot.slane %v2377_v62, %v4367_v47  ;;  %vm2265_vm13 = vcmp.eq.s32.totalorder %v4361_v38, %v2252_v16  ;;  %v3860_v13 = vld [vmem:[%s4461_s25 + $0x78] sm:$0xff]  ;;  %v3886_v18 = vld [vmem:[%s4461_s25 + $0x80] sm:$0xff]  ;;  %v3892_v62 = vld [vmem:[%s4461_s25 + $0xb0] sm:$0xff] }
  0x88   : > { %3843 = vmatmul.mubr.msk.f32.gmra.mrb[14].mxu1 %vm853_vm3, %v852_v6  ;;  %1823 = vmatprep.mubr.f32.mxu0 %v5856_v0  ;;  %vm2269_vm14 = vcmp.eq.s32.totalorder %v4364_v45, %v2252_v16  ;;  %v2298_v29 = vrot.slane %v2278_v22, %v4367_v47  ;;  %v2339_v30 = vrot.slane %v2323_v23, %v4367_v47  ;;  %v3893_v16 = vld [vmem:[%s4461_s25 + $0xb8] sm:$0xff]  ;;  %v420_v22 = vstv %s3815_s26  ;;  %s5799_s26 = scalar_lea.hbm %s5854_s8, %s3928_s21 }
  0x89   : > { %1930 = vmatprep.mubr.f32.mxu1 %v5856_v0  ;;  %v3945_v32 = vpack.c.bf16 %v2411_v26, %v2407_v25  ;;  %v2401_v33 = vsel %vm2355_vm11, %v2397_v27, 0.0  ;;  %v2405_v34 = vsel %vm2359_vm12, %v2397_v27, 0.0  ;;  %v2365_v35 = vrot.slane %v4604_v5, %v4367_v47 }
  0x8a   : > { %v2409_v36 = vadd.f32 %v2401_v33, %v2314_v61  ;;  %v2413_v37 = vadd.f32 %v2405_v34, %v2318_v9  ;;  %v2311_v56 = vsel %vm2265_vm13, %v2298_v29, 0.0  ;;  %v2315_v39 = vsel %vm2269_vm14, %v2298_v29, 0.0  ;;  %v3889_v61 = vld [vmem:[%s4461_s25 + $0x98] sm:$0xff]  ;;  %v3890_v9 = vld [vmem:[%s4461_s25 + $0xa0] sm:$0xff] }
  0x8b   : > { %3862 = vmatmul.mubr.msk.f32.gmra.mrb[18].mxu0 %vm853_vm3, %v3854_v28  ;;  %3946 = vmatprep.subr.bf16.mxu0 %v3945_v32  ;;  %vm2352_vm15 = vcmp.eq.s32.totalorder %v4361_v38, %v2339_v30  ;;  %vm2356_vm0 = vcmp.eq.s32.totalorder %v4364_v45, %v2339_v30  ;;  %v2385_v40 = vrot.slane %v2365_v35, %v4367_v47  ;;  %v418_v17 = vstv %s406_s27 }
  0x8c   : > { %3869 = vmatmul.mubr.msk.f32.vlgmr.msra.gmra.mrb[16].mxu1 %vm853_vm3, %v3853_v48  ;;  %1829 = vmatprep.mubr.f32.mxu0 %v5856_v0  ;;  %v3949_v42 = vpack.c.bf16 %v2413_v37, %v2409_v36  ;;  %v2260_v43 = vrot.slane %v2244_v63, %v4367_v47  ;;  %v2286_v46 = vrot.slane %v4586_v55, %v4378_v51  ;;  %v3887_v48 = vld [vmem:[%s4461_s25 + $0x88] sm:$0xff]  ;;  %v427_v27 = vstv %s3816_s28 }
  0x8d   : > { %1936 = vmatprep.mubr.f32.mxu1 %v5856_v0  ;;  %v2398_v53 = vsel %vm2352_vm15, %v2385_v40, 0.0  ;;  %v2402_v54 = vsel %vm2356_vm0, %v2385_v40, 0.0  ;;  %v2331_v58 = vrot.slane %v4589_v57, %v4378_v51  ;;  %v2373_v59 = vrot.slane %v4604_v5, %v4378_v51  ;;  %v3856_v57 = vld [vmem:[%s4461_s25 + $0x58] sm:$0xff] }
  0x8e   : > { %3950 = vmatprep.subr.bf16.mxu1 %v3949_v42  ;;  %v2406_v60 = vadd.f32 %v2398_v53, %v2311_v56  ;;  %v2410_v1 = vadd.f32 %v2402_v54, %v2315_v39  ;;  %vm2267_vm1 = vcmp.eq.s32.totalorder %v4361_v38, %v2260_v43  ;;  %vm2271_vm2 = vcmp.eq.s32.totalorder %v4364_v45, %v2260_v43 }
  0x8f   : > { %3863 = vmatmul.mubr.msk.f32.gmra.mrb[20].mxu0 %vm853_vm3, %v3855_v41  ;;  %v2306_v44 = vrot.slane %v2286_v46, %v4367_v47  ;;  %v2347_v55 = vrot.slane %v2331_v58, %v4367_v47  ;;  %v2393_v63 = vrot.slane %v2373_v59, %v4367_v47  ;;  %v421_v23 = vmul.f32 %v420_v22, %v4348_v7 }
  0x90   : > { %3870 = vmatmul.mubr.msk.f32.gmra.mrb[18].mxu1 %vm853_vm3, %v3854_v28  ;;  %1835 = vmatprep.mubr.f32.mxu0 %v5856_v0  ;;  %v3947_v3 = vpack.c.bf16 %v2410_v1, %v2406_v60  ;;  %v419_v24 = vmul.f32 %v418_v17, %v4348_v7  ;;  %v1301_v33 = vmul.f32 %v4350_v8, %v420_v22 }
  0x91   : > { %1942 = vmatprep.mubr.f32.mxu1 %v5856_v0  ;;  %v2313_v4 = vsel %vm2267_vm1, %v2306_v44, 0.0  ;;  %v2317_v5 = vsel %vm2271_vm2, %v2306_v44, 0.0  ;;  %vm2354_vm4 = vcmp.eq.s32.totalorder %v4361_v38, %v2347_v55  ;;  %vm2358_vm5 = vcmp.eq.s32.totalorder %v4364_v45, %v2347_v55 }
  0x92   : > { %3948 = vmatpush1.bf16.msra.mxu0 %v3947_v3  ;;  %v2400_v6 = vsel %vm2354_vm4, %v2393_v63, 0.0  ;;  %v2404_v52 = vsel %vm2358_vm5, %v2393_v63, 0.0  ;;  %v3820_v25 = vrot.slane %v421_v23, 9  ;;  %v1300_v35 = vmul.f32 %v4350_v8, %v418_v17 }
  0x93   : > { %3864 = vmatmul.mubr.msk.f32.gmra.mrb[22].mxu0 %vm853_vm3, %v3856_v57  ;;  %v2408_v10 = vadd.f32 %v2400_v6, %v2313_v4  ;;  %v2412_v11 = vadd.f32 %v2404_v52, %v2317_v5  ;;  %v3845_v36 = vrot.slane %v1301_v33, 9  ;;  %v2176_v53 = vmul.f32 %v4356_v20, %v420_v22 }
  0x94   : > { %3871 = vmatmul.mubr.msk.f32.gmra.mrb[20].mxu1 %vm853_vm3, %v3855_v41  ;;  %1841 = vmatprep.mubr.f32.mxu0 %v5856_v0  ;;  %v426_v26 = vadd.f32 %v3820_v25, %v419_v24  ;;  %v2175_v59 = vmul.f32 %v4356_v20, %v418_v17 }
  0x95   : > { %1948 = vmatprep.mubr.f32.mxu1 %v5856_v0  ;;  %v3951_v14 = vpack.c.bf16 %v2412_v11, %v2408_v10  ;;  %v1306_v56 = vadd.f32 %v3845_v36, %v1300_v35  ;;  %v3878_v60 = vrot.slane %v2176_v53, 9 }
  0x96   : > { %v428_v28 = vadd.f32 %v427_v27, %v426_v26 }
  0x97   : > { %3865 = vmatmul.mubr.msk.f32.gmra.mrb[24].mxu0 %vm853_vm3, %v3857_v12  ;;  %3952 = vmatpush1.bf16.msra.mxu1 %v3951_v14  ;;  %v1307_v40 = vadd.f32 %v1306_v56, %v427_v27  ;;  %v2181_v3 = vadd.f32 %v3878_v60, %v2175_v59 }
  0x98   : > { %3872 = vmatmul.mubr.msk.f32.gmra.mrb[22].mxu1 %vm853_vm3, %v3856_v57  ;;  %1847 = vmatprep.mubr.f32.mxu0 %v5856_v0  ;;  %v441_v29 = vmul.f32 0.06666667, %v428_v28 }
  0x99   : > { %1954 = vmatprep.mubr.f32.mxu1 %v5856_v0  ;;  %v1316_v41 = vmul.f32 0.06666667, %v1307_v40  ;;  %v2182_v11 = vadd.f32 %v2181_v3, %v427_v27 }
  0x9a   : > { %v442_v30 = vmul.f32 2.0, %v441_v29 }
  0x9b   : > { %3866 = vmatmul.mubr.msk.f32.gmra.mrb[26].mxu0 %vm853_vm3, %v3858_v2  ;;  %v1317_v46 = vmul.f32 2.0, %v1316_v41 }
  0x9c   : > { %3873 = vmatmul.mubr.msk.f32.gmra.mrb[24].mxu1 %vm853_vm3, %v3857_v12  ;;  %1853 = vmatprep.mubr.f32.mxu0 %v5856_v0  ;;  %v3822_v32 = vadd.f32 -1.0, %v442_v30 }
  0x9d   : > { %1960 = vmatprep.mubr.f32.mxu1 %v5856_v0  ;;  %v3847_v8 = vadd.f32 -1.0, %v1317_v46 }
  0x9e   : > { %v447_v34 = vadd.f32 1.0, %v3822_v32 }
  0x9f   : > { %3867 = vmatmul.mubr.msk.f32.gmra.mrb[28].mxu0 %vm853_vm3, %v3859_v15  ;;  %v1322_v57 = vadd.f32 1.0, %v3847_v8 }
  0xa0   : > { %3874 = vmatmul.mubr.msk.f32.gmra.mrb[26].mxu1 %vm853_vm3, %v3858_v2  ;;  %1859 = vmatprep.mubr.f32.mxu0 %v5856_v0  ;;  %v448_v37 = vmul.f32 0.5, %v447_v34 }
  0xa1   : > { %1966 = vmatprep.mubr.f32.mxu1 %v5856_v0  ;;  %v1323_v10 = vmul.f32 0.5, %v1322_v57 }
  0xa2   : > { %v449_v39 = vmul.f32 15.0, %v448_v37 }
  0xa3   : > { %3868 = vmatmul.mubr.msk.f32.gmra.mrb[30].mxu0 %vm853_vm3, %v3860_v13 }
  0xa4   : > { %3875 = vmatmul.mubr.msk.f32.gmra.mrb[28].mxu1 %vm853_vm3, %v3859_v15  ;;  %2692 = vmatprep.mubr.f32.mxu0 %v5856_v0  ;;  %v453_v7 = vfloor.f32 %v449_v39 }
  0xa5   : > { %1972 = vmatprep.mubr.f32.mxu1 %v5856_v0 }
  0xa6   : > { %v466_v42 = vadd.f32 1.0, %v453_v7  ;;  %v3967_v43 = vtrunc.f32 %v453_v7  ;;  %vm462_vm6 = vcmp.le.f32.partialorder %v453_v7, 15.0  ;;  %v455_v54 = vsub.f32 %v449_v39, %v453_v7 }
  0xa7   : > { %3894 = vmatmul.mubr.msk.f32.vlgmr.msra.gmra.mrb[32].mxu0 %vm853_vm3, %v3886_v18 }
  0xa8   : > { %3876 = vmatmul.mubr.msk.f32.gmra.mrb[30].mxu1 %vm853_vm3, %v3860_v13  ;;  %2698 = vmatprep.mubr.f32.mxu0 %v5856_v0  ;;  %vm467_vm7 = vcmp.ge.f32.partialorder %v466_v42, 0.0  ;;  %vm468_vm8 = vcmp.le.f32.partialorder %v466_v42, 15.0  ;;  %v3968_v58 = vcvt.f32.s32 %v3967_v43  ;;  %v456_v1 = vsub.f32 1.0, %v455_v54 }
  0xa9   : > { %2805 = vmatprep.mubr.f32.mxu1 %v5856_v0  ;;  %vm469_vm10 = vmand %vm467_vm7, %vm468_vm8  ;;  %v1324_v13 = vmul.f32 15.0, %v1323_v10 }
  0xaa   : > { %v3825_v55 = vsel %vm469_vm10, 1.0, %v5856_v0  ;;  %v750_v63 = vadd.s32 1, %v3968_v58  ;;  %v667_v6 = vrot.slane %v3968_v58, %v4367_v47  ;;  %v675_v15 = vrot.slane %v3968_v58, %v4378_v51 }
  0xab   : > { %3895 = vmatmul.mubr.msk.f32.gmra.mrb[34].mxu0 %vm853_vm3, %v3887_v48  ;;  %v4760_v5 = vmul.f32 %v3825_v55, %v455_v54  ;;  %v679_v32 = vrot.slane %v3968_v58, %v4375_v50 }
  0xac   : > { %3902 = vmatmul.mubr.msk.f32.vlgmr.msra.gmra.mrb[32].mxu1 %vm853_vm3, %v3886_v18  ;;  %2704 = vmatprep.mubr.f32.mxu0 %v5856_v0  ;;  %v754_v52 = vrot.slane %v750_v63, %v4367_v47  ;;  %v4769_v14 = vrot.slane %v667_v6, %v4367_v47  ;;  %v2191_v18 = vmul.f32 0.06666667, %v2182_v11  ;;  %v758_v22 = vrot.slane %v750_v63, %v4372_v49 }
  0xad   : > { %2811 = vmatprep.mubr.f32.mxu1 %v5856_v0  ;;  %v796_v12 = vrot.slane %v4760_v5, %v4367_v47  ;;  %v804_v26 = vrot.slane %v4760_v5, %v4378_v51  ;;  %v800_v30 = vrot.slane %v4760_v5, %v4372_v49  ;;  %v766_v33 = vrot.slane %v750_v63, %v4375_v50 }
  0xae   : > { %v4772_v2 = vrot.slane %v754_v52, %v4367_v47  ;;  %vm696_vm11 = vcmp.eq.s32.totalorder %v4361_v38, %v4769_v14  ;;  %v2192_v23 = vmul.f32 2.0, %v2191_v18  ;;  %v4809_v35 = vrot.slane %v758_v22, %v4367_v47 }
  0xaf   : > { %3896 = vmatmul.mubr.msk.f32.gmra.mrb[36].mxu0 %vm853_vm3, %v3888_v19  ;;  %v824_v37 = vrot.slane %v804_v26, %v4367_v47  ;;  %v808_v42 = vrot.slane %v4760_v5, %v4375_v50  ;;  %v4821_v43 = vrot.slane %v679_v32, %v4367_v47  ;;  %v4824_v46 = vrot.slane %v766_v33, %v4367_v47 }
  0xb0   : > { %3903 = vmatmul.mubr.msk.f32.gmra.mrb[34].mxu1 %vm853_vm3, %v3887_v48  ;;  %2710 = vmatprep.mubr.f32.mxu0 %v5856_v0  ;;  %vm783_vm12 = vcmp.eq.s32.totalorder %v4361_v38, %v4772_v2  ;;  %v3880_v36 = vadd.f32 -1.0, %v2192_v23  ;;  %v820_v53 = vrot.slane %v800_v30, %v4367_v47  ;;  %vm787_vm7 = vcmp.eq.s32.totalorder %v4364_v45, %v4772_v2 }
  0xb1   : > { %2817 = vmatprep.mubr.f32.mxu1 %v5856_v0  ;;  %vm786_vm10 = vcmp.eq.s32.totalorder %v4361_v38, %v4824_v46 }
  0xb2   : > { %v2197_v54 = vadd.f32 1.0, %v3880_v36 }
  0xb3   : > { %3897 = vmatmul.mubr.msk.f32.gmra.mrb[38].mxu0 %vm853_vm3, %v3889_v61 }
  0xb4   : > { %3904 = vmatmul.mubr.msk.f32.gmra.mrb[36].mxu1 %vm853_vm3, %v3888_v19  ;;  %2716 = vmatprep.mubr.f32.mxu0 %v5856_v0  ;;  %v816_v19 = vrot.slane %v796_v12, %v4367_v47  ;;  %v2198_v5 = vmul.f32 0.5, %v2197_v54 }
  0xb5   : > { %2823 = vmatprep.mubr.f32.mxu1 %v5856_v0 }
  0xb6   : > { %v829_v24 = vsel %vm783_vm12, %v816_v19, 0.0 }
  0xb7   : > { %3898 = vmatmul.mubr.msk.f32.gmra.mrb[40].mxu0 %vm853_vm3, %v3890_v9 }
  0xb8   : > { %3905 = vmatmul.mubr.msk.f32.gmra.mrb[38].mxu1 %vm853_vm3, %v3889_v61  ;;  %2722 = vmatprep.mubr.f32.mxu0 %v5856_v0  ;;  %v762_v61 = vrot.slane %v750_v63, %v4378_v51 }
  0xb9   : > { %2829 = vmatprep.mubr.f32.mxu1 %v5856_v0 }
  0xba   : > { %v4790_v25 = vrot.slane %v762_v61, %v4367_v47 }
  0xbb   : > { %3899 = vmatmul.mubr.msk.f32.gmra.mrb[42].mxu0 %vm853_vm3, %v3891_v21 }
  0xbc   : > { %3906 = vmatmul.mubr.msk.f32.gmra.mrb[40].mxu1 %vm853_vm3, %v3890_v9  ;;  %2728 = vmatprep.mubr.f32.mxu0 %v5856_v0  ;;  %vm785_vm0 = vcmp.eq.s32.totalorder %v4361_v38, %v4790_v25  ;;  %vm789_vm12 = vcmp.eq.s32.totalorder %v4364_v45, %v4790_v25 }
  0xbd   : > { %2835 = vmatprep.mubr.f32.mxu1 %v5856_v0  ;;  %v831_v59 = vsel %vm785_vm0, %v824_v37, 0.0  ;;  %vm790_vm0 = vcmp.eq.s32.totalorder %v4364_v45, %v4824_v46 }
  0xbf   : > { %3900 = vmatmul.mubr.msk.f32.gmra.mrb[44].mxu0 %vm853_vm3, %v3892_v62 }
  0xc0   : > { %3907 = vmatmul.mubr.msk.f32.gmra.mrb[42].mxu1 %vm853_vm3, %v3891_v21  ;;  %2734 = vmatprep.mubr.f32.mxu0 %v5856_v0  ;;  %v671_v21 = vrot.slane %v3968_v58, %v4372_v49 }
  0xc1   : > { %2841 = vmatprep.mubr.f32.mxu1 %v5856_v0 }
  0xc2   : > { %v4798_v28 = vrot.slane %v671_v21, %v4367_v47 }
  0xc3   : > { %3901 = vmatmul.mubr.msk.f32.gmra.mrb[46].mxu0 %vm853_vm3, %v3893_v16 }
  0xc4   : > { %3908 = vmatmul.mubr.msk.f32.gmra.mrb[44].mxu1 %vm853_vm3, %v3892_v62  ;;  %3370 = vmatprep.mubr.f32.mxu0 %v5856_v0  ;;  %v4786_v62 = vrot.slane %v675_v15, %v4367_v47  ;;  %vm697_vm5 = vcmp.eq.s32.totalorder %v4361_v38, %v4798_v28 }
  0xc5   : > { %2847 = vmatprep.mubr.f32.mxu1 %v5856_v0 }
  0xc6   : > { %vm698_vm13 = vcmp.eq.s32.totalorder %v4361_v38, %v4786_v62 }
  0xc8   : > { %3909 = vmatmul.mubr.msk.f32.gmra.mrb[46].mxu1 %vm853_vm3, %v3893_v16  ;;  %vm461_vm3 = vcmp.ge.f32.partialorder %v453_v7, 0.0  ;;  %v1328_v16 = vfloor.f32 %v1324_v13 }
  0xc9   : > { %3459 = vmatprep.mubr.f32.mxu1 %v5856_v0  ;;  %vm463_vm9 = vmand %vm461_vm3, %vm462_vm6  ;;  %vm784_vm3 = vcmp.eq.s32.totalorder %v4361_v38, %v4809_v35  ;;  %vm700_vm6 = vcmp.eq.s32.totalorder %v4364_v45, %v4769_v14 }
  0xca   : > { %v3824_v44 = vsel %vm463_vm9, 1.0, %v5856_v0  ;;  %v1341_v34 = vadd.f32 1.0, %v1328_v16  ;;  %vm1336_vm14 = vcmp.ge.f32.partialorder %v1328_v16, 0.0  ;;  %vm1337_vm15 = vcmp.le.f32.partialorder %v1328_v16, 15.0 }
  0xcb   : > { %v4758_v4 = vmul.f32 %v3824_v44, %v456_v1  ;;  %v1330_v56 = vsub.f32 %v1324_v13, %v1328_v16  ;;  %v3971_v39 = vtrunc.f32 %v1328_v16  ;;  %vm1338_vm1 = vmand %vm1336_vm14, %vm1337_vm15  ;;  %v828_v1 = vrot.slane %v808_v42, %v4367_v47 }
  0xcc   : > { %vm1342_vm2 = vcmp.ge.f32.partialorder %v1341_v34, 0.0  ;;  %vm1343_vm4 = vcmp.le.f32.partialorder %v1341_v34, 15.0  ;;  %v3849_v44 = vsel %vm1338_vm1, 1.0, %v5856_v0  ;;  %vm699_vm9 = vcmp.eq.s32.totalorder %v4361_v38, %v4821_v43 }
  0xcd   : > { %v709_v20 = vrot.slane %v4758_v4, %v4367_v47  ;;  %v717_v9 = vrot.slane %v4758_v4, %v4378_v51  ;;  %v713_v29 = vrot.slane %v4758_v4, %v4372_v49  ;;  %v721_v41 = vrot.slane %v4758_v4, %v4375_v50  ;;  %vm1344_vm8 = vmand %vm1342_vm2, %vm1343_vm4 }
  0xce   : > { %v1331_v58 = vsub.f32 1.0, %v1330_v56  ;;  %v4835_v8 = vcvt.f32.s32 %v3971_v39  ;;  %v830_v57 = vsel %vm784_vm3, %v820_v53, 0.0  ;;  %v833_v4 = vsel %vm787_vm7, %v816_v19, 0.0 }
  0xcf   : > { %v729_v48 = vrot.slane %v709_v20, %v4367_v47  ;;  %v4795_v27 = vrot.slane %v717_v9, %v4367_v47  ;;  %v733_v7 = vrot.slane %v713_v29, %v4367_v47  ;;  %v741_v60 = vrot.slane %v721_v41, %v4367_v47 }
  0xd0   : > { %v3850_v52 = vsel %vm1344_vm8, 1.0, %v5856_v0  ;;  %v4855_v10 = vmul.f32 %v3849_v44, %v1331_v58  ;;  %v4858_v11 = vadd.s32 1, %v4835_v8  ;;  %v832_v12 = vsel %vm786_vm10, %v828_v1, 0.0 }
  0xd1   : > { %v742_v17 = vsel %vm696_vm11, %v729_v48, 0.0  ;;  %v744_v40 = vsel %vm698_vm13, %v4795_v27, 0.0  ;;  %v743_v63 = vsel %vm697_vm5, %v733_v7, 0.0  ;;  %v746_v3 = vsel %vm700_vm6, %v729_v48, 0.0 }
  0xd2   : > { %v4843_v55 = vadd.f32 %v829_v24, %v742_v17  ;;  %v4852_v6 = vadd.f32 %v831_v59, %v744_v40  ;;  %v745_v20 = vsel %vm699_vm9, %v741_v60, 0.0  ;;  %vm702_vm11 = vcmp.eq.s32.totalorder %v4364_v45, %v4786_v62 }
  0xd3   : > { %v1542_v14 = vrot.slane %v4835_v8, %v4367_v47  ;;  %v4864_v2 = vadd.f32 %v830_v57, %v743_v63  ;;  %v4866_v15 = vadd.f32 %v833_v4, %v746_v3  ;;  %v1550_v13 = vrot.slane %v4835_v8, %v4378_v51 }
  0xd4   : > { %vm701_vm13 = vcmp.eq.s32.totalorder %v4364_v45, %v4798_v28  ;;  %vm788_vm14 = vcmp.eq.s32.totalorder %v4364_v45, %v4809_v35  ;;  %v4876_v18 = vmul.f32 %v3850_v52, %v1330_v56  ;;  %v2199_v48 = vmul.f32 15.0, %v2198_v5 }
  0xd5   : > { %v4878_v19 = vadd.f32 %v832_v12, %v745_v20  ;;  %v748_v61 = vsel %vm702_vm11, %v4795_v27, 0.0  ;;  %v1584_v9 = vrot.slane %v4855_v10, %v4367_v47  ;;  %v1629_v21 = vrot.slane %v4858_v11, %v4367_v47 }
  0xd6   : > { %v835_v62 = vsel %vm789_vm12, %v824_v37, 0.0  ;;  %v4886_v16 = vrot.slane %v1542_v14, %v4367_v47  ;;  %v1592_v22 = vrot.slane %v4855_v10, %v4378_v51  ;;  %v1637_v23 = vrot.slane %v4858_v11, %v4378_v51 }
  0xd7   : > { %v747_v17 = vsel %vm701_vm13, %v733_v7, 0.0  ;;  %v834_v24 = vsel %vm788_vm14, %v820_v53, 0.0  ;;  %vm703_vm15 = vcmp.eq.s32.totalorder %v4364_v45, %v4821_v43  ;;  %v4895_v25 = vrot.slane %v1550_v13, %v4367_v47 }
  0xd8   : > { %v1671_v26 = vrot.slane %v4876_v18, %v4367_v47  ;;  %v1546_v27 = vrot.slane %v4835_v8, %v4372_v49  ;;  %v2203_v28 = vfloor.f32 %v2199_v48  ;;  %v4903_v29 = vadd.f32 %v835_v62, %v748_v61 }
  0xd9   : > { %v1604_v30 = vrot.slane %v1584_v9, %v4367_v47  ;;  %v1645_v32 = vrot.slane %v1629_v21, %v4367_v47  ;;  %v1679_v33 = vrot.slane %v4876_v18, %v4378_v51  ;;  %v4909_v34 = vadd.f32 %v834_v24, %v747_v17 }
  0xda   : > { %vm1571_vm1 = vcmp.eq.s32.totalorder %v4361_v38, %v4886_v16  ;;  %v4914_v35 = vrot.slane %v1592_v22, %v4367_v47  ;;  %v4917_v36 = vrot.slane %v1637_v23, %v4367_v47  ;;  %v749_v37 = vsel %vm703_vm15, %v741_v60, 0.0 }
  0xdb   : > { %v836_v56 = vsel %vm790_vm0, %v828_v1, 0.0  ;;  %vm1573_vm2 = vcmp.eq.s32.totalorder %v4361_v38, %v4895_v25  ;;  %v1633_v39 = vrot.slane %v4858_v11, %v4372_v49  ;;  %v1691_v40 = vrot.slane %v1671_v26, %v4367_v47 }
  0xdc   : > { %v4925_v7 = vrot.slane %v1546_v27, %v4367_v47  ;;  %v1554_v41 = vrot.slane %v4835_v8, %v4375_v50  ;;  %v2216_v42 = vadd.f32 1.0, %v2203_v28  ;;  %v1617_v43 = vsel %vm1571_vm1, %v1604_v30, 0.0 }
  0xdd   : > { %vm1658_vm4 = vcmp.eq.s32.totalorder %v4361_v38, %v1645_v32  ;;  %v1699_v46 = vrot.slane %v1679_v33, %v4367_v47  ;;  %v3975_v53 = vtrunc.f32 %v2203_v28  ;;  %v1619_v54 = vsel %vm1573_vm2, %v4914_v35, 0.0 }
  0xde   : > { %vm1660_vm5 = vcmp.eq.s32.totalorder %v4361_v38, %v4917_v36  ;;  %v1588_v58 = vrot.slane %v4855_v10, %v4372_v49  ;;  %v1675_v59 = vrot.slane %v4876_v18, %v4372_v49  ;;  %v4939_v8 = vrot.slane %v1633_v39, %v4367_v47 }
  0xdf   : > { %v1641_v60 = vrot.slane %v4858_v11, %v4375_v50  ;;  %vm2211_vm3 = vcmp.ge.f32.partialorder %v2203_v28, 0.0  ;;  %vm2212_vm6 = vcmp.le.f32.partialorder %v2203_v28, 15.0  ;;  %v1704_v1 = vsel %vm1658_vm4, %v1691_v40, 0.0 }
  0xe0   : > { %v2205_v44 = vsub.f32 %v2199_v48, %v2203_v28  ;;  %vm2217_vm7 = vcmp.ge.f32.partialorder %v2216_v42, 0.0  ;;  %vm2218_vm8 = vcmp.le.f32.partialorder %v2216_v42, 15.0  ;;  %v1706_v63 = vsel %vm1660_vm5, %v1699_v46, 0.0  ;;  %vm2213_vm10 = vmand %vm2211_vm3, %vm2212_vm6 }
  0xe1   : > { %v4944_v57 = vrot.slane %v1554_v41, %v4367_v47  ;;  %v1596_v3 = vrot.slane %v4855_v10, %v4375_v50  ;;  %v4948_v4 = vcvt.f32.s32 %v3975_v53  ;;  %v4950_v5 = vadd.f32 %v836_v56, %v749_v37  ;;  %vm2219_vm12 = vmand %vm2217_vm7, %vm2218_vm8 }
  0xe2   : > { %vm1572_vm9 = vcmp.eq.s32.totalorder %v4361_v38, %v4925_v7  ;;  %v1608_v52 = vrot.slane %v1588_v58, %v4367_v47  ;;  %v4956_v11 = vrot.slane %v1675_v59, %v4367_v47  ;;  %v4958_v20 = vadd.f32 %v1704_v1, %v1617_v43 }
  0xe3   : > { %vm1659_vm11 = vcmp.eq.s32.totalorder %v4361_v38, %v4939_v8  ;;  %v4963_v10 = vrot.slane %v1641_v60, %v4367_v47  ;;  %v1683_v12 = vrot.slane %v4876_v18, %v4375_v50  ;;  %v4968_v14 = vadd.f32 %v1706_v63, %v1619_v54 }
  0xe4   : > { %vm1575_vm13 = vcmp.eq.s32.totalorder %v4364_v45, %v4886_v16  ;;  %vm1662_vm14 = vcmp.eq.s32.totalorder %v4364_v45, %v1645_v32  ;;  %v2206_v13 = vsub.f32 1.0, %v2205_v44  ;;  %vm1574_vm15 = vcmp.eq.s32.totalorder %v4361_v38, %v4944_v57 }
  0xe5   : > { %v1616_v48 = vrot.slane %v1596_v3, %v4367_v47  ;;  %v3882_v61 = vsel %vm2213_vm10, 1.0, %v5856_v0  ;;  %v4978_v9 = vadd.s32 1, %v4948_v4  ;;  %v1618_v18 = vsel %vm1572_vm9, %v1608_v52, 0.0 }
  0xe6   : > { %v1705_v21 = vsel %vm1659_vm11, %v4956_v11, 0.0  ;;  %vm1577_vm0 = vcmp.eq.s32.totalorder %v4364_v45, %v4895_v25  ;;  %v3883_v62 = vsel %vm2219_vm12, 1.0, %v5856_v0  ;;  %vm1661_vm1 = vcmp.eq.s32.totalorder %v4361_v38, %v4963_v10 }
  0xe7   : > { %v1703_v16 = vrot.slane %v1683_v12, %v4367_v47  ;;  %v1621_v22 = vsel %vm1575_vm13, %v1604_v30, 0.0  ;;  %v1708_v23 = vsel %vm1662_vm14, %v1691_v40, 0.0  ;;  %vm1664_vm2 = vcmp.eq.s32.totalorder %v4364_v45, %v4917_v36 }
  0xe8   : > { %v2417_v17 = vrot.slane %v4948_v4, %v4367_v47  ;;  %v4994_v24 = vmul.f32 %v3882_v61, %v2206_v13  ;;  %v2425_v25 = vrot.slane %v4948_v4, %v4378_v51  ;;  %v4998_v26 = vadd.f32 %v1705_v21, %v1618_v18 }
  0xe9   : > { %v1620_v27 = vsel %vm1574_vm15, %v1616_v48, 0.0  ;;  %v2504_v28 = vrot.slane %v4978_v9, %v4367_v47  ;;  %v5005_v30 = vmul.f32 %v3883_v62, %v2205_v44  ;;  %v5007_v32 = vadd.f32 %v1708_v23, %v1621_v22 }
  0xea   : > { %v1623_v33 = vsel %vm1577_vm0, %v4914_v35, 0.0  ;;  %vm1576_vm4 = vcmp.eq.s32.totalorder %v4364_v45, %v4925_v7  ;;  %v2512_v36 = vrot.slane %v4978_v9, %v4378_v51  ;;  %v1707_v37 = vsel %vm1661_vm1, %v1703_v16, 0.0 }
  0xeb   : > { %v1710_v56 = vsel %vm1664_vm2, %v1699_v46, 0.0  ;;  %v2421_v39 = vrot.slane %v4948_v4, %v4372_v49  ;;  %v2508_v40 = vrot.slane %v4978_v9, %v4372_v49  ;;  %v2433_v41 = vrot.slane %v2417_v17, %v4367_v47 }
  0xec   : > { %v2459_v35 = vrot.slane %v4994_v24, %v4367_v47  ;;  %v5025_v7 = vrot.slane %v2425_v25, %v4367_v47  ;;  %v2467_v42 = vrot.slane %v4994_v24, %v4378_v51  ;;  %v1622_v43 = vsel %vm1576_vm4, %v1608_v52, 0.0 }
  0xed   : > { %v2520_v46 = vrot.slane %v2504_v28, %v4367_v47  ;;  %v2546_v53 = vrot.slane %v5005_v30, %v4367_v47  ;;  %v2554_v54 = vrot.slane %v5005_v30, %v4378_v51  ;;  %vm1663_vm5 = vcmp.eq.s32.totalorder %v4364_v45, %v4939_v8 }
  0xee   : > { %v5037_v58 = vrot.slane %v2512_v36, %v4367_v47  ;;  %v2463_v59 = vrot.slane %v4994_v24, %v4372_v49  ;;  %v2550_v60 = vrot.slane %v5005_v30, %v4372_v49  ;;  %vm1578_vm3 = vcmp.eq.s32.totalorder %v4364_v45, %v4944_v57 }
  0xef   : > { %vm1665_vm6 = vcmp.eq.s32.totalorder %v4364_v45, %v4963_v10  ;;  %v5048_v51 = vrot.slane %v2421_v39, %v4367_v47  ;;  %v5051_v1 = vrot.slane %v2508_v40, %v4367_v47  ;;  %vm2446_vm7 = vcmp.eq.s32.totalorder %v4361_v38, %v2433_v41 }
  0xf0   : > { %v2479_v44 = vrot.slane %v2459_v35, %v4367_v47  ;;  %vm2448_vm8 = vcmp.eq.s32.totalorder %v4361_v38, %v5025_v7  ;;  %v2487_v49 = vrot.slane %v2467_v42, %v4367_v47  ;;  %vm2533_vm9 = vcmp.eq.s32.totalorder %v4361_v38, %v2520_v46 }
  0xf1   : > { %v2566_v63 = vrot.slane %v2546_v53, %v4367_v47  ;;  %v2574_v3 = vrot.slane %v2554_v54, %v4367_v47  ;;  %v2429_v52 = vrot.slane %v4948_v4, %v4375_v50  ;;  %vm2535_vm10 = vcmp.eq.s32.totalorder %v4361_v38, %v5037_v58 }
  0xf2   : > { %v2483_v12 = vrot.slane %v2463_v59, %v4367_v47  ;;  %v2570_v13 = vrot.slane %v2550_v60, %v4367_v47  ;;  %v2516_v61 = vrot.slane %v4978_v9, %v4375_v50  ;;  %v1709_v18 = vsel %vm1663_vm5, %v4956_v11, 0.0 }
  0xf3   : > { %v1624_v21 = vsel %vm1578_vm3, %v1616_v48, 0.0  ;;  %vm2447_vm11 = vcmp.eq.s32.totalorder %v4361_v38, %v5048_v51  ;;  %vm2534_vm12 = vcmp.eq.s32.totalorder %v4361_v38, %v5051_v1  ;;  %v1711_v4 = vsel %vm1665_vm6, %v1703_v16, 0.0 }
  0xf4   : > { %v2492_v9 = vsel %vm2446_vm7, %v2479_v44, 0.0  ;;  %v2494_v8 = vsel %vm2448_vm8, %v2487_v49, 0.0  ;;  %v2471_v57 = vrot.slane %v4994_v24, %v4375_v50  ;;  %v2579_v11 = vsel %vm2533_vm9, %v2566_v63, 0.0 }
  0xf5   : > { %v2581_v48 = vsel %vm2535_vm10, %v2574_v3, 0.0  ;;  %v2445_v62 = vrot.slane %v2429_v52, %v4367_v47  ;;  %v2558_v10 = vrot.slane %v5005_v30, %v4375_v50  ;;  %v2493_v22 = vsel %vm2447_vm11, %v2483_v12, 0.0 }
  0xf6   : > { %v2580_v23 = vsel %vm2534_vm12, %v2570_v13, 0.0  ;;  %v2532_v17 = vrot.slane %v2516_v61, %v4367_v47  ;;  %vm2450_vm13 = vcmp.eq.s32.totalorder %v4364_v45, %v2433_v41  ;;  %v5097_v28 = vadd.f32 %v1707_v37, %v1620_v27 }
  0xf7   : > { %v5099_v24 = vadd.f32 %v1710_v56, %v1623_v33  ;;  %v5101_v36 = vadd.f32 %v1709_v18, %v1622_v43  ;;  %vm2537_vm14 = vcmp.eq.s32.totalorder %v4364_v45, %v2520_v46  ;;  %v5104_v39 = vadd.f32 %v1711_v4, %v1624_v21 }
  0xf8   : > { %v5106_v40 = vadd.f32 %v2579_v11, %v2492_v9  ;;  %v5108_v50 = vadd.f32 %v2581_v48, %v2494_v8  ;;  %v2491_v30 = vrot.slane %v2471_v57, %v4367_v47  ;;  %v5111_v35 = vadd.f32 %v2580_v23, %v2493_v22 }
  0xf9   : > { %vm2449_vm15 = vcmp.eq.s32.totalorder %v4361_v38, %v2445_v62  ;;  %v2578_v27 = vrot.slane %v2558_v10, %v4367_v47  ;;  %v2496_v33 = vsel %vm2450_vm13, %v2479_v44, 0.0  ;;  %vm2536_vm0 = vcmp.eq.s32.totalorder %v4361_v38, %v2532_v17 }
  0xfa   : > { %5880 = vst [vmem:[#allocation10_spill] sm:$0xff] %v5106_v40  ;;  %5881 = vst [vmem:[#allocation11_spill] sm:$0xff] %v5108_v50  ;;  %v2583_v56 = vsel %vm2537_vm14, %v2566_v63, 0.0  ;;  %vm2452_vm1 = vcmp.eq.s32.totalorder %v4364_v45, %v5025_v7  ;;  %vm2539_vm2 = vcmp.eq.s32.totalorder %v4364_v45, %v5037_v58  ;;  %vm2451_vm4 = vcmp.eq.s32.totalorder %v4364_v45, %v5048_v51 }
  0xfb   : > { %5882 = vst [vmem:[#allocation12_spill] sm:$0xff] %v5111_v35  ;;  %vm2538_vm5 = vcmp.eq.s32.totalorder %v4364_v45, %v5051_v1  ;;  %vm2453_vm3 = vcmp.eq.s32.totalorder %v4364_v45, %v2445_v62  ;;  %vm2540_vm6 = vcmp.eq.s32.totalorder %v4364_v45, %v2532_v17  ;;  %v2495_v60 = vsel %vm2449_vm15, %v2491_v30, 0.0 }
  0xfc   : > { %v2582_v44 = vsel %vm2536_vm0, %v2578_v27, 0.0  ;;  %v5134_v51 = vadd.f32 %v2583_v56, %v2496_v33  ;;  %v2498_v61 = vsel %vm2452_vm1, %v2487_v49, 0.0  ;;  %v2585_v18 = vsel %vm2539_vm2, %v2574_v3, 0.0 }
  0xfd   : > { %v2497_v21 = vsel %vm2451_vm4, %v2483_v12, 0.0  ;;  %v2584_v57 = vsel %vm2538_vm5, %v2570_v13, 0.0  ;;  %v2499_v11 = vsel %vm2453_vm3, %v2491_v30, 0.0  ;;  %v2586_v48 = vsel %vm2540_vm6, %v2578_v27, 0.0 }
  0xfe   : > { %5883 = vst [vmem:[#allocation13_spill] sm:$0xff] %v5134_v51  ;;  %v5151_v22 = vadd.f32 %v2585_v18, %v2498_v61  ;;  %v5153_v13 = vadd.f32 %v2584_v57, %v2497_v21  ;;  %v5155_v17 = vadd.f32 %v2586_v48, %v2499_v11  ;;  %vm3198_vm7 = vcmask 1044484  }
  0xff   : > { %vm3200_vm8 = vcmask 1045509   ;;  %vm3202_vm9 = vcmask 1046534   ;;  %vm3247_vm10 = vcmask 1042432   ;;  %vm3233_vm11 = vcmask 1041409  }
 0x100   : > { %5885 = vst [vmem:[#allocation15_spill] sm:$0xff] %v5151_v22  ;;  %5886 = vst [vmem:[#allocation16_spill] sm:$0xff] %v5153_v13  ;;  %vm3252_vm12 = vcmask 1046528   ;;  %vm3235_vm13 = vcmask 1042434   ;;  %vm4211_vm14 = vmmov 1   ;;  %vm3285_vm0 = vcmask 89088  }
 0x101   : > { %5887 = vst [vmem:[#allocation17_spill] sm:$0xff] %v5155_v17  ;;  %vm5740_vm15 = vmpackc.low %vm3247_vm10, %vm4211_vm14 }
 0x13a   : > { %v944_v16 = vpop.f32.mrb[0].mxu0 }
 0x13b   : > { %v946_v25 = vpop.f32.mrb[1].mxu0  ;;  %v1104_v41 = vmul.f32 %v944_v16, %v4843_v55  ;;  %v5147_v16 = vadd.f32 %v2582_v44, %v2495_v60 }
 0x13c   : > { %v1105_v47 = vmul.f32 %v946_v25, %v4864_v2 }
 0x13d   : > { %5884 = vst [vmem:[#allocation14_spill] sm:$0xff] %v5147_v16 }
 0x13e   : > { %v950_v37 = vpop.f32.mrb[2].mxu0 }
 0x13f   : > { %v1057_v42 = vpop.f32.mrb[0].mxu1  ;;  %v1108_v43 = vmul.f32 %v950_v37, %v4866_v15  ;;  %v952_v46 = vpop.f32.mrb[3].mxu0 }
 0x140   : > { %v1059_v53 = vpop.f32.mrb[1].mxu1  ;;  %v1109_v54 = vmul.f32 %v952_v46, %v4909_v34  ;;  %v1106_v62 = vmul.f32 %v1057_v42, %v4852_v6 }
 0x141   : > { %v1136_v59 = vadd.f32 %v1108_v43, %v1104_v41  ;;  %v1107_v58 = vmul.f32 %v1059_v53, %v4878_v19 }
 0x142   : > { %v1143_v63 = vadd.f32 %v1109_v54, %v1105_v47  ;;  %v956_v52 = vpop.f32.mrb[4].mxu0 }
 0x143   : > { %v1137_v4 = vrot.slane %v1136_v59, 4  ;;  %v1063_v9 = vpop.f32.mrb[2].mxu1  ;;  %v958_v8 = vpop.f32.mrb[5].mxu0  ;;  %v1112_v27 = vmul.f32 %v956_v52, %v4843_v55 }
 0x144   : > { %v1110_v10 = vmul.f32 %v1063_v9, %v4903_v29  ;;  %v1144_v7 = vrot.slane %v1143_v63, 4  ;;  %v1065_v49 = vpop.f32.mrb[3].mxu1  ;;  %v1113_v43 = vmul.f32 %v958_v8, %v4864_v2 }
 0x145   : > { %v1138_v3 = vadd.f32 %v1137_v4, %v1136_v59  ;;  %v1111_v12 = vmul.f32 %v1065_v49, %v4950_v5 }
 0x146   : > { %v1150_v23 = vadd.f32 %v1110_v10, %v1106_v62  ;;  %v1145_v45 = vadd.f32 %v1144_v7, %v1143_v63  ;;  %v962_v1 = vpop.f32.mrb[6].mxu0 }
 0x147   : > { %v1139_v25 = vrot.slane %v1138_v3, 2  ;;  %v1157_v30 = vadd.f32 %v1111_v12, %v1107_v58  ;;  %v1069_v33 = vpop.f32.mrb[4].mxu1  ;;  %v1116_v37 = vmul.f32 %v962_v1, %v4866_v15  ;;  %v964_v56 = vpop.f32.mrb[7].mxu0 }
 0x148   : > { %v1151_v41 = vrot.slane %v1150_v23, 4  ;;  %v1146_v42 = vrot.slane %v1145_v45, 2  ;;  %v1071_v46 = vpop.f32.mrb[5].mxu1  ;;  %v1117_v47 = vmul.f32 %v964_v56, %v4909_v34  ;;  %v1114_v59 = vmul.f32 %v1069_v33, %v4852_v6 }
 0x149   : > { %v1140_v53 = vadd.f32 %v1139_v25, %v1138_v3  ;;  %v1158_v54 = vrot.slane %v1157_v30, 4  ;;  %v1164_v60 = vadd.f32 %v1116_v37, %v1112_v27  ;;  %v1115_v52 = vmul.f32 %v1071_v46, %v4878_v19 }
 0x14a   : > { %v1152_v44 = vadd.f32 %v1151_v41, %v1150_v23  ;;  %v1147_v63 = vadd.f32 %v1146_v42, %v1145_v45  ;;  %v1171_v61 = vadd.f32 %v1117_v47, %v1113_v43  ;;  %v968_v18 = vpop.f32.mrb[8].mxu0 }
 0x14b   : > { %v1141_v21 = vrot.slane %v1140_v53, 1  ;;  %v1159_v4 = vadd.f32 %v1158_v54, %v1157_v30  ;;  %v1165_v9 = vrot.slane %v1164_v60, 4  ;;  %v1075_v57 = vpop.f32.mrb[6].mxu1  ;;  %v1120_v8 = vmul.f32 %v968_v18, %v4843_v55  ;;  %v970_v11 = vpop.f32.mrb[9].mxu0 }
 0x14c   : > { %v1153_v48 = vrot.slane %v1152_v44, 2  ;;  %v1148_v62 = vrot.slane %v1147_v63, 1  ;;  %v1118_v10 = vmul.f32 %v1075_v57, %v4903_v29  ;;  %v1172_v7 = vrot.slane %v1171_v61, 4  ;;  %v1077_v49 = vpop.f32.mrb[7].mxu1 }
 0x14d   : > { %v5165_v58 = vadd.f32 %v1141_v21, %v1140_v53  ;;  %v1160_v3 = vrot.slane %v1159_v4, 2  ;;  %v1166_v12 = vadd.f32 %v1165_v9, %v1164_v60  ;;  %v1119_v23 = vmul.f32 %v1077_v49, %v4950_v5 }
 0x14e   : > { %v1154_v45 = vadd.f32 %v1153_v48, %v1152_v44  ;;  %v5168_v1 = vadd.f32 %v1148_v62, %v1147_v63  ;;  %v1178_v25 = vadd.f32 %v1118_v10, %v1114_v59  ;;  %v1173_v30 = vadd.f32 %v1172_v7, %v1171_v61  ;;  %v974_v27 = vpop.f32.mrb[10].mxu0 }
 0x14f   : > { %v5172_v33 = vmul.f32 %v5165_v58, %v5165_v58  ;;  %v1161_v37 = vadd.f32 %v1160_v3, %v1159_v4  ;;  %v1167_v56 = vrot.slane %v1166_v12, 2  ;;  %v1185_v41 = vadd.f32 %v1119_v23, %v1115_v52  ;;  %v1081_v42 = vpop.f32.mrb[8].mxu1  ;;  %v976_v43 = vpop.f32.mrb[11].mxu0 }
 0x150   : > { %v1155_v46 = vrot.slane %v1154_v45, 1  ;;  %v5176_v47 = vmul.f32 %v5168_v1, %v5168_v1  ;;  %v1179_v53 = vrot.slane %v1178_v25, 4  ;;  %v1174_v54 = vrot.slane %v1173_v30, 2  ;;  %v1083_v60 = vpop.f32.mrb[9].mxu1 }
 0x151   : > { %v1162_v59 = vrot.slane %v1161_v37, 1  ;;  %v1168_v44 = vadd.f32 %v1167_v56, %v1166_v12  ;;  %v1186_v63 = vrot.slane %v1185_v41, 4  ;;  %v1122_v61 = vmul.f32 %v1081_v42, %v4852_v6 }
 0x152   : > { %v5179_v18 = vadd.f32 %v1155_v46, %v1154_v45  ;;  %v1180_v21 = vadd.f32 %v1179_v53, %v1178_v25  ;;  %v1175_v4 = vadd.f32 %v1174_v54, %v1173_v30  ;;  %v1121_v52 = vmul.f32 %v970_v11, %v4864_v2  ;;  %v980_v9 = vpop.f32.mrb[12].mxu0 }
 0x153   : > { %v5182_v57 = vadd.f32 %v1162_v59, %v1161_v37  ;;  %v1169_v48 = vrot.slane %v1168_v44, 1  ;;  %v1187_v62 = vadd.f32 %v1186_v63, %v1185_v41  ;;  %v1123_v10 = vmul.f32 %v1083_v60, %v4878_v19  ;;  %v1087_v7 = vpop.f32.mrb[10].mxu1  ;;  %v982_v49 = vpop.f32.mrb[13].mxu0 }
 0x154   : > { %v5187_v3 = vmul.f32 %v5179_v18, %v5179_v18  ;;  %v1181_v12 = vrot.slane %v1180_v21, 2  ;;  %v1176_v23 = vrot.slane %v1175_v4, 1  ;;  %v1124_v45 = vmul.f32 %v974_v27, %v4866_v15  ;;  %v1089_v25 = vpop.f32.mrb[11].mxu1 }
 0x155   : > { %v5192_v11 = vmul.f32 %v5182_v57, %v5182_v57  ;;  %v5194_v30 = vadd.f32 %v1169_v48, %v1168_v44  ;;  %v1188_v37 = vrot.slane %v1187_v62, 2  ;;  %v1126_v56 = vmul.f32 %v1087_v7, %v4903_v29 }
 0x156   : > { %v1182_v41 = vadd.f32 %v1181_v12, %v1180_v21  ;;  %v5197_v42 = vadd.f32 %v1176_v23, %v1175_v4  ;;  %v1192_v46 = vadd.f32 %v1124_v45, %v1120_v8  ;;  %v1125_v53 = vmul.f32 %v976_v43, %v4909_v34  ;;  %v986_v54 = vpop.f32.mrb[14].mxu0 }
 0x157   : > { %v5202_v27 = vmul.f32 %v5194_v30, %v5194_v30  ;;  %v1189_v60 = vadd.f32 %v1188_v37, %v1187_v62  ;;  %v1206_v59 = vadd.f32 %v1126_v56, %v1122_v61  ;;  %v1127_v63 = vmul.f32 %v1089_v25, %v4950_v5  ;;  %v1093_v44 = vpop.f32.mrb[12].mxu1  ;;  %v988_v48 = vpop.f32.mrb[15].mxu0 }
 0x158   : > { %v1183_v31 = vrot.slane %v1182_v41, 1  ;;  %v5207_v21 = vmul.f32 %v5197_v42, %v5197_v42  ;;  %v1193_v4 = vrot.slane %v1192_v46, 4  ;;  %v1199_v8 = vadd.f32 %v1125_v53, %v1121_v52  ;;  %v1095_v7 = vpop.f32.mrb[13].mxu1 }
 0x159   : > { %v1190_v43 = vrot.slane %v1189_v60, 1  ;;  %v1207_v12 = vrot.slane %v1206_v59, 4  ;;  %v1213_v23 = vadd.f32 %v1127_v63, %v1123_v10  ;;  %v1128_v45 = vmul.f32 %v980_v9, %v4843_v55 }
 0x15a   : > { %v5210_v0 = vadd.f32 %v1183_v31, %v1182_v41  ;;  %v1194_v61 = vadd.f32 %v1193_v4, %v1192_v46  ;;  %v1200_v62 = vrot.slane %v1199_v8, 4  ;;  %v1130_v25 = vmul.f32 %v1093_v44, %v4852_v6  ;;  %v1819_v37 = vpop.f32.mrb[16].mxu0 }
 0x15b   : > { %v5213_v56 = vadd.f32 %v1190_v43, %v1189_v60  ;;  %v1208_v38 = vadd.f32 %v1207_v12, %v1206_v59  ;;  %v1214_v17 = vrot.slane %v1213_v23, 4  ;;  %v1129_v13 = vmul.f32 %v982_v49, %v4864_v2  ;;  %v1099_v52 = vpop.f32.mrb[14].mxu1  ;;  %v5216_v53 = vpop.f32.mrb[17].mxu0 }
 0x15c   : > { %v5220_v10 = vmul.f32 %v5210_v0, %v5210_v0  ;;  %v1195_v31 = vrot.slane %v1194_v61, 2  ;;  %v1201_v55 = vadd.f32 %v1200_v62, %v1199_v8  ;;  %v1131_v9 = vmul.f32 %v1095_v7, %v4878_v19  ;;  %v1101_v41 = vpop.f32.mrb[15].mxu1 }
 0x15d   : > { %v5225_v6 = vmul.f32 %v5213_v56, %v5213_v56  ;;  %v1209_v46 = vrot.slane %v1208_v38, 2  ;;  %v1215_v60 = vadd.f32 %v1214_v17, %v1213_v23  ;;  %v1132_v2 = vmul.f32 %v986_v54, %v4866_v15 }
 0x15e   : > { %v1196_v49 = vadd.f32 %v1195_v31, %v1194_v61  ;;  %v1202_v59 = vrot.slane %v1201_v55, 2  ;;  %v1134_v63 = vmul.f32 %v1099_v52, %v4903_v29  ;;  %v1133_v44 = vmul.f32 %v988_v48, %v4909_v34  ;;  %v1825_v4 = vpop.f32.mrb[18].mxu0 }
 0x15f   : > { %5888 = vst [vmem:[#allocation18_spill] sm:$0xff] %v5225_v6  ;;  %v1210_v43 = vadd.f32 %v1209_v46, %v1208_v38  ;;  %v1216_v8 = vrot.slane %v1215_v60, 2  ;;  %v1220_v12 = vadd.f32 %v1132_v2, %v1128_v45  ;;  %v1135_v19 = vmul.f32 %v1101_v41, %v4950_v5  ;;  %v1932_v7 = vpop.f32.mrb[16].mxu1  ;;  %v1827_v62 = vpop.f32.mrb[19].mxu0 }
 0x160   : > { %v1197_v22 = vrot.slane %v1196_v49, 1  ;;  %v1203_v51 = vadd.f32 %v1202_v59, %v1201_v55  ;;  %v1234_v16 = vadd.f32 %v1134_v63, %v1130_v25  ;;  %v1227_v17 = vadd.f32 %v1133_v44, %v1129_v13  ;;  %v1934_v23 = vpop.f32.mrb[17].mxu1 }
 0x161   : > { %v1211_v15 = vrot.slane %v1210_v43, 1  ;;  %v1217_v54 = vadd.f32 %v1216_v8, %v1215_v60  ;;  %v1221_v61 = vrot.slane %v1220_v12, 4  ;;  %v1241_v31 = vadd.f32 %v1135_v19, %v1131_v9 }
 0x162   : > { %v5231_v29 = vadd.f32 %v1197_v22, %v1196_v49  ;;  %v1204_v34 = vrot.slane %v1203_v51, 1  ;;  %v1235_v48 = vrot.slane %v1234_v16, 4  ;;  %v1228_v38 = vrot.slane %v1227_v17, 4  ;;  %v5233_v52 = vpop.f32.mrb[20].mxu0 }
 0x163   : > { %v5235_v45 = vadd.f32 %v1211_v15, %v1210_v43  ;;  %v1218_v5 = vrot.slane %v1217_v54, 1  ;;  %v1222_v41 = vadd.f32 %v1221_v61, %v1220_v12  ;;  %v1242_v46 = vrot.slane %v1241_v31, 4  ;;  %v1938_v55 = vpop.f32.mrb[18].mxu1  ;;  %v5237_v25 = vpop.f32.mrb[21].mxu0 }
 0x164   : > { %5889 = vst [vmem:[#allocation19_spill] sm:$0xff] %v5231_v29  ;;  %v5241_v13 = vmul.f32 %v5231_v29, %v5231_v29  ;;  %v5243_v9 = vadd.f32 %v1204_v34, %v1203_v51  ;;  %v1236_v22 = vadd.f32 %v1235_v48, %v1234_v16  ;;  %v1229_v60 = vadd.f32 %v1228_v38, %v1227_v17  ;;  %v1940_v2 = vpop.f32.mrb[19].mxu1 }
 0x165   : > { %5890 = vst [vmem:[#allocation20_spill] sm:$0xff] %v5235_v45  ;;  %v5247_v49 = vmul.f32 %v5235_v45, %v5235_v45  ;;  %v5249_v59 = vadd.f32 %v1218_v5, %v1217_v54  ;;  %v1223_v63 = vrot.slane %v1222_v41, 2  ;;  %v1243_v44 = vadd.f32 %v1242_v46, %v1241_v31 }
 0x166   : > { %5891 = vst [vmem:[#allocation21_spill] sm:$0xff] %v5241_v13  ;;  %5892 = vst [vmem:[#allocation22_spill] sm:$0xff] %v5243_v9  ;;  %v5253_v43 = vmul.f32 %v5243_v9, %v5243_v9  ;;  %v1237_v8 = vrot.slane %v1236_v22, 2  ;;  %v1230_v12 = vrot.slane %v1229_v60, 2  ;;  %v1979_v51 = vmul.f32 %v1819_v37, %v4958_v20  ;;  %v1837_v19 = vpop.f32.mrb[22].mxu0 }
 0x167   : > { %5893 = vst [vmem:[#allocation23_spill] sm:$0xff] %v5247_v49  ;;  %5894 = vst [vmem:[#allocation24_spill] sm:$0xff] %v5249_v59  ;;  %v5258_v16 = vmul.f32 %v5249_v59, %v5249_v59  ;;  %v1224_v17 = vadd.f32 %v1223_v63, %v1222_v41  ;;  %v1244_v15 = vrot.slane %v1243_v44, 2  ;;  %v1981_v54 = vmul.f32 %v1932_v7, %v4968_v14  ;;  %v1944_v61 = vpop.f32.mrb[20].mxu1  ;;  %v1839_v34 = vpop.f32.mrb[23].mxu0 }
 0x168   : > { %5895 = vst [vmem:[#allocation25_spill] sm:$0xff] %v5253_v43  ;;  %v1238_v31 = vadd.f32 %v1237_v8, %v1236_v22  ;;  %v1231_v48 = vadd.f32 %v1230_v12, %v1229_v60  ;;  %v1980_v38 = vmul.f32 %v5216_v53, %v4998_v26  ;;  %v1982_v5 = vmul.f32 %v1934_v23, %v5097_v28  ;;  %v1946_v46 = vpop.f32.mrb[21].mxu1 }
 0x169   : > { %5896 = vst [vmem:[#allocation26_spill] sm:$0xff] %v5258_v16  ;;  %v1225_v37 = vrot.slane %v1224_v17, 1  ;;  %v1245_v35 = vadd.f32 %v1244_v15, %v1243_v44  ;;  %v1983_v50 = vmul.f32 %v1825_v4, %v5007_v32  ;;  %v1985_v16 = vmul.f32 %v1938_v55, %v5099_v24 }
 0x16a   : > { %v1239_v41 = vrot.slane %v1238_v31, 1  ;;  %v1232_v63 = vrot.slane %v1231_v48, 1  ;;  %v1984_v7 = vmul.f32 %v1827_v62, %v5101_v36  ;;  %v1986_v40 = vmul.f32 %v1940_v2, %v5104_v39  ;;  %v5268_v22 = vpop.f32.mrb[24].mxu0 }
 0x16b   : > { %v5270_v60 = vadd.f32 %v1225_v37, %v1224_v17  ;;  %v1246_v53 = vrot.slane %v1245_v35, 1  ;;  %v2011_v8 = vadd.f32 %v1983_v50, %v1979_v51  ;;  %v2025_v23 = vadd.f32 %v1985_v16, %v1981_v54  ;;  %v1950_v12 = vpop.f32.mrb[22].mxu1  ;;  %v5272_v59 = vpop.f32.mrb[25].mxu0 }
 0x16c   : > { %v5274_v44 = vadd.f32 %v1239_v41, %v1238_v31  ;;  %v5276_v4 = vadd.f32 %v1232_v63, %v1231_v48  ;;  %v2018_v55 = vadd.f32 %v1984_v7, %v1980_v38  ;;  %v2032_v15 = vadd.f32 %v1986_v40, %v1982_v5  ;;  %v1952_v43 = vpop.f32.mrb[23].mxu1 }
 0x16d   : > { %5897 = vst [vmem:[#allocation27_spill] sm:$0xff] %v5270_v60  ;;  %v5280_v62 = vmul.f32 %v5270_v60, %v5270_v60  ;;  %v5282_v2 = vadd.f32 %v1246_v53, %v1245_v35  ;;  %v2012_v17 = vrot.slane %v2011_v8, 4  ;;  %v2026_v37 = vrot.slane %v2025_v23, 4 }
 0x16e   : > { %5898 = vst [vmem:[#allocation28_spill] sm:$0xff] %v5274_v44  ;;  %5899 = vst [vmem:[#allocation29_spill] sm:$0xff] %v5276_v4  ;;  %v5286_v50 = vmul.f32 %v5274_v44, %v5274_v44  ;;  %v5290_v51 = vmul.f32 %v5276_v4, %v5276_v4  ;;  %v2019_v16 = vrot.slane %v2018_v55, 4  ;;  %v2033_v54 = vrot.slane %v2032_v15, 4  ;;  %v5292_v40 = vpop.f32.mrb[26].mxu0 }
 0x16f   : > { %5900 = vst [vmem:[#allocation30_spill] sm:$0xff] %v5280_v62  ;;  %5901 = vst [vmem:[#allocation31_spill] sm:$0xff] %v5282_v2  ;;  %v5296_v31 = vmul.f32 %v5282_v2, %v5282_v2  ;;  %v2013_v35 = vadd.f32 %v2012_v17, %v2011_v8  ;;  %v2027_v48 = vadd.f32 %v2026_v37, %v2025_v23  ;;  %v5300_v5 = vpop.f32.mrb[24].mxu1  ;;  %v5302_v41 = vpop.f32.mrb[27].mxu0 }
 0x170   : > { %5902 = vst [vmem:[#allocation32_spill] sm:$0xff] %v5286_v50  ;;  %5903 = vst [vmem:[#allocation33_spill] sm:$0xff] %v5290_v51  ;;  %v1987_v38 = vmul.f32 %v5233_v52, %v4958_v20  ;;  %v2020_v63 = vadd.f32 %v2019_v16, %v2018_v55  ;;  %v2034_v7 = vadd.f32 %v2033_v54, %v2032_v15  ;;  %v5307_v4 = vpop.f32.mrb[25].mxu1 }
 0x171   : > { %5904 = vst [vmem:[#allocation34_spill] sm:$0xff] %v5296_v31  ;;  %v1989_v53 = vmul.f32 %v1944_v61, %v4968_v14  ;;  %v1988_v51 = vmul.f32 %v5237_v25, %v4998_v26  ;;  %v2014_v2 = vrot.slane %v2013_v35, 2  ;;  %v2028_v31 = vrot.slane %v2027_v48, 2 }
 0x172   : > { %v1990_v8 = vmul.f32 %v1946_v46, %v5097_v28  ;;  %v1991_v23 = vmul.f32 %v1837_v19, %v5007_v32  ;;  %v2021_v52 = vrot.slane %v2020_v63, 2  ;;  %v2035_v17 = vrot.slane %v2034_v7, 2  ;;  %v5313_v15 = vpop.f32.mrb[28].mxu0 }
 0x173   : > { %v1993_v37 = vmul.f32 %v1950_v12, %v5099_v24  ;;  %v1992_v55 = vmul.f32 %v1839_v34, %v5101_v36  ;;  %v2015_v61 = vadd.f32 %v2014_v2, %v2013_v35  ;;  %v2029_v16 = vadd.f32 %v2028_v31, %v2027_v48  ;;  %v1962_v50 = vpop.f32.mrb[26].mxu1  ;;  %v5316_v62 = vpop.f32.mrb[29].mxu0 }
 0x174   : > { %v2039_v54 = vadd.f32 %v1991_v23, %v1987_v38  ;;  %v1994_v25 = vmul.f32 %v1952_v43, %v5104_v39  ;;  %v2022_v44 = vadd.f32 %v2021_v52, %v2020_v63  ;;  %v2036_v46 = vadd.f32 %v2035_v17, %v2034_v7  ;;  %v1964_v49 = vpop.f32.mrb[27].mxu1 }
 0x175   : > { %v2053_v60 = vadd.f32 %v1993_v37, %v1989_v53  ;;  %v2046_v19 = vadd.f32 %v1992_v55, %v1988_v51  ;;  %v2016_v13 = vrot.slane %v2015_v61, 1  ;;  %v2030_v9 = vrot.slane %v2029_v16, 1 }
 0x176   : > { %v2040_v12 = vrot.slane %v2039_v54, 4  ;;  %v2060_v45 = vadd.f32 %v1994_v25, %v1990_v8  ;;  %v2023_v34 = vrot.slane %v2022_v44, 1  ;;  %v2037_v29 = vrot.slane %v2036_v46, 1  ;;  %v5318_v31 = vpop.f32.mrb[30].mxu0 }
 0x177   : > { %v2054_v6 = vrot.slane %v2053_v60, 4  ;;  %v2047_v2 = vrot.slane %v2046_v19, 4  ;;  %v2017_v35 = vadd.f32 %v2016_v13, %v2015_v61  ;;  %v2031_v43 = vadd.f32 %v2030_v9, %v2029_v16  ;;  %v5320_v23 = vpop.f32.mrb[28].mxu1  ;;  %v5322_v63 = vpop.f32.mrb[31].mxu0 }
 0x178   : > { %v2041_v48 = vadd.f32 %v2040_v12, %v2039_v54  ;;  %v2061_v38 = vrot.slane %v2060_v45, 4  ;;  %v2024_v51 = vadd.f32 %v2023_v34, %v2022_v44  ;;  %v2038_v7 = vadd.f32 %v2037_v29, %v2036_v46  ;;  %v5324_v17 = vpop.f32.mrb[29].mxu1 }
 0x179   : > { %v2055_v53 = vadd.f32 %v2054_v6, %v2053_v60  ;;  %v2048_v52 = vadd.f32 %v2047_v2, %v2046_v19  ;;  %v5327_v8 = vadd.f32 %v2017_v35, %v5165_v58  ;;  %v2139_v37 = vmul.f32 %v2017_v35, %v2017_v35 }
 0x17a   : > { %v5330_v55 = vadd.f32 %v2031_v43, %v5179_v18  ;;  %v2141_v13 = vmul.f32 %v2031_v43, %v2031_v43  ;;  %v5333_v9 = vadd.f32 %v2024_v51, %v5168_v1  ;;  %v2140_v61 = vmul.f32 %v2024_v51, %v2024_v51  ;;  %v5338_v6 = vpop.f32.mrb[32].mxu0 }
 0x17b   : > { %v5336_v16 = vadd.f32 %v2038_v7, %v5182_v57  ;;  %v2142_v29 = vmul.f32 %v2038_v7, %v2038_v7  ;;  %v5341_v60 = vadd.f32 %v2139_v37, %v5172_v33  ;;  %v2042_v44 = vrot.slane %v2041_v48, 2  ;;  %v5346_v54 = vpop.f32.mrb[30].mxu1  ;;  %v5348_v25 = vpop.f32.mrb[33].mxu0 }
 0x17c   : > { %v5344_v58 = vadd.f32 %v2141_v13, %v5187_v3  ;;  %v2056_v18 = vrot.slane %v2055_v53, 2  ;;  %v5351_v1 = vadd.f32 %v2140_v61, %v5176_v47  ;;  %v2049_v46 = vrot.slane %v2048_v52, 2  ;;  %v5356_v12 = vpop.f32.mrb[31].mxu1 }
 0x17d   : > { %v5354_v57 = vadd.f32 %v2142_v29, %v5192_v11  ;;  %v2062_v19 = vadd.f32 %v2061_v38, %v2060_v45  ;;  %v2043_v33 = vadd.f32 %v2042_v44, %v2041_v48  ;;  %v1995_v3 = vmul.f32 %v5268_v22, %v4958_v20 }
 0x17e   : > { %5905 = vst [vmem:[#allocation35_spill] sm:$0xff] %v5351_v1  ;;  %v2057_v34 = vadd.f32 %v2056_v18, %v2055_v53  ;;  %v1997_v2 = vmul.f32 %v5300_v5, %v4968_v14  ;;  %v2050_v35 = vadd.f32 %v2049_v46, %v2048_v52  ;;  %v1996_v47 = vmul.f32 %v5272_v59, %v4998_v26  ;;  %v5366_v51 = vpop.f32.mrb[34].mxu0 }
 0x17f   : > { %5906 = vst [vmem:[#allocation36_spill] sm:$0xff] %v5354_v57  ;;  %v2063_v43 = vrot.slane %v2062_v19, 2  ;;  %v1998_v11 = vmul.f32 %v5307_v4, %v5097_v28  ;;  %v2044_v45 = vrot.slane %v2043_v33, 1  ;;  %v1999_v48 = vmul.f32 %v5292_v40, %v5007_v32  ;;  %v5371_v7 = vpop.f32.mrb[32].mxu1  ;;  %v5373_v5 = vpop.f32.mrb[35].mxu0 }
 0x180   : > { %v2058_v38 = vrot.slane %v2057_v34, 1  ;;  %v2001_v22 = vmul.f32 %v1962_v50, %v5099_v24  ;;  %v2051_v53 = vrot.slane %v2050_v35, 1  ;;  %v2000_v59 = vmul.f32 %v5302_v41, %v5101_v36  ;;  %v5378_v37 = vpop.f32.mrb[33].mxu1 }
 0x181   : > { %v2064_v52 = vadd.f32 %v2063_v43, %v2062_v19  ;;  %v2002_v4 = vmul.f32 %v1964_v49, %v5104_v39  ;;  %v2045_v13 = vadd.f32 %v2044_v45, %v2043_v33  ;;  %v2067_v29 = vadd.f32 %v1999_v48, %v1995_v3 }
 0x182   : > { %v2059_v61 = vadd.f32 %v2058_v38, %v2057_v34  ;;  %v2081_v44 = vadd.f32 %v2001_v22, %v1997_v2  ;;  %v2052_v40 = vadd.f32 %v2051_v53, %v2050_v35  ;;  %v2074_v50 = vadd.f32 %v2000_v59, %v1996_v47  ;;  %v5380_v57 = vpop.f32.mrb[36].mxu0 }
 0x183   : > { %v2065_v18 = vrot.slane %v2064_v52, 1  ;;  %v2088_v46 = vadd.f32 %v2002_v4, %v1998_v11  ;;  %v5383_v1 = vadd.f32 %v2045_v13, %v5194_v30  ;;  %v2143_v19 = vmul.f32 %v2045_v13, %v2045_v13  ;;  %v5388_v43 = vpop.f32.mrb[34].mxu1  ;;  %v5390_v33 = vpop.f32.mrb[37].mxu0 }
 0x184   : > { %v5386_v41 = vadd.f32 %v2059_v61, %v5210_v0  ;;  %v2145_v49 = vmul.f32 %v2059_v61, %v2059_v61  ;;  %v5393_v34 = vadd.f32 %v2052_v40, %v5197_v42  ;;  %v2144_v3 = vmul.f32 %v2052_v40, %v2052_v40  ;;  %v5395_v47 = vpop.f32.mrb[35].mxu1  ;;  %v5907_v61 = vld [vmem:[#allocation18_spill] sm:$0xff] }
 0x185   : > { %v2066_v2 = vadd.f32 %v2065_v18, %v2064_v52  ;;  %v2068_v35 = vrot.slane %v2067_v29, 4  ;;  %v5398_v30 = vadd.f32 %v2143_v19, %v5202_v27  ;;  %v2082_v0 = vrot.slane %v2081_v44, 4 }
 0x186   : > { %v5401_v11 = vadd.f32 %v2145_v49, %v5220_v10  ;;  %v2075_v45 = vrot.slane %v2074_v50, 4  ;;  %v5404_v38 = vadd.f32 %v2144_v3, %v5207_v21  ;;  %v5409_v53 = vpop.f32.mrb[38].mxu0  ;;  %v2089_v4 = vrot.slane %v2088_v46, 4 }
 0x187   : > { %v5407_v48 = vadd.f32 %v2066_v2, %v5213_v56  ;;  %v2146_v42 = vmul.f32 %v2066_v2, %v2066_v2  ;;  %v2069_v22 = vadd.f32 %v2068_v35, %v2067_v29  ;;  %v2083_v52 = vadd.f32 %v2082_v0, %v2081_v44  ;;  %v5413_v10 = vpop.f32.mrb[36].mxu1  ;;  %v5415_v13 = vpop.f32.mrb[39].mxu0 }
 0x188   : > { %v2076_v59 = vadd.f32 %v2075_v45, %v2074_v50  ;;  %v2003_v27 = vmul.f32 %v5313_v15, %v4958_v20  ;;  %v2005_v56 = vmul.f32 %v5320_v23, %v4968_v14  ;;  %v2004_v29 = vmul.f32 %v5316_v62, %v4998_v26  ;;  %v5424_v44 = vpop.f32.mrb[37].mxu1 }
 0x189   : > { %v5418_v21 = vadd.f32 %v2146_v42, %v5907_v61  ;;  %v2070_v40 = vrot.slane %v2069_v22, 2  ;;  %v2084_v18 = vrot.slane %v2083_v52, 2  ;;  %v2090_v19 = vadd.f32 %v2089_v4, %v2088_v46 }
 0x18a   : > { %v2077_v50 = vrot.slane %v2076_v59, 2  ;;  %v2006_v20 = vmul.f32 %v5324_v17, %v5097_v28  ;;  %v2007_v49 = vmul.f32 %v5318_v31, %v5007_v32  ;;  %v2009_v3 = vmul.f32 %v5346_v54, %v5099_v24  ;;  %v5434_v23 = vpop.f32.mrb[40].mxu0 }
 0x18b   : > { %5908 = vst [vmem:[#allocation18_spill] sm:$0xff] %v5418_v21  ;;  %v2071_v15 = vadd.f32 %v2070_v40, %v2069_v22  ;;  %v2008_v14 = vmul.f32 %v5322_v63, %v5101_v36  ;;  %v2085_v26 = vadd.f32 %v2084_v18, %v2083_v52  ;;  %v2091_v2 = vrot.slane %v2090_v19, 2  ;;  %v5438_v35 = vpop.f32.mrb[38].mxu1  ;;  %v5440_v28 = vpop.f32.mrb[41].mxu0 }
 0x18c   : > { %v2078_v62 = vadd.f32 %v2077_v50, %v2076_v59  ;;  %v2010_v46 = vmul.f32 %v5356_v12, %v5104_v39  ;;  %v2095_v32 = vadd.f32 %v2007_v49, %v2003_v27  ;;  %v2109_v31 = vadd.f32 %v2009_v3, %v2005_v56  ;;  %v5442_v24 = vpop.f32.mrb[39].mxu1  ;;  %v5909_v56 = vld [vmem:[#allocation19_spill] sm:$0xff]  ;;  %v5912_v49 = vld [vmem:[#allocation20_spill] sm:$0xff] }
 0x18d   : > { %v2072_v17 = vrot.slane %v2071_v15, 1  ;;  %v2102_v0 = vadd.f32 %v2008_v14, %v2004_v29  ;;  %v2086_v54 = vrot.slane %v2085_v26, 1  ;;  %v2092_v63 = vadd.f32 %v2091_v2, %v2090_v19 }
 0x18e   : > { %v2079_v36 = vrot.slane %v2078_v62, 1  ;;  %v2116_v45 = vadd.f32 %v2010_v46, %v2006_v20  ;;  %v2096_v22 = vrot.slane %v2095_v32, 4  ;;  %v2110_v52 = vrot.slane %v2109_v31, 4  ;;  %v5444_v4 = vpop.f32.mrb[42].mxu0  ;;  %v5916_v46 = vld [vmem:[#allocation21_spill] sm:$0xff] }
 0x18f   : > { %v2073_v42 = vadd.f32 %v2072_v17, %v2071_v15  ;;  %v2103_v59 = vrot.slane %v2102_v0, 4  ;;  %v2087_v39 = vadd.f32 %v2086_v54, %v2085_v26  ;;  %v2093_v61 = vrot.slane %v2092_v63, 1  ;;  %v5446_v18 = vpop.f32.mrb[40].mxu1  ;;  %v5448_v27 = vpop.f32.mrb[43].mxu0  ;;  %v5914_v26 = vld [vmem:[#allocation22_spill] sm:$0xff] }
 0x190   : > { %v2080_v12 = vadd.f32 %v2079_v36, %v2078_v62  ;;  %v2117_v40 = vrot.slane %v2116_v45, 4  ;;  %v2097_v19 = vadd.f32 %v2096_v22, %v2095_v32  ;;  %v2111_v20 = vadd.f32 %v2110_v52, %v2109_v31  ;;  %v5453_v15 = vpop.f32.mrb[41].mxu1  ;;  %v5919_v32 = vld [vmem:[#allocation23_spill] sm:$0xff] }
 0x191   : > { %v5451_v29 = vadd.f32 %v2073_v42, %v5909_v56  ;;  %v2147_v50 = vmul.f32 %v2073_v42, %v2073_v42  ;;  %5911 = vst [vmem:[#allocation37_spill] sm:$0xff] %v5453_v15  ;;  %v5456_v3 = vadd.f32 %v2087_v39, %v5912_v49  ;;  %v2149_v14 = vmul.f32 %v2087_v39, %v2087_v39  ;;  %v5921_v42 = vld [vmem:[#allocation25_spill] sm:$0xff] }
 0x192   : > { %v5459_v62 = vadd.f32 %v2080_v12, %v5914_v26  ;;  %v2148_v2 = vmul.f32 %v2080_v12, %v2080_v12  ;;  %v2094_v54 = vadd.f32 %v2093_v61, %v2092_v63  ;;  %v2098_v36 = vrot.slane %v2097_v19, 2  ;;  %v5924_v12 = vld [vmem:[#allocation24_spill] sm:$0xff] }
 0x193   : > { %5910 = vst [vmem:[#allocation19_spill] sm:$0xff] %v5451_v29  ;;  %5913 = vst [vmem:[#allocation20_spill] sm:$0xff] %v5456_v3  ;;  %v5462_v17 = vadd.f32 %v2147_v50, %v5916_v46  ;;  %v2112_v56 = vrot.slane %v2111_v20, 2  ;;  %v5464_v29 = vpop.f32.mrb[44].mxu0  ;;  %v5467_v31 = vadd.f32 %v2149_v14, %v5919_v32  ;;  %v2104_v52 = vadd.f32 %v2103_v59, %v2102_v0  ;;  %v5472_v49 = vpop.f32.mrb[42].mxu1  ;;  %v5927_v32 = vld [vmem:[#allocation10_spill] sm:$0xff] }
 0x194   : > { %5915 = vst [vmem:[#allocation22_spill] sm:$0xff] %v5459_v62  ;;  %5918 = vst [vmem:[#allocation38_spill] sm:$0xff] %v5464_v29  ;;  %v5470_v22 = vadd.f32 %v2148_v2, %v5921_v42  ;;  %v2118_v39 = vadd.f32 %v2117_v40, %v2116_v45  ;;  %v5474_v26 = vpop.f32.mrb[45].mxu0  ;;  %v5477_v50 = vadd.f32 %v2094_v54, %v5924_v12  ;;  %v5479_v62 = vpop.f32.mrb[43].mxu1  ;;  %v5928_v42 = vld [vmem:[#allocation11_spill] sm:$0xff]  ;;  %v5929_v45 = vld [vmem:[#allocation26_spill] sm:$0xff] }
 0x195   : > { %5917 = vst [vmem:[#allocation21_spill] sm:$0xff] %v5462_v17  ;;  %5920 = vst [vmem:[#allocation23_spill] sm:$0xff] %v5467_v31  ;;  %v2150_v63 = vmul.f32 %v2094_v54, %v2094_v54  ;;  %v2099_v61 = vadd.f32 %v2098_v36, %v2097_v19  ;;  %v2113_v46 = vadd.f32 %v2112_v56, %v2111_v20  ;;  %v2105_v3 = vrot.slane %v2104_v52, 2  ;;  %v5931_v12 = vld [vmem:[#allocation12_spill] sm:$0xff]  ;;  %v5933_v56 = vld [vmem:[#allocation14_spill] sm:$0xff] }
 0x196   : > { %5922 = vst [vmem:[#allocation25_spill] sm:$0xff] %v5470_v22  ;;  %5923 = vst [vmem:[#allocation39_spill] sm:$0xff] %v5474_v26  ;;  %v2119_v14 = vrot.slane %v2118_v39, 2  ;;  %v2854_v2 = vmul.f32 %v5338_v6, %v5927_v32  ;;  %v2856_v0 = vmul.f32 %v5371_v7, %v5928_v42  ;;  %v2855_v54 = vmul.f32 %v5348_v25, %v5931_v12  ;;  %v5490_v19 = vpop.f32.mrb[46].mxu0  ;;  %v5934_v31 = vld [vmem:[#allocation13_spill] sm:$0xff]  ;;  %v5938_v25 = vld [vmem:[#allocation16_spill] sm:$0xff] }
 0x197   : > { %5925 = vst [vmem:[#allocation24_spill] sm:$0xff] %v5477_v50  ;;  %5926 = vst [vmem:[#allocation40_spill] sm:$0xff] %v5479_v62  ;;  %v5486_v59 = vadd.f32 %v2150_v63, %v5929_v45  ;;  %v2100_v40 = vrot.slane %v2099_v61, 1  ;;  %v2114_v22 = vrot.slane %v2113_v46, 1  ;;  %v2106_v20 = vadd.f32 %v2105_v3, %v2104_v52  ;;  %v5496_v17 = vpop.f32.mrb[44].mxu1  ;;  %v5498_v7 = vpop.f32.mrb[47].mxu0 }
 0x198   : > { %5932 = vst [vmem:[#allocation11_spill] sm:$0xff] %v5490_v19  ;;  %v2120_v36 = vadd.f32 %v2119_v14, %v2118_v39  ;;  %v2857_v50 = vmul.f32 %v5378_v37, %v5933_v56  ;;  %v2858_v6 = vmul.f32 %v5366_v51, %v5934_v31  ;;  %5935 = vst [vmem:[#allocation26_spill] sm:$0xff] %v5496_v17  ;;  %v5504_v3 = vpop.f32.mrb[45].mxu1  ;;  %v5940_v14 = vld [vmem:[#allocation17_spill] sm:$0xff]  ;;  %v5941_v29 = vld [vmem:[#allocation27_spill] sm:$0xff] }
 0x199   : > { %5930 = vst [vmem:[#allocation10_spill] sm:$0xff] %v5486_v59  ;;  %5936 = vst [vmem:[#allocation12_spill] sm:$0xff] %v5498_v7  ;;  %v2101_v63 = vadd.f32 %v2100_v40, %v2099_v61  ;;  %v2115_v45 = vadd.f32 %v2114_v22, %v2113_v46  ;;  %v5937_v59 = vld [vmem:[#allocation15_spill] sm:$0xff]  ;;  %v2859_v19 = vmul.f32 %v5373_v5, %v5938_v25  ;;  %v2107_v52 = vrot.slane %v2106_v20, 1  ;;  %v5943_v61 = vld [vmem:[#allocation28_spill] sm:$0xff] }
 0x19a   : > { %v2860_v26 = vmul.f32 %v5388_v43, %v5937_v59  ;;  %5939 = vst [vmem:[#allocation14_spill] sm:$0xff] %v5504_v3  ;;  %v2121_v39 = vrot.slane %v2120_v36, 1  ;;  %v2886_v37 = vadd.f32 %v2858_v6, %v2854_v2  ;;  %v2861_v51 = vmul.f32 %v5395_v47, %v5940_v14  ;;  %v5945_v3 = vld [vmem:[#allocation30_spill] sm:$0xff]  ;;  %v5946_v2 = vld [vmem:[#allocation32_spill] sm:$0xff] }
 0x19b   : > { %v5509_v17 = vadd.f32 %v2101_v63, %v5941_v29  ;;  %v2151_v7 = vmul.f32 %v2101_v63, %v2101_v63  ;;  %v5512_v22 = vadd.f32 %v2115_v45, %v5943_v61  ;;  %v2153_v46 = vmul.f32 %v2115_v45, %v2115_v45  ;;  %v5514_v15 = vpop.f32.mrb[46].mxu1  ;;  %v5947_v63 = vld [vmem:[#allocation29_spill] sm:$0xff] }
 0x19c   : > { %v2108_v43 = vadd.f32 %v2107_v52, %v2106_v20  ;;  %v2122_v40 = vadd.f32 %v2121_v39, %v2120_v36  ;;  %v2887_v62 = vrot.slane %v2886_v37, 4  ;;  %v2900_v5 = vadd.f32 %v2860_v26, %v2856_v0  ;;  %v5949_v20 = vld [vmem:[#allocation31_spill] sm:$0xff] }
 0x19d   : > { %5942 = vst [vmem:[#allocation13_spill] sm:$0xff] %v5509_v17  ;;  %5944 = vst [vmem:[#allocation15_spill] sm:$0xff] %v5512_v22  ;;  %v5517_v21 = vadd.f32 %v2151_v7, %v5945_v3  ;;  %v5520_v6 = vadd.f32 %v2153_v46, %v5946_v2  ;;  %v2893_v47 = vadd.f32 %v2859_v19, %v2855_v54  ;;  %v5522_v17 = vpop.f32.mrb[47].mxu1  ;;  %v5951_v3 = vld [vmem:[#allocation33_spill] sm:$0xff]  ;;  %v5953_v46 = vld [vmem:[#allocation34_spill] sm:$0xff] }
 0x19e   : > { %v2907_v29 = vadd.f32 %v2861_v51, %v2857_v50  ;;  %v5525_v61 = vadd.f32 %v2108_v43, %v5947_v63  ;;  %v2152_v45 = vmul.f32 %v2108_v43, %v2108_v43  ;;  %v5528_v36 = vadd.f32 %v2122_v40, %v5949_v20 }
 0x19f   : > { %v2154_v26 = vmul.f32 %v2122_v40, %v2122_v40  ;;  %v2888_v0 = vadd.f32 %v2887_v62, %v2886_v37  ;;  %v2901_v52 = vrot.slane %v2900_v5, 4  ;;  %v2894_v39 = vrot.slane %v2893_v47, 4 }
 0x1a0   : > { %5948 = vst [vmem:[#allocation16_spill] sm:$0xff] %v5525_v61  ;;  %5950 = vst [vmem:[#allocation17_spill] sm:$0xff] %v5528_v36  ;;  %v2908_v7 = vrot.slane %v2907_v29, 4  ;;  %v5531_v22 = vadd.f32 %v2152_v45, %v5951_v3  ;;  %v2862_v50 = vmul.f32 %v5380_v57, %v5927_v32  ;;  %v2864_v19 = vmul.f32 %v5413_v10, %v5928_v42 }
 0x1a1   : > { %v5534_v54 = vadd.f32 %v2154_v26, %v5953_v46  ;;  %v2889_v51 = vrot.slane %v2888_v0, 2  ;;  %v2902_v43 = vadd.f32 %v2901_v52, %v2900_v5  ;;  %v2895_v2 = vadd.f32 %v2894_v39, %v2893_v47 }
 0x1a2   : > { %5952 = vst [vmem:[#allocation27_spill] sm:$0xff] %v5531_v22  ;;  %v2909_v40 = vadd.f32 %v2908_v7, %v2907_v29  ;;  %v2863_v62 = vmul.f32 %v5390_v33, %v5931_v12  ;;  %v2865_v37 = vmul.f32 %v5424_v44, %v5933_v56  ;;  %v2866_v63 = vmul.f32 %v5409_v53, %v5934_v31 }
 0x1a3   : > { %5954 = vst [vmem:[#allocation28_spill] sm:$0xff] %v5534_v54  ;;  %v2868_v45 = vmul.f32 %v5438_v35, %v5937_v59  ;;  %v2890_v57 = vadd.f32 %v2889_v51, %v2888_v0  ;;  %v2903_v20 = vrot.slane %v2902_v43, 2  ;;  %v2896_v26 = vrot.slane %v2895_v2, 2 }
 0x1a4   : > { %v2910_v10 = vrot.slane %v2909_v40, 2  ;;  %v2914_v3 = vadd.f32 %v2866_v63, %v2862_v50  ;;  %v2867_v47 = vmul.f32 %v5415_v13, %v5938_v25  ;;  %v2869_v33 = vmul.f32 %v5442_v24, %v5940_v14 }
 0x1a5   : > { %v2928_v5 = vadd.f32 %v2868_v45, %v2864_v19  ;;  %v2891_v29 = vrot.slane %v2890_v57, 1  ;;  %v2904_v44 = vadd.f32 %v2903_v20, %v2902_v43  ;;  %v2897_v52 = vadd.f32 %v2896_v26, %v2895_v2 }
 0x1a6   : > { %v2911_v39 = vadd.f32 %v2910_v10, %v2909_v40  ;;  %v2915_v53 = vrot.slane %v2914_v3, 4  ;;  %v2921_v46 = vadd.f32 %v2867_v47, %v2863_v62  ;;  %v2935_v35 = vadd.f32 %v2869_v33, %v2865_v37 }
 0x1a7   : > { %v2929_v7 = vrot.slane %v2928_v5, 4  ;;  %v2892_v0 = vadd.f32 %v2891_v29, %v2890_v57  ;;  %v2905_v51 = vrot.slane %v2904_v44, 1  ;;  %v2898_v54 = vrot.slane %v2897_v52, 1  ;;  %v5955_v29 = vld [vmem:[#allocation35_spill] sm:$0xff] }
 0x1a8   : > { %v2912_v36 = vrot.slane %v2911_v39, 1  ;;  %v2916_v50 = vadd.f32 %v2915_v53, %v2914_v3  ;;  %v2922_v63 = vrot.slane %v2921_v46, 4  ;;  %v2936_v45 = vrot.slane %v2935_v35, 4 }
 0x1a9   : > { %v2930_v19 = vadd.f32 %v2929_v7, %v2928_v5  ;;  %v2998_v13 = vadd.f32 %v2892_v0, %v5327_v8  ;;  %v3014_v22 = vmul.f32 %v2892_v0, %v2892_v0  ;;  %v2906_v24 = vadd.f32 %v2905_v51, %v2904_v44 }
 0x1aa   : > { %v2899_v61 = vadd.f32 %v2898_v54, %v2897_v52  ;;  %v2913_v43 = vadd.f32 %v2912_v36, %v2911_v39  ;;  %v2917_v2 = vrot.slane %v2916_v50, 2  ;;  %v2923_v20 = vadd.f32 %v2922_v63, %v2921_v46 }
 0x1ab   : > { %v2931_v40 = vrot.slane %v2930_v19, 2  ;;  %v3030_v62 = vadd.f32 %v3014_v22, %v5341_v60  ;;  %v3046_v37 = vmul.f32 0.33333334, %v2998_v13  ;;  %v3000_v57 = vadd.f32 %v2906_v24, %v5330_v55  ;;  %v5956_v60 = vld [vmem:[#allocation36_spill] sm:$0xff] }
 0x1ac   : > { %v3016_v26 = vmul.f32 %v2906_v24, %v2906_v24  ;;  %v2999_v10 = vadd.f32 %v2899_v61, %v5333_v9  ;;  %v3015_v3 = vmul.f32 %v2899_v61, %v2899_v61  ;;  %v3001_v5 = vadd.f32 %v2913_v43, %v5336_v16 }
 0x1ad   : > { %v3017_v47 = vmul.f32 %v2913_v43, %v2913_v43  ;;  %v3062_v8 = vmul.f32 0.33333334, %v3030_v62  ;;  %v3078_v33 = vmul.f32 %v3046_v37, %v3046_v37  ;;  %v3048_v36 = vmul.f32 0.33333334, %v3000_v57 }
 0x1ae   : > { %v3032_v54 = vadd.f32 %v3016_v26, %v5344_v58  ;;  %v3031_v44 = vadd.f32 %v3015_v3, %v5955_v29  ;;  %v5559_v52 = vmul.f32 0.33333334, %v2999_v10  ;;  %v5562_v39 = vmul.f32 0.33333334, %v3001_v5 }
 0x1af   : > { %v3033_v22 = vadd.f32 %v3017_v47, %v5956_v60  ;;  %v3094_v55 = vsub.f32 %v3062_v8, %v3078_v33  ;;  %v3080_v9 = vmul.f32 %v3048_v36, %v3048_v36  ;;  %v2918_v61 = vadd.f32 %v2917_v2, %v2916_v50 }
 0x1b0   : > { %v3064_v53 = vmul.f32 0.33333334, %v3032_v54  ;;  %v3063_v7 = vmul.f32 0.33333334, %v3031_v44  ;;  %v3079_v16 = vmul.f32 %v5559_v52, %v5559_v52  ;;  %v3081_v58 = vmul.f32 %v5562_v39, %v5562_v39 }
 0x1b1   : > { %v3065_v46 = vmul.f32 0.33333334, %v3033_v22  ;;  %v3110_v0 = vmax.f32 %v3094_v55, 0.0  ;;  %v2919_v63 = vrot.slane %v2918_v61, 1  ;;  %v2932_v13 = vadd.f32 %v2931_v40, %v2930_v19 }
 0x1b2   : > { %v3096_v51 = vsub.f32 %v3064_v53, %v3080_v9  ;;  %v3095_v24 = vsub.f32 %v3063_v7, %v3079_v16  ;;  %v2924_v62 = vrot.slane %v2923_v20, 2  ;;  %v2937_v57 = vadd.f32 %v2936_v45, %v2935_v35 }
 0x1b3   : > { %v3097_v43 = vsub.f32 %v3065_v46, %v3081_v58  ;;  %v3126_v26 = vsub.f32 0.0, %v3110_v0  ;;  %v2920_v3 = vadd.f32 %v2919_v63, %v2918_v61  ;;  %v2933_v50 = vrot.slane %v2932_v13, 1 }
 0x1b4   : > { %v3112_v10 = vmax.f32 %v3096_v51, 0.0  ;;  %v3111_v2 = vmax.f32 %v3095_v24, 0.0  ;;  %v2925_v47 = vadd.f32 %v2924_v62, %v2923_v20  ;;  %v2938_v19 = vrot.slane %v2937_v57, 2 }
 0x1b5   : > { %v3113_v5 = vmax.f32 %v3097_v43, 0.0  ;;  %v3002_v33 = vadd.f32 %v2920_v3, %v5383_v1  ;;  %v3018_v54 = vmul.f32 %v2920_v3, %v2920_v3  ;;  %v2934_v44 = vadd.f32 %v2933_v50, %v2932_v13 }
 0x1b6   : > { %v3128_v8 = vsub.f32 0.0, %v3112_v10  ;;  %v3127_v29 = vsub.f32 0.0, %v3111_v2  ;;  %v2926_v60 = vrot.slane %v2925_v47, 1  ;;  %v3142_v40 = vmul.f32 1.442695, %v3126_v26 }
 0x1b7   : > { %v3129_v22 = vsub.f32 0.0, %v3113_v5  ;;  %v3034_v35 = vadd.f32 %v3018_v54, %v5398_v30  ;;  %v3050_v45 = vmul.f32 0.33333334, %v3002_v33  ;;  %v3004_v55 = vadd.f32 %v2934_v44, %v5386_v41 }
 0x1b8   : > { %v3020_v53 = vmul.f32 %v2934_v44, %v2934_v44  ;;  %v3146_v9 = vmul.f32 1.442695, %v3128_v8  ;;  %v3144_v1 = vmul.f32 1.442695, %v3127_v29  ;;  %v2927_v58 = vadd.f32 %v2926_v60, %v2925_v47 }
 0x1b9   : > { %v3066_v61 = vmul.f32 0.33333334, %v3034_v35  ;;  %v3082_v20 = vmul.f32 %v3050_v45, %v3050_v45  ;;  %v5572_v7 = vsel %vm3198_vm7, %v3050_v45, %v3046_v37  ;;  %v3052_v46 = vmul.f32 0.33333334, %v3004_v55 }
 0x1ba   : > { %v3036_v16 = vadd.f32 %v3020_v53, %v5401_v11  ;;  %4053 = vpow2.f32 %v3142_v40  ;;  %v5575_v0 = vmul.f32 1.442695, %v3129_v22  ;;  %v2939_v30 = vadd.f32 %v2938_v19, %v2937_v57  ;;  %v5957_v19 = vld [vmem:[#allocation18_spill] sm:$0xff] }
 0x1bb   : > { %v3098_v51 = vsub.f32 %v3066_v61, %v3082_v20  ;;  %v3084_v13 = vmul.f32 %v3052_v46, %v3052_v46  ;;  %v5578_v41 = vsel %vm3198_vm7, %v3052_v46, %v3048_v36  ;;  %v3003_v24 = vadd.f32 %v2927_v58, %v5393_v34 }
 0x1bc   : > { %v3068_v63 = vmul.f32 0.33333334, %v3036_v16  ;;  %4055 = vpow2.f32 %v3146_v9  ;;  %v3019_v43 = vmul.f32 %v2927_v58, %v2927_v58  ;;  %v2940_v62 = vrot.slane %v2939_v30, 1 }
 0x1bd   : > { %v3114_v37 = vmax.f32 %v3098_v51, 0.0  ;;  %4057 = vpow2.f32 %v3144_v1  ;;  %v3051_v26 = vmul.f32 0.33333334, %v3003_v24  ;;  %v2870_v10 = vmul.f32 %v5434_v23, %v5927_v32 }
 0x1be   : > { %v3100_v11 = vsub.f32 %v3068_v63, %v3084_v13  ;;  %v3035_v57 = vadd.f32 %v3019_v43, %v5404_v38  ;;  %v2941_v50 = vadd.f32 %v2940_v62, %v2939_v30  ;;  %v2874_v36 = vmul.f32 %v5444_v4, %v5934_v31  ;;  %v5959_v30 = vld [vmem:[#allocation40_spill] sm:$0xff] }
 0x1bf   : > { %v3130_v3 = vsub.f32 0.0, %v3114_v37  ;;  %v3083_v5 = vmul.f32 %v3051_v26, %v3051_v26  ;;  %v5588_v34 = vsel %vm3198_vm7, %v3051_v26, %v5559_v52  ;;  %v2872_v47 = vmul.f32 %v5446_v18, %v5928_v42  ;;  %v5960_v26 = vld [vmem:[#allocation38_spill] sm:$0xff] }
 0x1c0   : > { %v3116_v2 = vmax.f32 %v3100_v11, 0.0  ;;  %v3067_v8 = vmul.f32 0.33333334, %v3035_v57  ;;  %v3005_v33 = vadd.f32 %v2941_v50, %v5407_v48  ;;  %v3021_v23 = vmul.f32 %v2941_v50, %v2941_v50 }
 0x1c1   : > { %v2871_v38 = vmul.f32 %v5440_v28, %v5931_v12  ;;  %v2942_v29 = vadd.f32 %v2874_v36, %v2870_v10  ;;  %v2876_v4 = vmul.f32 %v5472_v49, %v5937_v59  ;;  %v2875_v44 = vmul.f32 %v5448_v27, %v5938_v25  ;;  %v5958_v27 = vld [vmem:[#allocation37_spill] sm:$0xff]  ;;  %v5961_v36 = vld [vmem:[#allocation26_spill] sm:$0xff] }
 0x1c2   : > { %v3132_v54 = vsub.f32 0.0, %v3116_v2  ;;  %v3150_v52 = vmul.f32 1.442695, %v3130_v3  ;;  %v3099_v60 = vsub.f32 %v3067_v8, %v3083_v5  ;;  %v3037_v40 = vadd.f32 %v3021_v23, %v5957_v19  ;;  %v5962_v8 = vld [vmem:[#allocation39_spill] sm:$0xff] }
 0x1c3   : > { %v3053_v18 = vmul.f32 0.33333334, %v3005_v33  ;;  %v2943_v35 = vrot.slane %v2942_v29, 4  ;;  %v2956_v48 = vadd.f32 %v2876_v4, %v2872_v47  ;;  %v2949_v45 = vadd.f32 %v2875_v44, %v2871_v38  ;;  %v5963_v23 = vld [vmem:[#allocation11_spill] sm:$0xff]  ;;  %v5964_v44 = vld [vmem:[#allocation14_spill] sm:$0xff] }
 0x1c4   : > { %v3154_v22 = vmul.f32 1.442695, %v3132_v54  ;;  %v5600_v55 = vpop.eup %4053  ;;  %v3115_v28 = vmax.f32 %v3099_v60, 0.0  ;;  %v3069_v53 = vmul.f32 0.33333334, %v3037_v40  ;;  %v2873_v61 = vmul.f32 %v5958_v27, %v5933_v56 }
 0x1c5   : > { %v3085_v9 = vmul.f32 %v3053_v18, %v3053_v18  ;;  %v5604_v49 = vsel %vm3198_vm7, %v3053_v18, %v5562_v39  ;;  %v2944_v20 = vadd.f32 %v2943_v35, %v2942_v29  ;;  %v2957_v1 = vrot.slane %v2956_v48, 4 }
 0x1c6   : > { %v2950_v16 = vrot.slane %v2949_v45, 4  ;;  %v5608_v46 = vpop.eup %4055  ;;  %4059 = vpow2.f32 %v3150_v52  ;;  %v3131_v58 = vsub.f32 0.0, %v3115_v28  ;;  %v2877_v63 = vmul.f32 %v5959_v30, %v5940_v14  ;;  %v5966_v28 = vld [vmem:[#allocation19_spill] sm:$0xff]  ;;  %v5968_v30 = vld [vmem:[#allocation20_spill] sm:$0xff] }
 0x1c7   : > { %v3101_v51 = vsub.f32 %v3069_v53, %v3085_v9  ;;  %v5612_v13 = vpop.eup %4057  ;;  %4061 = vpow2.f32 %v3154_v22  ;;  %v2945_v24 = vrot.slane %v2944_v20, 2  ;;  %v2958_v39 = vadd.f32 %v2957_v1, %v2956_v48 }
 0x1c8   : > { %v2951_v37 = vadd.f32 %v2950_v16, %v2949_v45  ;;  %v3152_v43 = vmul.f32 1.442695, %v3131_v58  ;;  %v2963_v11 = vadd.f32 %v2877_v63, %v2873_v61  ;;  %v2878_v10 = vmul.f32 %v5960_v26, %v5927_v32  ;;  %v5967_v58 = vld [vmem:[#allocation21_spill] sm:$0xff] }
 0x1c9   : > { %v3117_v62 = vmax.f32 %v3101_v51, 0.0  ;;  %v2946_v3 = vadd.f32 %v2945_v24, %v2944_v20  ;;  %v2959_v57 = vrot.slane %v2958_v39, 2  ;;  %v2880_v2 = vmul.f32 %v5961_v36, %v5928_v42 }
 0x1ca   : > { %v2952_v50 = vrot.slane %v2951_v37, 2  ;;  %v2964_v47 = vrot.slane %v2963_v11, 4  ;;  %v2879_v33 = vmul.f32 %v5962_v8, %v5931_v12  ;;  %v2882_v38 = vmul.f32 %v5963_v23, %v5934_v31  ;;  %v5965_v12 = vld [vmem:[#allocation12_spill] sm:$0xff] }
 0x1cb   : > { %v3133_v5 = vsub.f32 0.0, %v3117_v62  ;;  %v2947_v54 = vrot.slane %v2946_v3, 1  ;;  %v2960_v29 = vadd.f32 %v2959_v57, %v2958_v39  ;;  %v5624_v32 = vmul.f32 %v5964_v44, %v5933_v56  ;;  %v5969_v39 = vld [vmem:[#allocation22_spill] sm:$0xff]  ;;  %v5970_v57 = vld [vmem:[#allocation23_spill] sm:$0xff] }
 0x1cc   : > { %v2953_v4 = vadd.f32 %v2952_v50, %v2951_v37  ;;  %4063 = vpow2.f32 %v3152_v43  ;;  %v2965_v52 = vadd.f32 %v2964_v47, %v2963_v11  ;;  %v2970_v60 = vadd.f32 %v2882_v38, %v2878_v10 }
 0x1cd   : > { %v2884_v42 = vmul.f32 %v5514_v15, %v5937_v59  ;;  %v2948_v19 = vadd.f32 %v2947_v54, %v2946_v3  ;;  %v2961_v40 = vrot.slane %v2960_v29, 1  ;;  %v2883_v22 = vmul.f32 %v5965_v12, %v5938_v25 }
 0x1ce   : > { %v2954_v18 = vrot.slane %v2953_v4, 1  ;;  %v5630_v31 = vmul.f32 1.442695, %v3133_v5  ;;  %v2966_v35 = vrot.slane %v2965_v52, 2  ;;  %v2971_v48 = vrot.slane %v2970_v60, 4 }
 0x1cf   : > { %v2984_v45 = vadd.f32 %v2884_v42, %v2880_v2  ;;  %v3006_v56 = vadd.f32 %v2948_v19, %v5966_v28  ;;  %v3022_v53 = vmul.f32 %v2948_v19, %v2948_v19  ;;  %v2962_v9 = vadd.f32 %v2961_v40, %v2960_v29  ;;  %v5971_v2 = vld [vmem:[#allocation25_spill] sm:$0xff]  ;;  %v5972_v42 = vld [vmem:[#allocation24_spill] sm:$0xff]  ;;  %v5973_v28 = vld [vmem:[#allocation10_spill] sm:$0xff] }
 0x1d0   : > { %v2955_v27 = vadd.f32 %v2954_v18, %v2953_v4  ;;  %v5633_v61 = vpop.eup %4059  ;;  %v2967_v20 = vadd.f32 %v2966_v35, %v2965_v52  ;;  %v2972_v15 = vadd.f32 %v2971_v48, %v2970_v60  ;;  %v2977_v1 = vadd.f32 %v2883_v22, %v2879_v33 }
 0x1d1   : > { %v2985_v59 = vrot.slane %v2984_v45, 4  ;;  %v5635_v16 = vpop.eup %4061  ;;  %v3038_v25 = vadd.f32 %v3022_v53, %v5967_v58  ;;  %v3054_v51 = vmul.f32 0.33333334, %v3006_v56  ;;  %v3008_v63 = vadd.f32 %v2962_v9, %v5968_v30 }
 0x1d2   : > { %v3024_v24 = vmul.f32 %v2962_v9, %v2962_v9  ;;  %v3007_v37 = vadd.f32 %v2955_v27, %v5969_v39  ;;  %v3023_v43 = vmul.f32 %v2955_v27, %v2955_v27  ;;  %v2968_v62 = vrot.slane %v2967_v20, 1 }
 0x1d3   : > { %v2973_v11 = vrot.slane %v2972_v15, 2  ;;  %v3070_v26 = vmul.f32 0.33333334, %v3038_v25  ;;  %v3086_v10 = vmul.f32 %v3054_v51, %v3054_v51  ;;  %v3201_v3 = vsel %vm3200_vm8, %v3054_v51, %v5572_v7  ;;  %v5974_v51 = vld [vmem:[#allocation13_spill] sm:$0xff] }
 0x1d4   : > { %v3040_v50 = vadd.f32 %v3024_v24, %v5970_v57  ;;  %v3056_v36 = vmul.f32 0.33333334, %v3008_v63  ;;  %v3039_v5 = vadd.f32 %v3023_v43, %v5971_v2  ;;  %v5644_v47 = vmul.f32 0.33333334, %v3007_v37 }
 0x1d5   : > { %v2969_v8 = vadd.f32 %v2968_v62, %v2967_v20  ;;  %v3102_v33 = vsub.f32 %v3070_v26, %v3086_v10  ;;  %v2974_v38 = vadd.f32 %v2973_v11, %v2972_v15  ;;  %v2986_v54 = vadd.f32 %v2985_v59, %v2984_v45 }
 0x1d6   : > { %v3072_v23 = vmul.f32 0.33333334, %v3040_v50  ;;  %v5646_v29 = vpop.eup %4063  ;;  %v3088_v4 = vmul.f32 %v3056_v36, %v3056_v36  ;;  %v3208_v44 = vsel %vm3200_vm8, %v3056_v36, %v5578_v41  ;;  %v3071_v7 = vmul.f32 0.33333334, %v3039_v5 }
 0x1d7   : > { %v3087_v52 = vmul.f32 %v5644_v47, %v5644_v47  ;;  %v3118_v60 = vmax.f32 %v3102_v33, 0.0  ;;  %v3009_v19 = vadd.f32 %v2969_v8, %v5972_v42  ;;  %v3025_v40 = vmul.f32 %v2969_v8, %v2969_v8  ;;  %v5975_v33 = vld [vmem:[#allocation15_spill] sm:$0xff] }
 0x1d8   : > { %v2975_v18 = vrot.slane %v2974_v38, 1  ;;  %v3104_v12 = vsub.f32 %v3072_v23, %v3088_v4  ;;  %v2987_v35 = vrot.slane %v2986_v54, 2  ;;  %v2978_v48 = vrot.slane %v2977_v1, 4 }
 0x1d9   : > { %v3103_v22 = vsub.f32 %v3071_v7, %v3087_v52  ;;  %v3134_v45 = vsub.f32 0.0, %v3118_v60  ;;  %v3041_v56 = vadd.f32 %v3025_v40, %v5973_v28  ;;  %v5654_v53 = vmul.f32 0.33333334, %v3009_v19  ;;  %v3174_v40 = vld [vmem:[%s5666_s20] sm:$0x77] }
 0x1da   : > { %v2976_v9 = vadd.f32 %v2975_v18, %v2974_v38  ;;  %v3120_v41 = vmax.f32 %v3104_v12, 0.0  ;;  %v2988_v20 = vadd.f32 %v2987_v35, %v2986_v54  ;;  %v2979_v15 = vadd.f32 %v2978_v48, %v2977_v1 }
 0x1db   : > { %v3119_v27 = vmax.f32 %v3103_v22, 0.0  ;;  %v3158_v59 = vmul.f32 1.442695, %v3134_v45  ;;  %v3073_v58 = vmul.f32 0.33333334, %v3041_v56  ;;  %v3089_v25 = vmul.f32 %v5654_v53, %v5654_v53 }
 0x1dc   : > { %v3010_v30 = vadd.f32 %v2976_v9, %v5974_v51  ;;  %v3136_v63 = vsub.f32 0.0, %v3120_v41  ;;  %v3026_v39 = vmul.f32 %v2976_v9, %v2976_v9  ;;  %v2989_v37 = vrot.slane %v2988_v20, 1  ;;  %v5977_v9 = vld [vmem:[#allocation27_spill] sm:$0xff] }
 0x1dd   : > { %v3135_v24 = vsub.f32 0.0, %v3119_v27  ;;  %4065 = vpow2.f32 %v3158_v59  ;;  %v3105_v43 = vsub.f32 %v3073_v58, %v3089_v25  ;;  %v2980_v11 = vrot.slane %v2979_v15, 2 }
 0x1de   : > { %v3058_v62 = vmul.f32 0.33333334, %v3010_v30  ;;  %v3162_v26 = vmul.f32 1.442695, %v3136_v63  ;;  %v3042_v1 = vadd.f32 %v3026_v39, %v5517_v21  ;;  %v2990_v57 = vadd.f32 %v2989_v37, %v2988_v20  ;;  %v3175_v37 = vld [vmem:[%s5666_s20 + $0x8] sm:$0x77] }
 0x1df   : > { %v3160_v10 = vmul.f32 1.442695, %v3135_v24  ;;  %v3121_v50 = vmax.f32 %v3105_v43, 0.0  ;;  %v2981_v5 = vadd.f32 %v2980_v11, %v2979_v15  ;;  %v2885_v4 = vmul.f32 %v5522_v17, %v5940_v14  ;;  %v5976_v14 = vld [vmem:[#allocation16_spill] sm:$0xff]  ;;  %s377_s20 = sand.u32 1, %s4190_s30  }
 0x1e0   : > { %v3090_v36 = vmul.f32 %v3058_v62, %v3058_v62  ;;  %v3203_v2 = vsel %vm3202_vm9, %v3058_v62, %v3201_v3  ;;  %4067 = vpow2.f32 %v3162_v26  ;;  %v3074_v8 = vmul.f32 0.33333334, %v3042_v1  ;;  %s3810_s1 = sshll.u32 %s377_s20, 2  ;;  %s3669_s27 = scalar_lea.sflag [#allocation4], %s377_s20 }
 0x1e1   : > { %v3012_v23 = vadd.f32 %v2990_v57, %v5975_v33  ;;  %v3028_v38 = vmul.f32 %v2990_v57, %v2990_v57  ;;  %4069 = vpow2.f32 %v3160_v10  ;;  %v3137_v54 = vsub.f32 0.0, %v3121_v50  ;;  %s379_s22 = scalar_lea.vmem [#allocation6], %s3810_s1 }
 0x1e2   : > { %v2982_v21 = vrot.slane %v2981_v5, 1  ;;  %4071 = vpow2.f32 %v5630_v31  ;;  %v3106_v3 = vsub.f32 %v3074_v8, %v3090_v36  ;;  %v2991_v19 = vadd.f32 %v2885_v4, %v5624_v32  ;;  %v3262_v4 = vld [vmem:[%s5852_s6 + $0x8] sm:$0xff]  ;;  %s3685_s23 = sshll.u32 %s379_s22, 4  ;;  %s5801_s23 = int_to_ptr.vmem [resolvable:$true] %s3685_s23 }
 0x1e3   : > { %v3044_v7 = vadd.f32 %v3028_v38, %v5520_v6  ;;  %v3060_v52 = vmul.f32 0.33333334, %v3012_v23  ;;  %v3164_v60 = vmul.f32 1.442695, %v3137_v54  ;;  %v3205_v18 = vsel %vm3200_vm8, %v5644_v47, %v5588_v34  ;;  %v5978_v38 = vld [vmem:[#allocation17_spill] sm:$0xff]  ;;  %s4124_s28 = scalar_lea.vmem %s5801_s23, 64  ;;  %p4131_p0 = scmp.lt.s32.totalorder %s5801_s23, %s4129_s13 }
 0x1e4   : > { %v2983_v42 = vadd.f32 %v2982_v21, %v2981_v5  ;;  %v3122_v12 = vmax.f32 %v3106_v3, 0.0  ;;  %v2992_v6 = vrot.slane %v2991_v19, 4  ;;  %v3178_v32 = vcombine.high %v3174_v40, %v3174_v40  ;;  %p4125_p10 = scmp.ne.s32.totalorder %s5801_s23, %s4124_s28  ;;  %p4132_p1 = scmp.lt.s32.totalorder %s4130_s15, %s4124_s28 }
 0x1e5   : > { %v3076_v22 = vmul.f32 0.33333334, %v3044_v7  ;;  %v3092_v35 = vmul.f32 %v3060_v52, %v3060_v52  ;;  %v3209_v17 = vsel %vm3202_vm9, %v3060_v52, %v3208_v44  ;;  %4073 = vpow2.f32 %v3164_v60  ;;  %v5979_v7 = vld [vmem:[#allocation28_spill] sm:$0xff] }
 0x1e6   : > { %v3011_v31 = vadd.f32 %v2983_v42, %v5976_v14  ;;  %v3027_v48 = vmul.f32 %v2983_v42, %v2983_v42  ;;  %4075 = vpow2.f32 %v5575_v0  ;;  %v3138_v45 = vsub.f32 0.0, %v3122_v12  ;;  %p4126_p11 = pnand %p4125_p10, %p4302_p4  ;;  %p4133_p2 = por %p4132_p1, %p4131_p0 }
 0x1e7   : > { %v3108_v28 = vsub.f32 %v3076_v22, %v3092_v35  ;;  %v4066_v56 = vpop.eup %4065  ;;  %v2993_v34 = vadd.f32 %v2992_v6, %v2991_v19  ;;  %v3211_v43 = vsel %vm3200_vm8, %v5654_v53, %v5604_v49  ;;  %v3248_v1 = vsel %vm3247_vm10, %v3174_v40, %v3203_v2  ;;  %v3261_v49 = vld [vmem:[%s5852_s6] sm:$0xff]  ;;  %v3501_v35 = vld [vmem:[%s5853_s7 + $0x8] sm:$0xff] }
 0x1e8   : > { %v3043_v41 = vadd.f32 %v3027_v48, %v5977_v9  ;;  %v3059_v27 = vmul.f32 0.33333334, %v3011_v31  ;;  %v3166_v47 = vmul.f32 1.442695, %v3138_v45  ;;  %v3234_v10 = vsel %vm3233_vm11, %v4066_v56, %v5633_v61  ;;  %v3500_v22 = vld [vmem:[%s5853_s7] sm:$0xff]  ;;  %v3503_v56 = vld [vmem:[%s5853_s7 + $0x18] sm:$0xff]  ;;  %p4127_p13 = pneg %p4126_p11 }
 0x1e9   : > { %v3124_v20 = vmax.f32 %v3108_v28, 0.0  ;;  %v2994_v59 = vrot.slane %v2993_v34, 2  ;;  %v3250_v61 = vsel %vm3247_vm10, %v3175_v37, %v3209_v17  ;;  %v4210_v8 = vmov 0  }
 0x1ea   : > { %v3075_v44 = vmul.f32 0.33333334, %v3043_v41  ;;  %v3091_v15 = vmul.f32 %v3059_v27, %v3059_v27  ;;  %v3206_v58 = vsel %vm3202_vm9, %v3059_v27, %v3205_v18  ;;  %v4068_v0 = vpop.eup %4067  ;;  %4077 = vpow2.f32 %v3166_v47  ;;  %4049 = vset.pattern.permute.xlu0 %v4210_v8  ;;  %4050 = vset.pattern.permute.xlu1 %v4210_v8  ;;  %p4134_p3 = pnand %p4133_p2, %p4127_p13 }
 0x1eb   : > { %v3140_v25 = vsub.f32 0.0, %v3124_v20  ;;  %v3249_v51 = vsel %vm3247_vm10, %v3178_v32, %v3206_v58  ;;  %v4070_v30 = vpop.eup %4069  ;;  %v2995_v24 = vadd.f32 %v2994_v59, %v2993_v34  ;;  %v3239_v36 = vsel %vm3233_vm11, %v4068_v0, %v5635_v16  ;;  %3267 = vperm.xlu0 %4049, %v3261_v49   ;;  %v3502_v32 = vld [vmem:[%s5853_s7 + $0x10] sm:$0xff]  ;;  %v3258_v58 = vld [vmem:[%s5851_s5 + $0x8] sm:$0xff] }
 0x1ec   : > { %v3107_v63 = vsub.f32 %v3075_v44, %v3091_v15  ;;  %v5685_v39 = vsel %vm3252_vm12, %v3249_v51, %v5612_v13  ;;  %v4072_v62 = vpop.eup %4071  ;;  %v3237_v26 = vsel %vm3233_vm11, %v4070_v30, %v5646_v29  ;;  %v3253_v13 = vsel %vm3252_vm12, %v3248_v1, %v5600_v55  ;;  %v3263_v29 = vld [vmem:[%s5852_s6 + $0x10] sm:$0xff]  ;;  %v3257_v15 = vld [vmem:[%s5851_s5] sm:$0xff] }
 0x1ed   : > { %v3170_v11 = vmul.f32 1.442695, %v3140_v25  ;;  %v2996_v50 = vrot.slane %v2995_v24, 1  ;;  %v5709_v55 = vsel %vm3252_vm12, %v3250_v61, %v5608_v46  ;;  %3277 = vperm.xlu1 %4050, %v3263_v29   ;;  %v3264_v46 = vld [vmem:[%s5852_s6 + $0x18] sm:$0xff]  ;;  %v3179_v3 = vcombine.high %v3175_v37, %v3175_v37  ;;  %v3259_v51 = vld [vmem:[%s5851_s5 + $0x10] sm:$0xff] }
 0x1ee   : > { %v3123_v57 = vmax.f32 %v3107_v63, 0.0  ;;  %v5982_v59 = vmov 0.0   ;;  %v3260_v63 = vld [vmem:[%s5851_s5 + $0x18] sm:$0xff] }
 0x1ef   : > { %4079 = vpow2.f32 %v3170_v11  ;;  %v4074_v53 = vpop.eup %4073  ;;  %v2997_v5 = vadd.f32 %v2996_v50, %v2995_v24  ;;  %3272 = vperm.xlu0 %4049, %v3262_v4  }
 0x1f0   : > { %v3139_v2 = vsub.f32 0.0, %v3123_v57  ;;  %v4076_v16 = vpop.eup %4075  ;;  %v3241_v33 = vsel %vm3233_vm11, %v4074_v53, %v4072_v62 }
 0x1f1   : > { %v3013_v54 = vadd.f32 %v2997_v5, %v5978_v38  ;;  %v3029_v21 = vmul.f32 %v2997_v5, %v2997_v5  ;;  %3282 = vperm.xlu1 %4050, %v3264_v46  }
 0x1f2   : > { %v3168_v23 = vmul.f32 1.442695, %v3139_v2 }
 0x1f3   : > { %v3045_v52 = vadd.f32 %v3029_v21, %v5979_v7  ;;  %v3061_v60 = vmul.f32 0.33333334, %v3013_v54  ;;  %3506 = vperm.xlu0 %4049, %v3500_v22  }
 0x1f4   : > { %4081 = vpow2.f32 %v3168_v23  ;;  %v4078_v42 = vpop.eup %4077 }
 0x1f5   : > { %v3077_v19 = vmul.f32 0.33333334, %v3045_v52  ;;  %v3093_v40 = vmul.f32 %v3061_v60, %v3061_v60  ;;  %v3212_v18 = vsel %vm3202_vm9, %v3061_v60, %v3211_v43  ;;  %v3236_v12 = vsel %vm3235_vm13, %v4078_v42, %v3234_v10  ;;  %3511 = vperm.xlu1 %4050, %v3501_v35  }
 0x1f6   : > { %v3251_v17 = vsel %vm3247_vm10, %v3179_v3, %v3212_v18  ;;  %v3956_v14 = vpack.c.bf16 %v3236_v12, %v3253_v13 }
 0x1f7   : > { %v3109_v31 = vsub.f32 %v3077_v19, %v3093_v40  ;;  %v3256_v48 = vsel %vm3252_vm12, %v3251_v17, %v4076_v16  ;;  %3516 = vperm.xlu0 %4049, %v3502_v32  }
 0x1f9   : > { %v4080_v6 = vpop.eup %4079  ;;  %v3125_v45 = vmax.f32 %v3109_v31, 0.0  ;;  %3521 = vperm.xlu1 %4050, %v3503_v56  }
 0x1fa   : > { %v3240_v28 = vsel %vm3235_vm13, %v4080_v6, %v3239_v36 }
 0x1fb   : > { %v3962_v9 = vpack.c.bf16 %v3240_v28, %v5709_v55  ;;  %v3141_v41 = vsub.f32 0.0, %v3125_v45 }
 0x1fd   : > { %v3172_v34 = vmul.f32 1.442695, %v3141_v41 }
 0x1fe   : > { %v4082_v27 = vpop.eup %4081 }
 0x1ff   : > { %v3238_v47 = vsel %vm3235_vm13, %v4082_v27, %v3237_v26  ;;  %4083 = vpow2.f32 %v3172_v34 }
 0x200   : > { %v3953_v44 = vpack.c.bf16 %v3238_v47, %v5685_v39 }
 0x202   : > { %3955 = vmatprep.subr.msk.bf16.mxu0 %vm5740_vm15, %v3953_v44 }
 0x203   : > { %3958 = vmatpush1.bf16.msk.msra.mxu0 %vm5740_vm15, %v3956_v14 }
 0x206   : > { %3912 = vmatmul.mubr.msk.f32.vlgmr.msra.gmra.mrb[48].mxu0 %vm3285_vm0, %v3257_v15 }
 0x207   : > { %3376 = vmatprep.mubr.f32.mxu0 %v5982_v59 }
 0x209   : > { %v4084_v0 = vpop.eup %4083 }
 0x20a   : > { %3913 = vmatmul.mubr.msk.f32.gmra.mrb[50].mxu0 %vm3285_vm0, %v3258_v58  ;;  %v3242_v25 = vsel %vm3235_vm13, %v4084_v0, %v3241_v33 }
 0x20b   : > { %3382 = vmatprep.mubr.f32.mxu0 %v5982_v59  ;;  %v3959_v30 = vpack.c.bf16 %v3242_v25, %v3256_v48 }
 0x20d   : > { %3961 = vmatprep.subr.msk.bf16.mxu1 %vm5740_vm15, %v3959_v30 }
 0x20e   : > { %3914 = vmatmul.mubr.msk.f32.gmra.mrb[52].mxu0 %vm3285_vm0, %v3259_v51  ;;  %3964 = vmatpush1.bf16.msk.msra.mxu1 %vm5740_vm15, %v3962_v9 }
 0x20f   : > { %3388 = vmatprep.mubr.f32.mxu0 %v5982_v59 }
 0x211   : > { %3918 = vmatmul.mubr.msk.f32.vlgmr.msra.gmra.mrb[48].mxu1 %vm3285_vm0, %v3257_v15 }
 0x212   : > { %3915 = vmatmul.mubr.msk.f32.gmra.mrb[54].mxu0 %vm3285_vm0, %v3260_v63  ;;  %3465 = vmatprep.mubr.f32.mxu1 %v5982_v59 }
 0x215   : > { %3919 = vmatmul.mubr.msk.f32.gmra.mrb[50].mxu1 %vm3285_vm0, %v3258_v58 }
 0x216   : > { %3471 = vmatprep.mubr.f32.mxu1 %v5982_v59 }
 0x219   : > { %3920 = vmatmul.mubr.msk.f32.gmra.mrb[52].mxu1 %vm3285_vm0, %v3259_v51 }
 0x21a   : > { %3477 = vmatprep.mubr.f32.mxu1 %v5982_v59 }
 0x21d   : > { %3921 = vmatmul.mubr.msk.f32.gmra.mrb[54].mxu1 %vm3285_vm0, %v3260_v63 }
 0x26a   : > { %v3268_v24 = vpop.permute.xlu0 %3267 }
 0x26c   : > { %v5780_v39 = vpop.permute.xlu1 %3277 }
 0x26e   : > { %v3273_v37 = vpop.permute.xlu0 %3272 }
 0x270   : > { %v5782_v10 = vpop.permute.xlu1 %3282 }
 0x272   : > { %v3507_v36 = vpop.permute.xlu0 %3506 }
 0x274   : > { %v3512_v5 = vpop.permute.xlu1 %3511 }
 0x276   : > { %v3517_v4 = vpop.permute.xlu0 %3516 }
 0x278   : > { %v3522_v28 = vpop.permute.xlu1 %3521 }
 0x2d9   : > { %v3372_v43 = vpop.f32.mrb[48].mxu0 }
 0x2da   : > { %v3373_v62 = vadd.f32 %v3372_v43, %v3268_v24  ;;  %v3374_v11 = vpop.f32.mrb[49].mxu0 }
 0x2db   : > { %v3375_v26 = vadd.f32 %v3374_v11, %v3268_v24 }
 0x2dc   : > { %v3484_v57 = vmax.f32 %v3373_v62, 0.0 }
 0x2dd   : > { %v3378_v1 = vpop.f32.mrb[50].mxu0  ;;  %v3485_v49 = vmax.f32 %v3375_v26, 0.0 }
 0x2de   : > { %v3379_v50 = vadd.f32 %v3378_v1, %v3273_v37  ;;  %v3380_v13 = vpop.f32.mrb[51].mxu0  ;;  %v3524_v55 = vmul.f32 %v3507_v36, %v3484_v57 }
 0x2df   : > { %v3381_v29 = vadd.f32 %v3380_v13, %v3273_v37  ;;  %v3525_v23 = vmul.f32 %v3507_v36, %v3485_v49 }
 0x2e0   : > { %v3488_v61 = vmax.f32 %v3379_v50, 0.0 }
 0x2e1   : > { %v3489_v53 = vmax.f32 %v3381_v29, 0.0  ;;  %v3384_v2 = vpop.f32.mrb[52].mxu0 }
 0x2e2   : > { %v3385_v8 = vadd.f32 %v3384_v2, %v5780_v39  ;;  %v3386_v16 = vpop.f32.mrb[53].mxu0  ;;  %v3528_v33 = vmul.f32 %v3512_v5, %v3488_v61 }
 0x2e3   : > { %v3387_v38 = vadd.f32 %v3386_v16, %v5780_v39  ;;  %v3529_v54 = vmul.f32 %v3512_v5, %v3489_v53 }
 0x2e4   : > { %v3492_v21 = vmax.f32 %v3385_v8, 0.0  ;;  %v3540_v46 = vadd.f32 %v3528_v33, %v3524_v55  ;;  %v3461_v3 = vpop.f32.mrb[48].mxu1 }
 0x2e5   : > { %v3493_v7 = vmax.f32 %v3387_v38, 0.0  ;;  %v3390_v52 = vpop.f32.mrb[54].mxu0  ;;  %v3549_v60 = vadd.f32 %v3529_v54, %v3525_v23  ;;  %v3462_v42 = vadd.f32 %v3461_v3, %v3268_v24  ;;  %v3463_v19 = vpop.f32.mrb[49].mxu1 }
 0x2e6   : > { %v3391_v40 = vadd.f32 %v3390_v52, %v5782_v10  ;;  %v3392_v18 = vpop.f32.mrb[55].mxu0  ;;  %v3532_v12 = vmul.f32 %v3517_v4, %v3492_v21  ;;  %v3464_v22 = vadd.f32 %v3463_v19, %v3268_v24 }
 0x2e7   : > { %v3393_v35 = vadd.f32 %v3392_v18, %v5782_v10  ;;  %v3533_v17 = vmul.f32 %v3517_v4, %v3493_v7  ;;  %v3486_v32 = vmax.f32 %v3462_v42, 0.0 }
 0x2e8   : > { %v3496_v14 = vmax.f32 %v3391_v40, 0.0  ;;  %v3541_v31 = vadd.f32 %v3540_v46, %v3532_v12  ;;  %v3467_v48 = vpop.f32.mrb[50].mxu1  ;;  %v3487_v27 = vmax.f32 %v3464_v22, 0.0  ;;  %v3577_v46 = vstv %s3576_s17 }
 0x2e9   : > { %v3497_v6 = vmax.f32 %v3393_v35, 0.0  ;;  %v3550_v45 = vadd.f32 %v3549_v60, %v3533_v17  ;;  %v3468_v56 = vadd.f32 %v3467_v48, %v3273_v37  ;;  %v3469_v9 = vpop.f32.mrb[51].mxu1  ;;  %v3526_v0 = vmul.f32 %v3507_v36, %v3486_v32 }
 0x2ea   : > { %v3536_v41 = vmul.f32 %v3522_v28, %v3496_v14  ;;  %v3470_v34 = vadd.f32 %v3469_v9, %v3273_v37  ;;  %v3527_v24 = vmul.f32 %v3507_v36, %v3487_v27 }
 0x2eb   : > { %v3537_v47 = vmul.f32 %v3522_v28, %v3497_v6  ;;  %v3490_v20 = vmax.f32 %v3468_v56, 0.0 }
 0x2ec   : > { %v3542_v44 = vadd.f32 %v3541_v31, %v3536_v41  ;;  %v3491_v15 = vmax.f32 %v3470_v34, 0.0  ;;  %v3473_v59 = vpop.f32.mrb[52].mxu1 }
 0x2ed   : > { %v3551_v58 = vadd.f32 %v3550_v45, %v3537_v47  ;;  %v3474_v25 = vadd.f32 %v3473_v59, %v5780_v39  ;;  %v3475_v51 = vpop.f32.mrb[53].mxu1  ;;  %v3530_v30 = vmul.f32 %v3512_v5, %v3490_v20 }
 0x2ee   : > { %v3543_v63 = vrot.slane %v3542_v44, 4  ;;  %v3476_v43 = vadd.f32 %v3475_v51, %v5780_v39  ;;  %v3531_v62 = vmul.f32 %v3512_v5, %v3491_v15 }
 0x2ef   : > { %v3552_v11 = vrot.slane %v3551_v58, 4  ;;  %v3494_v26 = vmax.f32 %v3474_v25, 0.0  ;;  %v3558_v37 = vadd.f32 %v3530_v30, %v3526_v0 }
 0x2f0   : > { %v3544_v1 = vadd.f32 %v3543_v63, %v3542_v44  ;;  %v3495_v57 = vmax.f32 %v3476_v43, 0.0  ;;  %v3479_v50 = vpop.f32.mrb[54].mxu1  ;;  %v3567_v13 = vadd.f32 %v3531_v62, %v3527_v24 }
 0x2f1   : > { %v3553_v49 = vadd.f32 %v3552_v11, %v3551_v58  ;;  %v3480_v29 = vadd.f32 %v3479_v50, %v5782_v10  ;;  %v3481_v61 = vpop.f32.mrb[55].mxu1  ;;  %v3534_v53 = vmul.f32 %v3517_v4, %v3494_v26 }
 0x2f2   : > { %v3545_v2 = vrot.slane %v3544_v1, 2  ;;  %v3482_v55 = vadd.f32 %v3481_v61, %v5782_v10  ;;  %v3535_v36 = vmul.f32 %v3517_v4, %v3495_v57 }
 0x2f3   : > { %v3554_v8 = vrot.slane %v3553_v49, 2  ;;  %v3498_v39 = vmax.f32 %v3480_v29, 0.0  ;;  %v3559_v5 = vadd.f32 %v3558_v37, %v3534_v53 }
 0x2f4   : > { %v3546_v16 = vadd.f32 %v3545_v2, %v3544_v1  ;;  %v3499_v33 = vmax.f32 %v3482_v55, 0.0  ;;  %v3568_v23 = vadd.f32 %v3567_v13, %v3535_v36 }
 0x2f5   : > { %v3555_v38 = vadd.f32 %v3554_v8, %v3553_v49  ;;  %v3538_v54 = vmul.f32 %v3522_v28, %v3498_v39 }
 0x2f6   : > { %v3547_v21 = vrot.slane %v3546_v16, 1  ;;  %v3539_v3 = vmul.f32 %v3522_v28, %v3499_v33 }
 0x2f7   : > { %v3556_v7 = vrot.slane %v3555_v38, 1  ;;  %v3560_v60 = vadd.f32 %v3559_v5, %v3538_v54 }
 0x2f8   : > { %v3548_v52 = vadd.f32 %v3547_v21, %v3546_v16  ;;  %v3569_v19 = vadd.f32 %v3568_v23, %v3539_v3 }
 0x2f9   : > { %v3557_v42 = vadd.f32 %v3556_v7, %v3555_v38  ;;  %v3561_v40 = vrot.slane %v3560_v60, 4 }
 0x2fa   : > { %v3578_v18 = vadd.f32 %v3577_v46, %v3548_v52  ;;  %v3570_v10 = vrot.slane %v3569_v19, 4 }
 0x2fb   : > { %v3579_v4 = vadd.f32 %v3577_v46, %v3557_v42  ;;  %v3562_v12 = vadd.f32 %v3561_v40, %v3560_v60  ;;  %v4212_v40 = vmov 1966171168  }
 0x2fc   : > { %v3586_v22 = vand.u32 2147483647, %v3578_v18  ;;  %v3571_v35 = vadd.f32 %v3570_v10, %v3569_v19  ;;  %v3582_v57 = vmax.f32 %v3578_v18, 0.0  ;;  %v3641_v18 = vunpack.c.l.s4 %v4212_v40 }
 0x2fd   : > { %v3587_v17 = vand.u32 2147483647, %v3579_v4  ;;  %v3563_v14 = vrot.slane %v3562_v12, 2  ;;  %v3583_v13 = vmax.f32 %v3579_v4, 0.0 }
 0x2fe   : > { %v3590_v31 = vsub.f32 0.0, %v3586_v22  ;;  %v3572_v48 = vrot.slane %v3571_v35, 2  ;;  %v3642_v4 = vunpack.c.0.s8 %v3641_v18  ;;  %v5983_v22 = vld [vmem:[#allocation9_spill] sm:$0xff] }
 0x2ff   : > { %v3591_v6 = vsub.f32 0.0, %v3587_v17  ;;  %v3564_v45 = vadd.f32 %v3563_v14, %v3562_v12 }
 0x300   : > { %v3594_v32 = vmul.f32 1.442695, %v3590_v31  ;;  %v3573_v28 = vadd.f32 %v3572_v48, %v3571_v35  ;;  %v3645_v35 = vsub.s32 %v3642_v4, %v5983_v22 }
 0x301   : > { %v3596_v56 = vmul.f32 1.442695, %v3591_v6  ;;  %v3565_v9 = vrot.slane %v3564_v45, 1 }
 0x302   : > { %4085 = vpow2.f32 %v3594_v32  ;;  %v3574_v41 = vrot.slane %v3573_v28, 1 }
 0x303   : > { %4087 = vpow2.f32 %v3596_v56  ;;  %v3566_v27 = vadd.f32 %v3565_v9, %v3564_v45 }
 0x304   : > { %v3575_v34 = vadd.f32 %v3574_v41, %v3573_v28  ;;  %v5984_v28 = vlaneseq }
 0x305   : > { %v3580_v47 = vadd.f32 %v3577_v46, %v3566_v27 }
 0x306   : > { %v3581_v20 = vadd.f32 %v3577_v46, %v3575_v34  ;;  %vm3665_vm1 = vcmp.lt.s32.totalorder %v5984_v28, 512 }
 0x307   : > { %v3588_v44 = vand.u32 2147483647, %v3580_v47  ;;  %v3584_v5 = vmax.f32 %v3580_v47, 0.0 }
 0x308   : > { %v3589_v15 = vand.u32 2147483647, %v3581_v20  ;;  %v3585_v33 = vmax.f32 %v3581_v20, 0.0 }
 0x309   : > { %v3592_v59 = vsub.f32 0.0, %v3588_v44 }
 0x30a   : > { %v3593_v58 = vsub.f32 0.0, %v3589_v15 }
 0x30b   : > { %v3598_v25 = vmul.f32 1.442695, %v3592_v59 }
 0x30c   : > { %v4086_v0 = vpop.eup %4085  ;;  %v3600_v30 = vmul.f32 1.442695, %v3593_v58 }
 0x30d   : > { %v4088_v51 = vpop.eup %4087  ;;  %v3602_v63 = vadd.f32 1.0, %v4086_v0  ;;  %4089 = vpow2.f32 %v3598_v25 }
 0x30e   : > { %v3603_v24 = vadd.f32 1.0, %v4088_v51  ;;  %4091 = vpow2.f32 %v3600_v30 }
 0x30f   : > { %4093 = vlog2.f32 %v3602_v63 }
 0x310   : > { %4095 = vlog2.f32 %v3603_v24 }
 0x317   : > { %v4090_v43 = vpop.eup %4089 }
 0x318   : > { %v4092_v62 = vpop.eup %4091  ;;  %v3604_v11 = vadd.f32 1.0, %v4090_v43 }
 0x319   : > { %v4094_v26 = vpop.eup %4093  ;;  %v3605_v37 = vadd.f32 1.0, %v4092_v62 }
 0x31a   : > { %v4096_v1 = vpop.eup %4095  ;;  %v3607_v50 = vmul.f32 0.6931472, %v4094_v26  ;;  %4097 = vlog2.f32 %v3604_v11 }
 0x31b   : > { %v3609_v49 = vmul.f32 0.6931472, %v4096_v1  ;;  %4099 = vlog2.f32 %v3605_v37 }
 0x31c   : > { %v3614_v29 = vadd.f32 %v3607_v50, %v3582_v57 }
 0x31d   : > { %v3615_v61 = vadd.f32 %v3609_v49, %v3583_v13 }
 0x31e   : > { %v3618_v53 = vsub.f32 0.0, %v3614_v29 }
 0x31f   : > { %v3619_v2 = vsub.f32 0.0, %v3615_v61 }
 0x320   : > { %v3622_v55 = vmul.f32 1.442695, %v3618_v53 }
 0x321   : > { %v3624_v36 = vmul.f32 1.442695, %v3619_v2 }
 0x322   : > { %4101 = vpow2.f32 %v3622_v55 }
 0x323   : > { %4103 = vpow2.f32 %v3624_v36 }
 0x324   : > { %v4098_v8 = vpop.eup %4097 }
 0x325   : > { %v4100_v39 = vpop.eup %4099  ;;  %v3611_v16 = vmul.f32 0.6931472, %v4098_v8 }
 0x326   : > { %v3613_v23 = vmul.f32 0.6931472, %v4100_v39 }
 0x327   : > { %v3616_v38 = vadd.f32 %v3611_v16, %v3584_v5 }
 0x328   : > { %v3617_v54 = vadd.f32 %v3613_v23, %v3585_v33 }
 0x329   : > { %v3620_v21 = vsub.f32 0.0, %v3616_v38 }
 0x32a   : > { %v3621_v46 = vsub.f32 0.0, %v3617_v54 }
 0x32b   : > { %v3626_v3 = vmul.f32 1.442695, %v3620_v21 }
 0x32c   : > { %v4102_v7 = vpop.eup %4101  ;;  %v3628_v52 = vmul.f32 1.442695, %v3621_v46 }
 0x32d   : > { %v4104_v60 = vpop.eup %4103  ;;  %4105 = vpow2.f32 %v3626_v3  ;;  %v3630_v42 = vsub.f32 1.0, %v4102_v7 }
 0x32e   : > { %4107 = vpow2.f32 %v3628_v52  ;;  %v3631_v19 = vsub.f32 1.0, %v4104_v60 }
 0x330   : > { %v3638_v10 = vcombine.low %v3630_v42, %v3631_v19 }
 0x332   : > { %v3646_v6 = vrot.slane %v3638_v10, %v3645_v35 }
 0x337   : > { %v4106_v12 = vpop.eup %4105 }
 0x338   : > { %v4108_v17 = vpop.eup %4107  ;;  %v3632_v14 = vsub.f32 1.0, %v4106_v12 }
 0x339   : > { %v3633_v31 = vsub.f32 1.0, %v4108_v17 }
 0x33b   : > { %v3639_v48 = vcombine.low %v3632_v14, %v3633_v31 }
 0x33d   : > { %v3653_v45 = vrot.slane %v3639_v48, %v3645_v35 }
 0x33f   : > { %v3654_v32 = vcombine.low %v3646_v6, %v3653_v45 }
 0x341   : > { %v3661_v56 = vrot.slane %v3654_v32, %v3645_v35 }
 0x343   : > { %3667 = vst.msk [vmem:[%s379_s22] sm:$0xf] %vm3665_vm1, %v3661_v56 }
 0x344   : > { %4137 = shalt.err (!%p4134_p3)
}
 0x345   : > { %s4138_s17 = scalar_lea.hbm %s5799_s26, 64  ;;  %s4142_s21 = scalar_lea.hbm %s5854_s8, 128 }
 0x346   : > { %p4139_p5 = scmp.ne.s32.totalorder %s5799_s26, %s4138_s17  ;;  %p4143_p9 = scmp.lt.u32.totalorder %s5799_s26, %s5854_s8 }
 0x347   : > { %p4144_p12 = scmp.lt.u32.totalorder %s4142_s21, %s4138_s17  ;;  %p4146_p11 = scmp.lt.u32.totalorder %s4138_s17, %s5799_s26 }
 0x348   : > { %p4140_p6 = pnand %p4139_p5, %p4302_p4 }
 0x349   : > { %p4145_p10 = por %p4144_p12, %p4143_p9 }
 0x34a   : > { %p4141_p7 = pneg %p4140_p6 }
 0x34b   : > { %p4147_p13 = por %p4146_p11, %p4145_p10 }
 0x34d   : > { %p4148_p0 = pnand %p4147_p13, %p4141_p7 }
 0x34f   : > { %4151 = shalt.err (!%p4148_p0)
}
 0x350   : > { %3983 = dma.vmem_to_hbm [thread:$0]  (%p4302_p4), %s5801_s23, 64, %s5799_s26, %s3669_s27  }
 0x351 PF: > { %p3995_p1 = scmp.ge.s32.totalorder %s4206_s12, 2  ;;  %s3697_s25 = sand.u32 1, %s4186_s29  }
 0x352   : > { %s3698_s28 = scalar_lea.sflag [#allocation4], %s3697_s25 }
 0x353   : > { %p3990_p2 = pnand %p3995_p1, %p4309_p8 }
 0x355   : > { %4181 = dma.done.wait (!%p3990_p2), %s3698_s28, 64  }
 0x356   : > { %4183 = vsyncadd (!%p3990_p2), %s3698_s28, 4294967232  ;;  %s23_s12 = sadd.s32 1, %s4206_s12   ;;  %s5985_s29 = smov %s4190_s30 }
 0x357   : > { %p20_p3 = scmp.ge.s32.totalorder %s23_s12, 4   ;;  %s5986_s30 = smov %s4194_s9 }
 0x358   : > { %s5987_s9 = smov %s4315_s19  ;;  %s5988_s10 = smov %s4202_s11 }
 0x359   : > { %s5989_s11 = smov %s5991_s14  ;;  %22 = sbr.rel (!%p20_p3) target bundleno = 7 (0x7), region = 102 }
 0x360   :  { %3703 = vsyncpa [#allocation4], 1 }
 0x361   :  { %3705 = vsyncpa [#allocation4 + $0x1], 1 }
 0x362   :  { %3706 = vsyncpa [#allocation5], 1 }
 0x363   :  { %3708 = vsyncpa [#allocation5 + $0x1], 1 }

</bundles_post_ra>
